<compile_context>
chip_gen: v7x
topology: tpu7x:2x2x1
jax: 0.10.0
libtpu: 0.0.40
codegen_flags: <defaults>
</compile_context>

<pallas_src>
import functools
import math

import jax
import jax.numpy as jnp
from jax.experimental import pallas as pl
from jax.experimental.pallas import tpu as pltpu


def _mtan_kernel(q_ref, k_ref, vb_ref, wqkb_ref, wob_ref, o_ref, *,
                 num_heads, d_k, tb):
    e = q_ref.shape[1]
    sq = q_ref.shape[0] // tb
    sk = k_ref.shape[0] // tb
    d = vb_ref.shape[2]

    # Resident fused weights (constant index maps -> DMA'd once, stay in VMEM).
    wq_t = wqkb_ref[0, :e, :]                               # (E, E)
    bq = wqkb_ref[0, e:e + 1, :]                            # (1, E)
    wk_t = wqkb_ref[1, :e, :]                               # (E, E)
    bk = wqkb_ref[1, e:e + 1, :]                            # (1, E)
    wr = wob_ref[:num_heads * d, :]                         # (H*D, N)
    b_out = wob_ref[num_heads * d:num_heads * d + 1, :]     # (1, N)

    # Fused time-embedding projections for the WHOLE batch block and all heads:
    # one MXU pass each over TB*Sq / TB*Sk rows (Linear: x @ W^T + b).
    q_proj = jnp.dot(q_ref[...], wq_t,
                     preferred_element_type=jnp.float32) + bq   # (TB*Sq, E)
    k_proj = jnp.dot(k_ref[...], wk_t,
                     preferred_element_type=jnp.float32) + bk   # (TB*Sk, E)

    inv_sqrt_dk = 1.0 / math.sqrt(d_k)

    # Hoisted out of all loops: per-head lane masks (JAX does not CSE iota).
    lane = jax.lax.broadcasted_iota(jnp.int32, (1, e), 1)
    head_lanes = [(lane >= h * d_k) & (lane < (h + 1) * d_k)
                  for h in range(num_heads)]

    for i in range(tb):                      # static unroll over the batch block
        qi = q_proj[i * sq:(i + 1) * sq, :]              # (Sq, E)
        ki = k_proj[i * sk:(i + 1) * sk, :]              # (Sk, E)
        v_t = vb_ref[i, 0]                               # (D, Sk) feature-major values
        bias = vb_ref[i, 1]                              # (D, Sk) additive bias (0 / -1e9)

        attn_parts = []
        for h in range(num_heads):           # static unroll; H is tiny
            # Select head h by zeroing the other heads' lanes of the fused q
            # projection: zeroed lanes contribute 0 to the contraction, so the
            # full-E matmul gives exactly the per-head (Sq, Dk) x (Dk, Sk)
            # scores with no sub-128-lane slicing / relayout.
            qh = jnp.where(head_lanes[h], qi, 0.0)
            scores = jax.lax.dot_general(
                qh, ki, (((1,), (1,)), ((), ())),
                preferred_element_type=jnp.float32) * inv_sqrt_dk    # (Sq, Sk)

            # Per-feature masked softmax over Sk, kept un-normalized: reduce a
            # numerator and denominator and do one reciprocal per (d, q)
            # instead of normalizing the full (D, Sq, Sk) probability tensor.
            # NOTE: a fully-masked (d, q) row degenerates to softmax(scores)
            # rather than the exactly-uniform distribution of the PyTorch -1e9
            # fill; both are arbitrary and the case cannot occur with a 0/1
            # observation mask that has >= 1 observation per feature.
            masked = scores[None, :, :] + bias[:, None, :]           # (D, Sq, Sk)
            mmax = jnp.max(masked, axis=-1, keepdims=True)
            ex = jnp.exp(masked - mmax)
            denom = jnp.sum(ex, axis=-1)                             # (D, Sq)
            num = jnp.sum(ex * v_t[:, None, :], axis=-1)             # (D, Sq)
            inv = pl.reciprocal(denom, approx=True)                  # EUP slot
            inv = inv * (2.0 - denom * inv)                          # Newton step -> ~f32 exact
            attn_parts.append(num * inv)                             # (D, Sq)

        # x[i, q, h*D + d] == attn_parts[h][d, q]; one (H*D, Sq)^T @ (H*D, N)
        # matmul against the resident output weight writes this batch item's
        # (Sq, N) output slab directly -- no Sq-tiled weights / flatten tricks.
        attn_all = (attn_parts[0] if num_heads == 1
                    else jnp.concatenate(attn_parts, axis=0))        # (H*D, Sq)
        out_i = jax.lax.dot_general(
            attn_all, wr, (((0,), (0,)), ((), ())),
            preferred_element_type=jnp.float32)                      # (Sq, N)
        o_ref[i] = (out_i + b_out).astype(o_ref.dtype)


def multi_time_attention(query, key, value, mask, params, num_heads,
                         batch_block=None):
    """Pallas implementation of multiTimeAttention.forward (dropout=None)."""
    wq, bq, wk, bk, wout, bout = params
    B, Sq, E = query.shape
    _, Sk, D = value.shape
    H = num_heads
    Dk = E // H
    N = wout.shape[0]

    if batch_block is None:
        # Keep >= 2 grid steps so v7x's 2 TensorCores both get work (batch axis
        # is "parallel"), while amortizing per-step overhead over up to 8 items.
        batch_block = min(8, pl.cdiv(B, 2))
    TB = max(1, min(batch_block, B))
    G = pl.cdiv(B, TB)
    Bp = G * TB

    # ---- plain-JAX glue: layout only (no math proportional to B*Sq*Sk*D) ----
    # Fused resident weights: [Wq^T; bq] / [Wk^T; bk] -> (2, E+1, E),
    # [Wout^T; bout] -> (H*D+1, N).  (PyTorch Linear stores W as (out, in).)
    wqkb = jnp.stack([
        jnp.concatenate([wq.T, bq.reshape(1, E)], axis=0),
        jnp.concatenate([wk.T, bk.reshape(1, E)], axis=0),
    ], axis=0)                                                # (2, E+1, E)
    wob = jnp.concatenate([wout.T, bout.reshape(1, N)], axis=0)   # (H*D+1, N)

    # Feature-major value + additive mask bias (0 observed / -1e9 masked),
    # fused into a single per-batch block.
    v_t = jnp.swapaxes(value, 1, 2)                           # (B, D, Sk)
    bias = (jnp.swapaxes(mask, 1, 2) - 1.0) * 1000000000.0    # (B, D, Sk)
    vb = jnp.stack([v_t, bias], axis=1)                       # (B, 2, D, Sk)

    # Flatten batch into the sublane axis so each grid step's projections are
    # one big MXU pass over TB*Sq / TB*Sk rows.
    q2 = query.reshape(B * Sq, E)
    k2 = key.reshape(B * Sk, E)

    if Bp != B:  # pad batch to a multiple of TB (padded rows are sliced off)
        pad = Bp - B
        q2 = jnp.concatenate([q2, jnp.zeros((pad * Sq, E), q2.dtype)], axis=0)
        k2 = jnp.concatenate([k2, jnp.zeros((pad * Sk, E), k2.dtype)], axis=0)
        vb = jnp.concatenate([vb, jnp.zeros((pad, 2, D, Sk), vb.dtype)], axis=0)

    out = pl.pallas_call(
        functools.partial(_mtan_kernel, num_heads=H, d_k=Dk, tb=TB),
        out_shape=jax.ShapeDtypeStruct((Bp, Sq, N), jnp.float32),
        grid_spec=pltpu.PrefetchScalarGridSpec(
            num_scalar_prefetch=0,
            grid=(G,),                                   # heads & batch block fused per step
            in_specs=[
                pl.BlockSpec((TB * Sq, E), lambda b: (b, 0)),          # queries (batch-flat)
                pl.BlockSpec((TB * Sk, E), lambda b: (b, 0)),          # keys    (batch-flat)
                pl.BlockSpec((TB, 2, D, Sk), lambda b: (b, 0, 0, 0)),  # value + mask bias
                pl.BlockSpec((2, E + 1, E), lambda b: (0, 0, 0)),      # [Wq^T;bq],[Wk^T;bk] resident
                pl.BlockSpec((H * D + 1, N), lambda b: (0, 0)),        # [Wout^T;bout]      resident
            ],
            out_specs=pl.BlockSpec((TB, Sq, N), lambda b: (b, 0, 0)),
        ),
        compiler_params=pltpu.CompilerParams(
            dimension_semantics=("parallel",)),          # batch shards across TCs on v7x
    )(q2, k2, vb, wqkb, wob)

    return out[:B]


def multi_time_attention_ref(query, key, value, mask, params, num_heads):
    """Pure-JAX reference matching the PyTorch forward exactly."""
    wq, bq, wk, bk, wout, bout = params
    B, Sq, E = query.shape
    _, Sk, D = value.shape
    H = num_heads
    Dk = E // H
    q = (query @ wq.T + bq).reshape(B, Sq, H, Dk).transpose(0, 2, 1, 3)
    k = (key @ wk.T + bk).reshape(B, Sk, H, Dk).transpose(0, 2, 1, 3)
    scores = jnp.einsum('bhqe,bhke->bhqk', q, k) / math.sqrt(Dk)
    scores = jnp.broadcast_to(scores[..., None], (B, H, Sq, Sk, D))
    m = mask[:, None, None, :, :]
    scores = jnp.where(m == 0, -1000000000.0, scores)
    p = jax.nn.softmax(scores, axis=-2)
    x = jnp.sum(p * value[:, None, None, :, :], axis=-2)     # (B, H, Sq, D)
    x = x.transpose(0, 2, 1, 3).reshape(B, Sq, H * D)
    return x @ wout.T + bout


if __name__ == "__main__":
    # Module hyper-parameters.
    input_dim = 4        # D
    nhidden = 32         # N
    embed_time = 16      # E
    num_heads = 2        # H  (embed_time % num_heads == 0)

    # Forward-pass shapes (B chosen so batch blocking is exercised: TB=8, grid=(2,)).
    B, Sq, Sk = 16, 8, 16

    key_rng = jax.random.PRNGKey(0)
    ks = jax.random.split(key_rng, 10)

    # Deterministic parameter init (PyTorch Linear convention: W (out, in)).
    scale = 0.1
    wq = scale * jax.random.normal(ks[0], (embed_time, embed_time), jnp.float32)
    bq = scale * jax.random.normal(ks[1], (embed_time,), jnp.float32)
    wk = scale * jax.random.normal(ks[2], (embed_time, embed_time), jnp.float32)
    bk = scale * jax.random.normal(ks[3], (embed_time,), jnp.float32)
    wout = scale * jax.random.normal(ks[4], (nhidden, input_dim * num_heads), jnp.float32)
    bout = scale * jax.random.normal(ks[5], (nhidden,), jnp.float32)
    params = (wq, bq, wk, bk, wout, bout)

    # Inputs.
    query = jax.random.normal(ks[6], (B, Sq, embed_time), jnp.float32)
    key_in = jax.random.normal(ks[7], (B, Sk, embed_time), jnp.float32)
    value = jax.random.normal(ks[8], (B, Sk, input_dim), jnp.float32)
    mask = jax.random.bernoulli(ks[9], 0.7, (B, Sk, input_dim)).astype(jnp.float32)

    out = multi_time_attention(query, key_in, value, mask, params, num_heads)
    out = jax.block_until_ready(out)

    ref = multi_time_attention_ref(query, key_in, value, mask, params, num_heads)
    assert out.shape == (B, Sq, nhidden)
    assert jnp.allclose(out, ref, atol=1e-4, rtol=1e-4), (
        f"max abs err {jnp.max(jnp.abs(out - ref))}")

    print("KERNEL_OK")
</pallas_src>

<mosaic_0001>
module attributes {stable_mosaic.version = 11 : i64} {
  func.func @_mtan_kernel(%arg0: i32, %arg1: memref<64x16xf32, #tpu.memory_space<vmem>>, %arg2: memref<128x16xf32, #tpu.memory_space<vmem>>, %arg3: memref<8x2x4x16xf32, #tpu.memory_space<vmem>>, %arg4: memref<2x17x16xf32, #tpu.memory_space<vmem>>, %arg5: memref<9x32xf32, #tpu.memory_space<vmem>>, %arg6: memref<8x8x32xf32, #tpu.memory_space<vmem>>) attributes {dimension_semantics = [#tpu.dimension_semantics<parallel>], iteration_bounds = array<i64: 2>, scalar_prefetch = 0 : i64, scratch_operands = 0 : i64, tpu.core_type = #tpu.core_type<tc>, window_params = [{transform_indices = @transform_0, window_bounds = array<i64: 64, 16>}, {transform_indices = @transform_1, window_bounds = array<i64: 128, 16>}, {transform_indices = @transform_2, window_bounds = array<i64: 8, 2, 4, 16>}, {pipeline_mode = #tpu.pipeline_mode<synchronous>, transform_indices = @transform_3, window_bounds = array<i64: 2, 17, 16>}, {pipeline_mode = #tpu.pipeline_mode<synchronous>, transform_indices = @transform_4, window_bounds = array<i64: 9, 32>}, {transform_indices = @transform_5, window_bounds = array<i64: 8, 8, 32>}]} {
    %c0 = arith.constant 0 : index
    %c0_0 = arith.constant 0 : index
    %c0_1 = arith.constant 0 : index
    %0 = vector.load %arg4[%c0, %c0_0, %c0_1] : memref<2x17x16xf32, #tpu.memory_space<vmem>>, vector<1x16x16xf32>
    %1 = vector.shape_cast %0 : vector<1x16x16xf32> to vector<16x16xf32>
    %c0_2 = arith.constant 0 : index
    %c16 = arith.constant 16 : index
    %c0_3 = arith.constant 0 : index
    %2 = vector.load %arg4[%c0_2, %c16, %c0_3] : memref<2x17x16xf32, #tpu.memory_space<vmem>>, vector<1x1x16xf32>
    %3 = vector.shape_cast %2 : vector<1x1x16xf32> to vector<1x16xf32>
    %c1 = arith.constant 1 : index
    %c0_4 = arith.constant 0 : index
    %c0_5 = arith.constant 0 : index
    %4 = vector.load %arg4[%c1, %c0_4, %c0_5] : memref<2x17x16xf32, #tpu.memory_space<vmem>>, vector<1x16x16xf32>
    %5 = vector.shape_cast %4 : vector<1x16x16xf32> to vector<16x16xf32>
    %c1_6 = arith.constant 1 : index
    %c16_7 = arith.constant 16 : index
    %c0_8 = arith.constant 0 : index
    %6 = vector.load %arg4[%c1_6, %c16_7, %c0_8] : memref<2x17x16xf32, #tpu.memory_space<vmem>>, vector<1x1x16xf32>
    %7 = vector.shape_cast %6 : vector<1x1x16xf32> to vector<1x16xf32>
    %c0_9 = arith.constant 0 : index
    %c0_10 = arith.constant 0 : index
    %8 = vector.load %arg5[%c0_9, %c0_10] : memref<9x32xf32, #tpu.memory_space<vmem>>, vector<8x32xf32>
    %c8 = arith.constant 8 : index
    %c0_11 = arith.constant 0 : index
    %9 = vector.load %arg5[%c8, %c0_11] : memref<9x32xf32, #tpu.memory_space<vmem>>, vector<1x32xf32>
    %c0_12 = arith.constant 0 : index
    %c0_13 = arith.constant 0 : index
    %10 = vector.load %arg1[%c0_12, %c0_13] : memref<64x16xf32, #tpu.memory_space<vmem>>, vector<64x16xf32>
    %cst = arith.constant dense<0.000000e+00> : vector<64x16xf32>
    %11 = tpu.matmul %10, %1, %cst {dimension_numbers = #tpu.dot_dimension_numbers<[1], [0], [0], [1], [0, 0, 1, 1], [], []>} : vector<64x16xf32>, vector<16x16xf32>, vector<64x16xf32> -> vector<64x16xf32>
    %12 = vector.broadcast %3 : vector<1x16xf32> to vector<64x16xf32>
    %13 = arith.addf %11, %12 : vector<64x16xf32>
    %c0_14 = arith.constant 0 : index
    %c0_15 = arith.constant 0 : index
    %14 = vector.load %arg2[%c0_14, %c0_15] : memref<128x16xf32, #tpu.memory_space<vmem>>, vector<128x16xf32>
    %cst_16 = arith.constant dense<0.000000e+00> : vector<128x16xf32>
    %15 = tpu.matmul %14, %5, %cst_16 {dimension_numbers = #tpu.dot_dimension_numbers<[1], [0], [0], [1], [0, 0, 1, 1], [], []>} : vector<128x16xf32>, vector<16x16xf32>, vector<128x16xf32> -> vector<128x16xf32>
    %16 = vector.broadcast %7 : vector<1x16xf32> to vector<128x16xf32>
    %17 = arith.addf %15, %16 : vector<128x16xf32>
    %18 = tpu.iota {dimensions = array<i32: 1>} : vector<1x16xi32>
    %c0_i32 = arith.constant 0 : i32
    %19 = vector.broadcast %c0_i32 : i32 to vector<1x16xi32>
    %20 = arith.cmpi sge, %18, %19 : vector<1x16xi32>
    %c8_i32 = arith.constant 8 : i32
    %21 = vector.broadcast %c8_i32 : i32 to vector<1x16xi32>
    %22 = arith.cmpi slt, %18, %21 : vector<1x16xi32>
    %23 = arith.andi %20, %22 : vector<1x16xi1>
    %c8_i32_17 = arith.constant 8 : i32
    %24 = vector.broadcast %c8_i32_17 : i32 to vector<1x16xi32>
    %25 = arith.cmpi sge, %18, %24 : vector<1x16xi32>
    %c16_i32 = arith.constant 16 : i32
    %26 = vector.broadcast %c16_i32 : i32 to vector<1x16xi32>
    %27 = arith.cmpi slt, %18, %26 : vector<1x16xi32>
    %28 = arith.andi %25, %27 : vector<1x16xi1>
    %29 = vector.extract_strided_slice %13 {offsets = [0, 0], sizes = [8, 16], strides = [1, 1]} : vector<64x16xf32> to vector<8x16xf32>
    %30 = vector.extract_strided_slice %17 {offsets = [0, 0], sizes = [16, 16], strides = [1, 1]} : vector<128x16xf32> to vector<16x16xf32>
    %c0_18 = arith.constant 0 : index
    %c0_19 = arith.constant 0 : index
    %c0_20 = arith.constant 0 : index
    %c0_21 = arith.constant 0 : index
    %31 = vector.load %arg3[%c0_18, %c0_19, %c0_20, %c0_21] : memref<8x2x4x16xf32, #tpu.memory_space<vmem>>, vector<1x1x4x16xf32>
    %32 = vector.shape_cast %31 : vector<1x1x4x16xf32> to vector<4x16xf32>
    %c0_22 = arith.constant 0 : index
    %c1_23 = arith.constant 1 : index
    %c0_24 = arith.constant 0 : index
    %c0_25 = arith.constant 0 : index
    %33 = vector.load %arg3[%c0_22, %c1_23, %c0_24, %c0_25] : memref<8x2x4x16xf32, #tpu.memory_space<vmem>>, vector<1x1x4x16xf32>
    %34 = vector.shape_cast %33 : vector<1x1x4x16xf32> to vector<4x16xf32>
    %cst_26 = arith.constant 0.000000e+00 : f32
    %35 = vector.shape_cast %23 : vector<1x16xi1> to vector<1x16xi1>
    %36 = vector.broadcast %35 : vector<1x16xi1> to vector<8x16xi1>
    %37 = vector.broadcast %cst_26 : f32 to vector<8x16xf32>
    %38 = arith.select %36, %29, %37 : vector<8x16xi1>, vector<8x16xf32>
    %cst_27 = arith.constant dense<0.000000e+00> : vector<8x16xf32>
    %39 = tpu.matmul %38, %30, %cst_27 {dimension_numbers = #tpu.dot_dimension_numbers<[1], [1], [0], [0], [0, 0, 1, 0], [], []>} : vector<8x16xf32>, vector<16x16xf32>, vector<8x16xf32> -> vector<8x16xf32>
    %cst_28 = arith.constant 0.353553385 : f32
    %40 = vector.broadcast %cst_28 : f32 to vector<8x16xf32>
    %41 = arith.mulf %39, %40 : vector<8x16xf32>
    %42 = vector.shape_cast %41 : vector<8x16xf32> to vector<1x8x16xf32>
    %43 = vector.shape_cast %34 : vector<4x16xf32> to vector<4x1x16xf32>
    %44 = vector.broadcast %42 : vector<1x8x16xf32> to vector<4x8x16xf32>
    %45 = vector.broadcast %43 : vector<4x1x16xf32> to vector<4x8x16xf32>
    %46 = arith.addf %44, %45 : vector<4x8x16xf32>
    %cst_29 = arith.constant dense<0xFF800000> : vector<4x8xf32>
    %47 = vector.multi_reduction <maximumf>, %46, %cst_29 [2] : vector<4x8x16xf32> to vector<4x8xf32>
    %48 = vector.shape_cast %47 : vector<4x8xf32> to vector<4x8x1xf32>
    %49 = vector.broadcast %48 : vector<4x8x1xf32> to vector<4x8x16xf32>
    %50 = arith.subf %46, %49 : vector<4x8x16xf32>
    %51 = math.exp %50 : vector<4x8x16xf32>
    %cst_30 = arith.constant dense<0.000000e+00> : vector<4x8xf32>
    %52 = vector.multi_reduction <add>, %51, %cst_30 [2] : vector<4x8x16xf32> to vector<4x8xf32>
    %53 = vector.shape_cast %32 : vector<4x16xf32> to vector<4x1x16xf32>
    %54 = vector.broadcast %53 : vector<4x1x16xf32> to vector<4x8x16xf32>
    %55 = arith.mulf %51, %54 : vector<4x8x16xf32>
    %cst_31 = arith.constant dense<0.000000e+00> : vector<4x8xf32>
    %56 = vector.multi_reduction <add>, %55, %cst_31 [2] : vector<4x8x16xf32> to vector<4x8xf32>
    %57 = tpu.reciprocal %52 {approx = true} : vector<4x8xf32> -> vector<4x8xf32>
    %58 = arith.mulf %52, %57 : vector<4x8xf32>
    %cst_32 = arith.constant 2.000000e+00 : f32
    %59 = vector.broadcast %cst_32 : f32 to vector<4x8xf32>
    %60 = arith.subf %59, %58 : vector<4x8xf32>
    %61 = arith.mulf %57, %60 : vector<4x8xf32>
    %62 = arith.mulf %56, %61 : vector<4x8xf32>
    %cst_33 = arith.constant 0.000000e+00 : f32
    %63 = vector.shape_cast %28 : vector<1x16xi1> to vector<1x16xi1>
    %64 = vector.broadcast %63 : vector<1x16xi1> to vector<8x16xi1>
    %65 = vector.broadcast %cst_33 : f32 to vector<8x16xf32>
    %66 = arith.select %64, %29, %65 : vector<8x16xi1>, vector<8x16xf32>
    %cst_34 = arith.constant dense<0.000000e+00> : vector<8x16xf32>
    %67 = tpu.matmul %66, %30, %cst_34 {dimension_numbers = #tpu.dot_dimension_numbers<[1], [1], [0], [0], [0, 0, 1, 0], [], []>} : vector<8x16xf32>, vector<16x16xf32>, vector<8x16xf32> -> vector<8x16xf32>
    %cst_35 = arith.constant 0.353553385 : f32
    %68 = vector.broadcast %cst_35 : f32 to vector<8x16xf32>
    %69 = arith.mulf %67, %68 : vector<8x16xf32>
    %70 = vector.shape_cast %69 : vector<8x16xf32> to vector<1x8x16xf32>
    %71 = vector.shape_cast %34 : vector<4x16xf32> to vector<4x1x16xf32>
    %72 = vector.broadcast %70 : vector<1x8x16xf32> to vector<4x8x16xf32>
    %73 = vector.broadcast %71 : vector<4x1x16xf32> to vector<4x8x16xf32>
    %74 = arith.addf %72, %73 : vector<4x8x16xf32>
    %cst_36 = arith.constant dense<0xFF800000> : vector<4x8xf32>
    %75 = vector.multi_reduction <maximumf>, %74, %cst_36 [2] : vector<4x8x16xf32> to vector<4x8xf32>
    %76 = vector.shape_cast %75 : vector<4x8xf32> to vector<4x8x1xf32>
    %77 = vector.broadcast %76 : vector<4x8x1xf32> to vector<4x8x16xf32>
    %78 = arith.subf %74, %77 : vector<4x8x16xf32>
    %79 = math.exp %78 : vector<4x8x16xf32>
    %cst_37 = arith.constant dense<0.000000e+00> : vector<4x8xf32>
    %80 = vector.multi_reduction <add>, %79, %cst_37 [2] : vector<4x8x16xf32> to vector<4x8xf32>
    %81 = vector.shape_cast %32 : vector<4x16xf32> to vector<4x1x16xf32>
    %82 = vector.broadcast %81 : vector<4x1x16xf32> to vector<4x8x16xf32>
    %83 = arith.mulf %79, %82 : vector<4x8x16xf32>
    %cst_38 = arith.constant dense<0.000000e+00> : vector<4x8xf32>
    %84 = vector.multi_reduction <add>, %83, %cst_38 [2] : vector<4x8x16xf32> to vector<4x8xf32>
    %85 = tpu.reciprocal %80 {approx = true} : vector<4x8xf32> -> vector<4x8xf32>
    %86 = arith.mulf %80, %85 : vector<4x8xf32>
    %cst_39 = arith.constant 2.000000e+00 : f32
    %87 = vector.broadcast %cst_39 : f32 to vector<4x8xf32>
    %88 = arith.subf %87, %86 : vector<4x8xf32>
    %89 = arith.mulf %85, %88 : vector<4x8xf32>
    %90 = arith.mulf %84, %89 : vector<4x8xf32>
    %91 = tpu.concatenate %62, %90 in 0 : vector<4x8xf32>, vector<4x8xf32> -> vector<8x8xf32>
    %cst_40 = arith.constant dense<0.000000e+00> : vector<8x32xf32>
    %92 = tpu.matmul %91, %8, %cst_40 {dimension_numbers = #tpu.dot_dimension_numbers<[0], [0], [1], [1], [0, 1, 1, 1], [], []>} : vector<8x8xf32>, vector<8x32xf32>, vector<8x32xf32> -> vector<8x32xf32>
    %93 = vector.broadcast %9 : vector<1x32xf32> to vector<8x32xf32>
    %94 = arith.addf %92, %93 : vector<8x32xf32>
    %c0_41 = arith.constant 0 : index
    %c0_42 = arith.constant 0 : index
    %c0_43 = arith.constant 0 : index
    %95 = vector.load %arg6[%c0_41, %c0_42, %c0_43] : memref<8x8x32xf32, #tpu.memory_space<vmem>>, vector<1x8x32xf32>
    %96 = vector.shape_cast %95 : vector<1x8x32xf32> to vector<8x32xf32>
    %97 = vector.shape_cast %94 : vector<8x32xf32> to vector<1x8x32xf32>
    tpu.vector_store %arg6[%c0_41, %c0_42, %c0_43], %97 {strides = array<i32>} : memref<8x8x32xf32, #tpu.memory_space<vmem>>, vector<1x8x32xf32>,
    %98 = vector.extract_strided_slice %13 {offsets = [8, 0], sizes = [8, 16], strides = [1, 1]} : vector<64x16xf32> to vector<8x16xf32>
    %99 = vector.extract_strided_slice %17 {offsets = [16, 0], sizes = [16, 16], strides = [1, 1]} : vector<128x16xf32> to vector<16x16xf32>
    %c1_44 = arith.constant 1 : index
    %c0_45 = arith.constant 0 : index
    %c0_46 = arith.constant 0 : index
    %c0_47 = arith.constant 0 : index
    %100 = vector.load %arg3[%c1_44, %c0_45, %c0_46, %c0_47] : memref<8x2x4x16xf32, #tpu.memory_space<vmem>>, vector<1x1x4x16xf32>
    %101 = vector.shape_cast %100 : vector<1x1x4x16xf32> to vector<4x16xf32>
    %c1_48 = arith.constant 1 : index
    %c1_49 = arith.constant 1 : index
    %c0_50 = arith.constant 0 : index
    %c0_51 = arith.constant 0 : index
    %102 = vector.load %arg3[%c1_48, %c1_49, %c0_50, %c0_51] : memref<8x2x4x16xf32, #tpu.memory_space<vmem>>, vector<1x1x4x16xf32>
    %103 = vector.shape_cast %102 : vector<1x1x4x16xf32> to vector<4x16xf32>
    %cst_52 = arith.constant 0.000000e+00 : f32
    %104 = vector.shape_cast %23 : vector<1x16xi1> to vector<1x16xi1>
    %105 = vector.broadcast %104 : vector<1x16xi1> to vector<8x16xi1>
    %106 = vector.broadcast %cst_52 : f32 to vector<8x16xf32>
    %107 = arith.select %105, %98, %106 : vector<8x16xi1>, vector<8x16xf32>
    %cst_53 = arith.constant dense<0.000000e+00> : vector<8x16xf32>
    %108 = tpu.matmul %107, %99, %cst_53 {dimension_numbers = #tpu.dot_dimension_numbers<[1], [1], [0], [0], [0, 0, 1, 0], [], []>} : vector<8x16xf32>, vector<16x16xf32>, vector<8x16xf32> -> vector<8x16xf32>
    %cst_54 = arith.constant 0.353553385 : f32
    %109 = vector.broadcast %cst_54 : f32 to vector<8x16xf32>
    %110 = arith.mulf %108, %109 : vector<8x16xf32>
    %111 = vector.shape_cast %110 : vector<8x16xf32> to vector<1x8x16xf32>
    %112 = vector.shape_cast %103 : vector<4x16xf32> to vector<4x1x16xf32>
    %113 = vector.broadcast %111 : vector<1x8x16xf32> to vector<4x8x16xf32>
    %114 = vector.broadcast %112 : vector<4x1x16xf32> to vector<4x8x16xf32>
    %115 = arith.addf %113, %114 : vector<4x8x16xf32>
    %cst_55 = arith.constant dense<0xFF800000> : vector<4x8xf32>
    %116 = vector.multi_reduction <maximumf>, %115, %cst_55 [2] : vector<4x8x16xf32> to vector<4x8xf32>
    %117 = vector.shape_cast %116 : vector<4x8xf32> to vector<4x8x1xf32>
    %118 = vector.broadcast %117 : vector<4x8x1xf32> to vector<4x8x16xf32>
    %119 = arith.subf %115, %118 : vector<4x8x16xf32>
    %120 = math.exp %119 : vector<4x8x16xf32>
    %cst_56 = arith.constant dense<0.000000e+00> : vector<4x8xf32>
    %121 = vector.multi_reduction <add>, %120, %cst_56 [2] : vector<4x8x16xf32> to vector<4x8xf32>
    %122 = vector.shape_cast %101 : vector<4x16xf32> to vector<4x1x16xf32>
    %123 = vector.broadcast %122 : vector<4x1x16xf32> to vector<4x8x16xf32>
    %124 = arith.mulf %120, %123 : vector<4x8x16xf32>
    %cst_57 = arith.constant dense<0.000000e+00> : vector<4x8xf32>
    %125 = vector.multi_reduction <add>, %124, %cst_57 [2] : vector<4x8x16xf32> to vector<4x8xf32>
    %126 = tpu.reciprocal %121 {approx = true} : vector<4x8xf32> -> vector<4x8xf32>
    %127 = arith.mulf %121, %126 : vector<4x8xf32>
    %cst_58 = arith.constant 2.000000e+00 : f32
    %128 = vector.broadcast %cst_58 : f32 to vector<4x8xf32>
    %129 = arith.subf %128, %127 : vector<4x8xf32>
    %130 = arith.mulf %126, %129 : vector<4x8xf32>
    %131 = arith.mulf %125, %130 : vector<4x8xf32>
    %cst_59 = arith.constant 0.000000e+00 : f32
    %132 = vector.shape_cast %28 : vector<1x16xi1> to vector<1x16xi1>
    %133 = vector.broadcast %132 : vector<1x16xi1> to vector<8x16xi1>
    %134 = vector.broadcast %cst_59 : f32 to vector<8x16xf32>
    %135 = arith.select %133, %98, %134 : vector<8x16xi1>, vector<8x16xf32>
    %cst_60 = arith.constant dense<0.000000e+00> : vector<8x16xf32>
    %136 = tpu.matmul %135, %99, %cst_60 {dimension_numbers = #tpu.dot_dimension_numbers<[1], [1], [0], [0], [0, 0, 1, 0], [], []>} : vector<8x16xf32>, vector<16x16xf32>, vector<8x16xf32> -> vector<8x16xf32>
    %cst_61 = arith.constant 0.353553385 : f32
    %137 = vector.broadcast %cst_61 : f32 to vector<8x16xf32>
    %138 = arith.mulf %136, %137 : vector<8x16xf32>
    %139 = vector.shape_cast %138 : vector<8x16xf32> to vector<1x8x16xf32>
    %140 = vector.shape_cast %103 : vector<4x16xf32> to vector<4x1x16xf32>
    %141 = vector.broadcast %139 : vector<1x8x16xf32> to vector<4x8x16xf32>
    %142 = vector.broadcast %140 : vector<4x1x16xf32> to vector<4x8x16xf32>
    %143 = arith.addf %141, %142 : vector<4x8x16xf32>
    %cst_62 = arith.constant dense<0xFF800000> : vector<4x8xf32>
    %144 = vector.multi_reduction <maximumf>, %143, %cst_62 [2] : vector<4x8x16xf32> to vector<4x8xf32>
    %145 = vector.shape_cast %144 : vector<4x8xf32> to vector<4x8x1xf32>
    %146 = vector.broadcast %145 : vector<4x8x1xf32> to vector<4x8x16xf32>
    %147 = arith.subf %143, %146 : vector<4x8x16xf32>
    %148 = math.exp %147 : vector<4x8x16xf32>
    %cst_63 = arith.constant dense<0.000000e+00> : vector<4x8xf32>
    %149 = vector.multi_reduction <add>, %148, %cst_63 [2] : vector<4x8x16xf32> to vector<4x8xf32>
    %150 = vector.shape_cast %101 : vector<4x16xf32> to vector<4x1x16xf32>
    %151 = vector.broadcast %150 : vector<4x1x16xf32> to vector<4x8x16xf32>
    %152 = arith.mulf %148, %151 : vector<4x8x16xf32>
    %cst_64 = arith.constant dense<0.000000e+00> : vector<4x8xf32>
    %153 = vector.multi_reduction <add>, %152, %cst_64 [2] : vector<4x8x16xf32> to vector<4x8xf32>
    %154 = tpu.reciprocal %149 {approx = true} : vector<4x8xf32> -> vector<4x8xf32>
    %155 = arith.mulf %149, %154 : vector<4x8xf32>
    %cst_65 = arith.constant 2.000000e+00 : f32
    %156 = vector.broadcast %cst_65 : f32 to vector<4x8xf32>
    %157 = arith.subf %156, %155 : vector<4x8xf32>
    %158 = arith.mulf %154, %157 : vector<4x8xf32>
    %159 = arith.mulf %153, %158 : vector<4x8xf32>
    %160 = tpu.concatenate %131, %159 in 0 : vector<4x8xf32>, vector<4x8xf32> -> vector<8x8xf32>
    %cst_66 = arith.constant dense<0.000000e+00> : vector<8x32xf32>
    %161 = tpu.matmul %160, %8, %cst_66 {dimension_numbers = #tpu.dot_dimension_numbers<[0], [0], [1], [1], [0, 1, 1, 1], [], []>} : vector<8x8xf32>, vector<8x32xf32>, vector<8x32xf32> -> vector<8x32xf32>
    %162 = vector.broadcast %9 : vector<1x32xf32> to vector<8x32xf32>
    %163 = arith.addf %161, %162 : vector<8x32xf32>
    %c1_67 = arith.constant 1 : index
    %c0_68 = arith.constant 0 : index
    %c0_69 = arith.constant 0 : index
    %164 = vector.load %arg6[%c1_67, %c0_68, %c0_69] : memref<8x8x32xf32, #tpu.memory_space<vmem>>, vector<1x8x32xf32>
    %165 = vector.shape_cast %164 : vector<1x8x32xf32> to vector<8x32xf32>
    %166 = vector.shape_cast %163 : vector<8x32xf32> to vector<1x8x32xf32>
    tpu.vector_store %arg6[%c1_67, %c0_68, %c0_69], %166 {strides = array<i32>} : memref<8x8x32xf32, #tpu.memory_space<vmem>>, vector<1x8x32xf32>,
    %167 = vector.extract_strided_slice %13 {offsets = [16, 0], sizes = [8, 16], strides = [1, 1]} : vector<64x16xf32> to vector<8x16xf32>
    %168 = vector.extract_strided_slice %17 {offsets = [32, 0], sizes = [16, 16], strides = [1, 1]} : vector<128x16xf32> to vector<16x16xf32>
    %c2 = arith.constant 2 : index
    %c0_70 = arith.constant 0 : index
    %c0_71 = arith.constant 0 : index
    %c0_72 = arith.constant 0 : index
    %169 = vector.load %arg3[%c2, %c0_70, %c0_71, %c0_72] : memref<8x2x4x16xf32, #tpu.memory_space<vmem>>, vector<1x1x4x16xf32>
    %170 = vector.shape_cast %169 : vector<1x1x4x16xf32> to vector<4x16xf32>
    %c2_73 = arith.constant 2 : index
    %c1_74 = arith.constant 1 : index
    %c0_75 = arith.constant 0 : index
    %c0_76 = arith.constant 0 : index
    %171 = vector.load %arg3[%c2_73, %c1_74, %c0_75, %c0_76] : memref<8x2x4x16xf32, #tpu.memory_space<vmem>>, vector<1x1x4x16xf32>
    %172 = vector.shape_cast %171 : vector<1x1x4x16xf32> to vector<4x16xf32>
    %cst_77 = arith.constant 0.000000e+00 : f32
    %173 = vector.shape_cast %23 : vector<1x16xi1> to vector<1x16xi1>
    %174 = vector.broadcast %173 : vector<1x16xi1> to vector<8x16xi1>
    %175 = vector.broadcast %cst_77 : f32 to vector<8x16xf32>
    %176 = arith.select %174, %167, %175 : vector<8x16xi1>, vector<8x16xf32>
    %cst_78 = arith.constant dense<0.000000e+00> : vector<8x16xf32>
    %177 = tpu.matmul %176, %168, %cst_78 {dimension_numbers = #tpu.dot_dimension_numbers<[1], [1], [0], [0], [0, 0, 1, 0], [], []>} : vector<8x16xf32>, vector<16x16xf32>, vector<8x16xf32> -> vector<8x16xf32>
    %cst_79 = arith.constant 0.353553385 : f32
    %178 = vector.broadcast %cst_79 : f32 to vector<8x16xf32>
    %179 = arith.mulf %177, %178 : vector<8x16xf32>
    %180 = vector.shape_cast %179 : vector<8x16xf32> to vector<1x8x16xf32>
    %181 = vector.shape_cast %172 : vector<4x16xf32> to vector<4x1x16xf32>
    %182 = vector.broadcast %180 : vector<1x8x16xf32> to vector<4x8x16xf32>
    %183 = vector.broadcast %181 : vector<4x1x16xf32> to vector<4x8x16xf32>
    %184 = arith.addf %182, %183 : vector<4x8x16xf32>
    %cst_80 = arith.constant dense<0xFF800000> : vector<4x8xf32>
    %185 = vector.multi_reduction <maximumf>, %184, %cst_80 [2] : vector<4x8x16xf32> to vector<4x8xf32>
    %186 = vector.shape_cast %185 : vector<4x8xf32> to vector<4x8x1xf32>
    %187 = vector.broadcast %186 : vector<4x8x1xf32> to vector<4x8x16xf32>
    %188 = arith.subf %184, %187 : vector<4x8x16xf32>
    %189 = math.exp %188 : vector<4x8x16xf32>
    %cst_81 = arith.constant dense<0.000000e+00> : vector<4x8xf32>
    %190 = vector.multi_reduction <add>, %189, %cst_81 [2] : vector<4x8x16xf32> to vector<4x8xf32>
    %191 = vector.shape_cast %170 : vector<4x16xf32> to vector<4x1x16xf32>
    %192 = vector.broadcast %191 : vector<4x1x16xf32> to vector<4x8x16xf32>
    %193 = arith.mulf %189, %192 : vector<4x8x16xf32>
    %cst_82 = arith.constant dense<0.000000e+00> : vector<4x8xf32>
    %194 = vector.multi_reduction <add>, %193, %cst_82 [2] : vector<4x8x16xf32> to vector<4x8xf32>
    %195 = tpu.reciprocal %190 {approx = true} : vector<4x8xf32> -> vector<4x8xf32>
    %196 = arith.mulf %190, %195 : vector<4x8xf32>
    %cst_83 = arith.constant 2.000000e+00 : f32
    %197 = vector.broadcast %cst_83 : f32 to vector<4x8xf32>
    %198 = arith.subf %197, %196 : vector<4x8xf32>
    %199 = arith.mulf %195, %198 : vector<4x8xf32>
    %200 = arith.mulf %194, %199 : vector<4x8xf32>
    %cst_84 = arith.constant 0.000000e+00 : f32
    %201 = vector.shape_cast %28 : vector<1x16xi1> to vector<1x16xi1>
    %202 = vector.broadcast %201 : vector<1x16xi1> to vector<8x16xi1>
    %203 = vector.broadcast %cst_84 : f32 to vector<8x16xf32>
    %204 = arith.select %202, %167, %203 : vector<8x16xi1>, vector<8x16xf32>
    %cst_85 = arith.constant dense<0.000000e+00> : vector<8x16xf32>
    %205 = tpu.matmul %204, %168, %cst_85 {dimension_numbers = #tpu.dot_dimension_numbers<[1], [1], [0], [0], [0, 0, 1, 0], [], []>} : vector<8x16xf32>, vector<16x16xf32>, vector<8x16xf32> -> vector<8x16xf32>
    %cst_86 = arith.constant 0.353553385 : f32
    %206 = vector.broadcast %cst_86 : f32 to vector<8x16xf32>
    %207 = arith.mulf %205, %206 : vector<8x16xf32>
    %208 = vector.shape_cast %207 : vector<8x16xf32> to vector<1x8x16xf32>
    %209 = vector.shape_cast %172 : vector<4x16xf32> to vector<4x1x16xf32>
    %210 = vector.broadcast %208 : vector<1x8x16xf32> to vector<4x8x16xf32>
    %211 = vector.broadcast %209 : vector<4x1x16xf32> to vector<4x8x16xf32>
    %212 = arith.addf %210, %211 : vector<4x8x16xf32>
    %cst_87 = arith.constant dense<0xFF800000> : vector<4x8xf32>
    %213 = vector.multi_reduction <maximumf>, %212, %cst_87 [2] : vector<4x8x16xf32> to vector<4x8xf32>
    %214 = vector.shape_cast %213 : vector<4x8xf32> to vector<4x8x1xf32>
    %215 = vector.broadcast %214 : vector<4x8x1xf32> to vector<4x8x16xf32>
    %216 = arith.subf %212, %215 : vector<4x8x16xf32>
    %217 = math.exp %216 : vector<4x8x16xf32>
    %cst_88 = arith.constant dense<0.000000e+00> : vector<4x8xf32>
    %218 = vector.multi_reduction <add>, %217, %cst_88 [2] : vector<4x8x16xf32> to vector<4x8xf32>
    %219 = vector.shape_cast %170 : vector<4x16xf32> to vector<4x1x16xf32>
    %220 = vector.broadcast %219 : vector<4x1x16xf32> to vector<4x8x16xf32>
    %221 = arith.mulf %217, %220 : vector<4x8x16xf32>
    %cst_89 = arith.constant dense<0.000000e+00> : vector<4x8xf32>
    %222 = vector.multi_reduction <add>, %221, %cst_89 [2] : vector<4x8x16xf32> to vector<4x8xf32>
    %223 = tpu.reciprocal %218 {approx = true} : vector<4x8xf32> -> vector<4x8xf32>
    %224 = arith.mulf %218, %223 : vector<4x8xf32>
    %cst_90 = arith.constant 2.000000e+00 : f32
    %225 = vector.broadcast %cst_90 : f32 to vector<4x8xf32>
    %226 = arith.subf %225, %224 : vector<4x8xf32>
    %227 = arith.mulf %223, %226 : vector<4x8xf32>
    %228 = arith.mulf %222, %227 : vector<4x8xf32>
    %229 = tpu.concatenate %200, %228 in 0 : vector<4x8xf32>, vector<4x8xf32> -> vector<8x8xf32>
    %cst_91 = arith.constant dense<0.000000e+00> : vector<8x32xf32>
    %230 = tpu.matmul %229, %8, %cst_91 {dimension_numbers = #tpu.dot_dimension_numbers<[0], [0], [1], [1], [0, 1, 1, 1], [], []>} : vector<8x8xf32>, vector<8x32xf32>, vector<8x32xf32> -> vector<8x32xf32>
    %231 = vector.broadcast %9 : vector<1x32xf32> to vector<8x32xf32>
    %232 = arith.addf %230, %231 : vector<8x32xf32>
    %c2_92 = arith.constant 2 : index
    %c0_93 = arith.constant 0 : index
    %c0_94 = arith.constant 0 : index
    %233 = vector.load %arg6[%c2_92, %c0_93, %c0_94] : memref<8x8x32xf32, #tpu.memory_space<vmem>>, vector<1x8x32xf32>
    %234 = vector.shape_cast %233 : vector<1x8x32xf32> to vector<8x32xf32>
    %235 = vector.shape_cast %232 : vector<8x32xf32> to vector<1x8x32xf32>
    tpu.vector_store %arg6[%c2_92, %c0_93, %c0_94], %235 {strides = array<i32>} : memref<8x8x32xf32, #tpu.memory_space<vmem>>, vector<1x8x32xf32>,
    %236 = vector.extract_strided_slice %13 {offsets = [24, 0], sizes = [8, 16], strides = [1, 1]} : vector<64x16xf32> to vector<8x16xf32>
    %237 = vector.extract_strided_slice %17 {offsets = [48, 0], sizes = [16, 16], strides = [1, 1]} : vector<128x16xf32> to vector<16x16xf32>
    %c3 = arith.constant 3 : index
    %c0_95 = arith.constant 0 : index
    %c0_96 = arith.constant 0 : index
    %c0_97 = arith.constant 0 : index
    %238 = vector.load %arg3[%c3, %c0_95, %c0_96, %c0_97] : memref<8x2x4x16xf32, #tpu.memory_space<vmem>>, vector<1x1x4x16xf32>
    %239 = vector.shape_cast %238 : vector<1x1x4x16xf32> to vector<4x16xf32>
    %c3_98 = arith.constant 3 : index
    %c1_99 = arith.constant 1 : index
    %c0_100 = arith.constant 0 : index
    %c0_101 = arith.constant 0 : index
    %240 = vector.load %arg3[%c3_98, %c1_99, %c0_100, %c0_101] : memref<8x2x4x16xf32, #tpu.memory_space<vmem>>, vector<1x1x4x16xf32>
    %241 = vector.shape_cast %240 : vector<1x1x4x16xf32> to vector<4x16xf32>
    %cst_102 = arith.constant 0.000000e+00 : f32
    %242 = vector.shape_cast %23 : vector<1x16xi1> to vector<1x16xi1>
    %243 = vector.broadcast %242 : vector<1x16xi1> to vector<8x16xi1>
    %244 = vector.broadcast %cst_102 : f32 to vector<8x16xf32>
    %245 = arith.select %243, %236, %244 : vector<8x16xi1>, vector<8x16xf32>
    %cst_103 = arith.constant dense<0.000000e+00> : vector<8x16xf32>
    %246 = tpu.matmul %245, %237, %cst_103 {dimension_numbers = #tpu.dot_dimension_numbers<[1], [1], [0], [0], [0, 0, 1, 0], [], []>} : vector<8x16xf32>, vector<16x16xf32>, vector<8x16xf32> -> vector<8x16xf32>
    %cst_104 = arith.constant 0.353553385 : f32
    %247 = vector.broadcast %cst_104 : f32 to vector<8x16xf32>
    %248 = arith.mulf %246, %247 : vector<8x16xf32>
    %249 = vector.shape_cast %248 : vector<8x16xf32> to vector<1x8x16xf32>
    %250 = vector.shape_cast %241 : vector<4x16xf32> to vector<4x1x16xf32>
    %251 = vector.broadcast %249 : vector<1x8x16xf32> to vector<4x8x16xf32>
    %252 = vector.broadcast %250 : vector<4x1x16xf32> to vector<4x8x16xf32>
    %253 = arith.addf %251, %252 : vector<4x8x16xf32>
    %cst_105 = arith.constant dense<0xFF800000> : vector<4x8xf32>
    %254 = vector.multi_reduction <maximumf>, %253, %cst_105 [2] : vector<4x8x16xf32> to vector<4x8xf32>
    %255 = vector.shape_cast %254 : vector<4x8xf32> to vector<4x8x1xf32>
    %256 = vector.broadcast %255 : vector<4x8x1xf32> to vector<4x8x16xf32>
    %257 = arith.subf %253, %256 : vector<4x8x16xf32>
    %258 = math.exp %257 : vector<4x8x16xf32>
    %cst_106 = arith.constant dense<0.000000e+00> : vector<4x8xf32>
    %259 = vector.multi_reduction <add>, %258, %cst_106 [2] : vector<4x8x16xf32> to vector<4x8xf32>
    %260 = vector.shape_cast %239 : vector<4x16xf32> to vector<4x1x16xf32>
    %261 = vector.broadcast %260 : vector<4x1x16xf32> to vector<4x8x16xf32>
    %262 = arith.mulf %258, %261 : vector<4x8x16xf32>
    %cst_107 = arith.constant dense<0.000000e+00> : vector<4x8xf32>
    %263 = vector.multi_reduction <add>, %262, %cst_107 [2] : vector<4x8x16xf32> to vector<4x8xf32>
    %264 = tpu.reciprocal %259 {approx = true} : vector<4x8xf32> -> vector<4x8xf32>
    %265 = arith.mulf %259, %264 : vector<4x8xf32>
    %cst_108 = arith.constant 2.000000e+00 : f32
    %266 = vector.broadcast %cst_108 : f32 to vector<4x8xf32>
    %267 = arith.subf %266, %265 : vector<4x8xf32>
    %268 = arith.mulf %264, %267 : vector<4x8xf32>
    %269 = arith.mulf %263, %268 : vector<4x8xf32>
    %cst_109 = arith.constant 0.000000e+00 : f32
    %270 = vector.shape_cast %28 : vector<1x16xi1> to vector<1x16xi1>
    %271 = vector.broadcast %270 : vector<1x16xi1> to vector<8x16xi1>
    %272 = vector.broadcast %cst_109 : f32 to vector<8x16xf32>
    %273 = arith.select %271, %236, %272 : vector<8x16xi1>, vector<8x16xf32>
    %cst_110 = arith.constant dense<0.000000e+00> : vector<8x16xf32>
    %274 = tpu.matmul %273, %237, %cst_110 {dimension_numbers = #tpu.dot_dimension_numbers<[1], [1], [0], [0], [0, 0, 1, 0], [], []>} : vector<8x16xf32>, vector<16x16xf32>, vector<8x16xf32> -> vector<8x16xf32>
    %cst_111 = arith.constant 0.353553385 : f32
    %275 = vector.broadcast %cst_111 : f32 to vector<8x16xf32>
    %276 = arith.mulf %274, %275 : vector<8x16xf32>
    %277 = vector.shape_cast %276 : vector<8x16xf32> to vector<1x8x16xf32>
    %278 = vector.shape_cast %241 : vector<4x16xf32> to vector<4x1x16xf32>
    %279 = vector.broadcast %277 : vector<1x8x16xf32> to vector<4x8x16xf32>
    %280 = vector.broadcast %278 : vector<4x1x16xf32> to vector<4x8x16xf32>
    %281 = arith.addf %279, %280 : vector<4x8x16xf32>
    %cst_112 = arith.constant dense<0xFF800000> : vector<4x8xf32>
    %282 = vector.multi_reduction <maximumf>, %281, %cst_112 [2] : vector<4x8x16xf32> to vector<4x8xf32>
    %283 = vector.shape_cast %282 : vector<4x8xf32> to vector<4x8x1xf32>
    %284 = vector.broadcast %283 : vector<4x8x1xf32> to vector<4x8x16xf32>
    %285 = arith.subf %281, %284 : vector<4x8x16xf32>
    %286 = math.exp %285 : vector<4x8x16xf32>
    %cst_113 = arith.constant dense<0.000000e+00> : vector<4x8xf32>
    %287 = vector.multi_reduction <add>, %286, %cst_113 [2] : vector<4x8x16xf32> to vector<4x8xf32>
    %288 = vector.shape_cast %239 : vector<4x16xf32> to vector<4x1x16xf32>
    %289 = vector.broadcast %288 : vector<4x1x16xf32> to vector<4x8x16xf32>
    %290 = arith.mulf %286, %289 : vector<4x8x16xf32>
    %cst_114 = arith.constant dense<0.000000e+00> : vector<4x8xf32>
    %291 = vector.multi_reduction <add>, %290, %cst_114 [2] : vector<4x8x16xf32> to vector<4x8xf32>
    %292 = tpu.reciprocal %287 {approx = true} : vector<4x8xf32> -> vector<4x8xf32>
    %293 = arith.mulf %287, %292 : vector<4x8xf32>
    %cst_115 = arith.constant 2.000000e+00 : f32
    %294 = vector.broadcast %cst_115 : f32 to vector<4x8xf32>
    %295 = arith.subf %294, %293 : vector<4x8xf32>
    %296 = arith.mulf %292, %295 : vector<4x8xf32>
    %297 = arith.mulf %291, %296 : vector<4x8xf32>
    %298 = tpu.concatenate %269, %297 in 0 : vector<4x8xf32>, vector<4x8xf32> -> vector<8x8xf32>
    %cst_116 = arith.constant dense<0.000000e+00> : vector<8x32xf32>
    %299 = tpu.matmul %298, %8, %cst_116 {dimension_numbers = #tpu.dot_dimension_numbers<[0], [0], [1], [1], [0, 1, 1, 1], [], []>} : vector<8x8xf32>, vector<8x32xf32>, vector<8x32xf32> -> vector<8x32xf32>
    %300 = vector.broadcast %9 : vector<1x32xf32> to vector<8x32xf32>
    %301 = arith.addf %299, %300 : vector<8x32xf32>
    %c3_117 = arith.constant 3 : index
    %c0_118 = arith.constant 0 : index
    %c0_119 = arith.constant 0 : index
    %302 = vector.load %arg6[%c3_117, %c0_118, %c0_119] : memref<8x8x32xf32, #tpu.memory_space<vmem>>, vector<1x8x32xf32>
    %303 = vector.shape_cast %302 : vector<1x8x32xf32> to vector<8x32xf32>
    %304 = vector.shape_cast %301 : vector<8x32xf32> to vector<1x8x32xf32>
    tpu.vector_store %arg6[%c3_117, %c0_118, %c0_119], %304 {strides = array<i32>} : memref<8x8x32xf32, #tpu.memory_space<vmem>>, vector<1x8x32xf32>,
    %305 = vector.extract_strided_slice %13 {offsets = [32, 0], sizes = [8, 16], strides = [1, 1]} : vector<64x16xf32> to vector<8x16xf32>
    %306 = vector.extract_strided_slice %17 {offsets = [64, 0], sizes = [16, 16], strides = [1, 1]} : vector<128x16xf32> to vector<16x16xf32>
    %c4 = arith.constant 4 : index
    %c0_120 = arith.constant 0 : index
    %c0_121 = arith.constant 0 : index
    %c0_122 = arith.constant 0 : index
    %307 = vector.load %arg3[%c4, %c0_120, %c0_121, %c0_122] : memref<8x2x4x16xf32, #tpu.memory_space<vmem>>, vector<1x1x4x16xf32>
    %308 = vector.shape_cast %307 : vector<1x1x4x16xf32> to vector<4x16xf32>
    %c4_123 = arith.constant 4 : index
    %c1_124 = arith.constant 1 : index
    %c0_125 = arith.constant 0 : index
    %c0_126 = arith.constant 0 : index
    %309 = vector.load %arg3[%c4_123, %c1_124, %c0_125, %c0_126] : memref<8x2x4x16xf32, #tpu.memory_space<vmem>>, vector<1x1x4x16xf32>
    %310 = vector.shape_cast %309 : vector<1x1x4x16xf32> to vector<4x16xf32>
    %cst_127 = arith.constant 0.000000e+00 : f32
    %311 = vector.shape_cast %23 : vector<1x16xi1> to vector<1x16xi1>
    %312 = vector.broadcast %311 : vector<1x16xi1> to vector<8x16xi1>
    %313 = vector.broadcast %cst_127 : f32 to vector<8x16xf32>
    %314 = arith.select %312, %305, %313 : vector<8x16xi1>, vector<8x16xf32>
    %cst_128 = arith.constant dense<0.000000e+00> : vector<8x16xf32>
    %315 = tpu.matmul %314, %306, %cst_128 {dimension_numbers = #tpu.dot_dimension_numbers<[1], [1], [0], [0], [0, 0, 1, 0], [], []>} : vector<8x16xf32>, vector<16x16xf32>, vector<8x16xf32> -> vector<8x16xf32>
    %cst_129 = arith.constant 0.353553385 : f32
    %316 = vector.broadcast %cst_129 : f32 to vector<8x16xf32>
    %317 = arith.mulf %315, %316 : vector<8x16xf32>
    %318 = vector.shape_cast %317 : vector<8x16xf32> to vector<1x8x16xf32>
    %319 = vector.shape_cast %310 : vector<4x16xf32> to vector<4x1x16xf32>
    %320 = vector.broadcast %318 : vector<1x8x16xf32> to vector<4x8x16xf32>
    %321 = vector.broadcast %319 : vector<4x1x16xf32> to vector<4x8x16xf32>
    %322 = arith.addf %320, %321 : vector<4x8x16xf32>
    %cst_130 = arith.constant dense<0xFF800000> : vector<4x8xf32>
    %323 = vector.multi_reduction <maximumf>, %322, %cst_130 [2] : vector<4x8x16xf32> to vector<4x8xf32>
    %324 = vector.shape_cast %323 : vector<4x8xf32> to vector<4x8x1xf32>
    %325 = vector.broadcast %324 : vector<4x8x1xf32> to vector<4x8x16xf32>
    %326 = arith.subf %322, %325 : vector<4x8x16xf32>
    %327 = math.exp %326 : vector<4x8x16xf32>
    %cst_131 = arith.constant dense<0.000000e+00> : vector<4x8xf32>
    %328 = vector.multi_reduction <add>, %327, %cst_131 [2] : vector<4x8x16xf32> to vector<4x8xf32>
    %329 = vector.shape_cast %308 : vector<4x16xf32> to vector<4x1x16xf32>
    %330 = vector.broadcast %329 : vector<4x1x16xf32> to vector<4x8x16xf32>
    %331 = arith.mulf %327, %330 : vector<4x8x16xf32>
    %cst_132 = arith.constant dense<0.000000e+00> : vector<4x8xf32>
    %332 = vector.multi_reduction <add>, %331, %cst_132 [2] : vector<4x8x16xf32> to vector<4x8xf32>
    %333 = tpu.reciprocal %328 {approx = true} : vector<4x8xf32> -> vector<4x8xf32>
    %334 = arith.mulf %328, %333 : vector<4x8xf32>
    %cst_133 = arith.constant 2.000000e+00 : f32
    %335 = vector.broadcast %cst_133 : f32 to vector<4x8xf32>
    %336 = arith.subf %335, %334 : vector<4x8xf32>
    %337 = arith.mulf %333, %336 : vector<4x8xf32>
    %338 = arith.mulf %332, %337 : vector<4x8xf32>
    %cst_134 = arith.constant 0.000000e+00 : f32
    %339 = vector.shape_cast %28 : vector<1x16xi1> to vector<1x16xi1>
    %340 = vector.broadcast %339 : vector<1x16xi1> to vector<8x16xi1>
    %341 = vector.broadcast %cst_134 : f32 to vector<8x16xf32>
    %342 = arith.select %340, %305, %341 : vector<8x16xi1>, vector<8x16xf32>
    %cst_135 = arith.constant dense<0.000000e+00> : vector<8x16xf32>
    %343 = tpu.matmul %342, %306, %cst_135 {dimension_numbers = #tpu.dot_dimension_numbers<[1], [1], [0], [0], [0, 0, 1, 0], [], []>} : vector<8x16xf32>, vector<16x16xf32>, vector<8x16xf32> -> vector<8x16xf32>
    %cst_136 = arith.constant 0.353553385 : f32
    %344 = vector.broadcast %cst_136 : f32 to vector<8x16xf32>
    %345 = arith.mulf %343, %344 : vector<8x16xf32>
    %346 = vector.shape_cast %345 : vector<8x16xf32> to vector<1x8x16xf32>
    %347 = vector.shape_cast %310 : vector<4x16xf32> to vector<4x1x16xf32>
    %348 = vector.broadcast %346 : vector<1x8x16xf32> to vector<4x8x16xf32>
    %349 = vector.broadcast %347 : vector<4x1x16xf32> to vector<4x8x16xf32>
    %350 = arith.addf %348, %349 : vector<4x8x16xf32>
    %cst_137 = arith.constant dense<0xFF800000> : vector<4x8xf32>
    %351 = vector.multi_reduction <maximumf>, %350, %cst_137 [2] : vector<4x8x16xf32> to vector<4x8xf32>
    %352 = vector.shape_cast %351 : vector<4x8xf32> to vector<4x8x1xf32>
    %353 = vector.broadcast %352 : vector<4x8x1xf32> to vector<4x8x16xf32>
    %354 = arith.subf %350, %353 : vector<4x8x16xf32>
    %355 = math.exp %354 : vector<4x8x16xf32>
    %cst_138 = arith.constant dense<0.000000e+00> : vector<4x8xf32>
    %356 = vector.multi_reduction <add>, %355, %cst_138 [2] : vector<4x8x16xf32> to vector<4x8xf32>
    %357 = vector.shape_cast %308 : vector<4x16xf32> to vector<4x1x16xf32>
    %358 = vector.broadcast %357 : vector<4x1x16xf32> to vector<4x8x16xf32>
    %359 = arith.mulf %355, %358 : vector<4x8x16xf32>
    %cst_139 = arith.constant dense<0.000000e+00> : vector<4x8xf32>
    %360 = vector.multi_reduction <add>, %359, %cst_139 [2] : vector<4x8x16xf32> to vector<4x8xf32>
    %361 = tpu.reciprocal %356 {approx = true} : vector<4x8xf32> -> vector<4x8xf32>
    %362 = arith.mulf %356, %361 : vector<4x8xf32>
    %cst_140 = arith.constant 2.000000e+00 : f32
    %363 = vector.broadcast %cst_140 : f32 to vector<4x8xf32>
    %364 = arith.subf %363, %362 : vector<4x8xf32>
    %365 = arith.mulf %361, %364 : vector<4x8xf32>
    %366 = arith.mulf %360, %365 : vector<4x8xf32>
    %367 = tpu.concatenate %338, %366 in 0 : vector<4x8xf32>, vector<4x8xf32> -> vector<8x8xf32>
    %cst_141 = arith.constant dense<0.000000e+00> : vector<8x32xf32>
    %368 = tpu.matmul %367, %8, %cst_141 {dimension_numbers = #tpu.dot_dimension_numbers<[0], [0], [1], [1], [0, 1, 1, 1], [], []>} : vector<8x8xf32>, vector<8x32xf32>, vector<8x32xf32> -> vector<8x32xf32>
    %369 = vector.broadcast %9 : vector<1x32xf32> to vector<8x32xf32>
    %370 = arith.addf %368, %369 : vector<8x32xf32>
    %c4_142 = arith.constant 4 : index
    %c0_143 = arith.constant 0 : index
    %c0_144 = arith.constant 0 : index
    %371 = vector.load %arg6[%c4_142, %c0_143, %c0_144] : memref<8x8x32xf32, #tpu.memory_space<vmem>>, vector<1x8x32xf32>
    %372 = vector.shape_cast %371 : vector<1x8x32xf32> to vector<8x32xf32>
    %373 = vector.shape_cast %370 : vector<8x32xf32> to vector<1x8x32xf32>
    tpu.vector_store %arg6[%c4_142, %c0_143, %c0_144], %373 {strides = array<i32>} : memref<8x8x32xf32, #tpu.memory_space<vmem>>, vector<1x8x32xf32>,
    %374 = vector.extract_strided_slice %13 {offsets = [40, 0], sizes = [8, 16], strides = [1, 1]} : vector<64x16xf32> to vector<8x16xf32>
    %375 = vector.extract_strided_slice %17 {offsets = [80, 0], sizes = [16, 16], strides = [1, 1]} : vector<128x16xf32> to vector<16x16xf32>
    %c5 = arith.constant 5 : index
    %c0_145 = arith.constant 0 : index
    %c0_146 = arith.constant 0 : index
    %c0_147 = arith.constant 0 : index
    %376 = vector.load %arg3[%c5, %c0_145, %c0_146, %c0_147] : memref<8x2x4x16xf32, #tpu.memory_space<vmem>>, vector<1x1x4x16xf32>
    %377 = vector.shape_cast %376 : vector<1x1x4x16xf32> to vector<4x16xf32>
    %c5_148 = arith.constant 5 : index
    %c1_149 = arith.constant 1 : index
    %c0_150 = arith.constant 0 : index
    %c0_151 = arith.constant 0 : index
    %378 = vector.load %arg3[%c5_148, %c1_149, %c0_150, %c0_151] : memref<8x2x4x16xf32, #tpu.memory_space<vmem>>, vector<1x1x4x16xf32>
    %379 = vector.shape_cast %378 : vector<1x1x4x16xf32> to vector<4x16xf32>
    %cst_152 = arith.constant 0.000000e+00 : f32
    %380 = vector.shape_cast %23 : vector<1x16xi1> to vector<1x16xi1>
    %381 = vector.broadcast %380 : vector<1x16xi1> to vector<8x16xi1>
    %382 = vector.broadcast %cst_152 : f32 to vector<8x16xf32>
    %383 = arith.select %381, %374, %382 : vector<8x16xi1>, vector<8x16xf32>
    %cst_153 = arith.constant dense<0.000000e+00> : vector<8x16xf32>
    %384 = tpu.matmul %383, %375, %cst_153 {dimension_numbers = #tpu.dot_dimension_numbers<[1], [1], [0], [0], [0, 0, 1, 0], [], []>} : vector<8x16xf32>, vector<16x16xf32>, vector<8x16xf32> -> vector<8x16xf32>
    %cst_154 = arith.constant 0.353553385 : f32
    %385 = vector.broadcast %cst_154 : f32 to vector<8x16xf32>
    %386 = arith.mulf %384, %385 : vector<8x16xf32>
    %387 = vector.shape_cast %386 : vector<8x16xf32> to vector<1x8x16xf32>
    %388 = vector.shape_cast %379 : vector<4x16xf32> to vector<4x1x16xf32>
    %389 = vector.broadcast %387 : vector<1x8x16xf32> to vector<4x8x16xf32>
    %390 = vector.broadcast %388 : vector<4x1x16xf32> to vector<4x8x16xf32>
    %391 = arith.addf %389, %390 : vector<4x8x16xf32>
    %cst_155 = arith.constant dense<0xFF800000> : vector<4x8xf32>
    %392 = vector.multi_reduction <maximumf>, %391, %cst_155 [2] : vector<4x8x16xf32> to vector<4x8xf32>
    %393 = vector.shape_cast %392 : vector<4x8xf32> to vector<4x8x1xf32>
    %394 = vector.broadcast %393 : vector<4x8x1xf32> to vector<4x8x16xf32>
    %395 = arith.subf %391, %394 : vector<4x8x16xf32>
    %396 = math.exp %395 : vector<4x8x16xf32>
    %cst_156 = arith.constant dense<0.000000e+00> : vector<4x8xf32>
    %397 = vector.multi_reduction <add>, %396, %cst_156 [2] : vector<4x8x16xf32> to vector<4x8xf32>
    %398 = vector.shape_cast %377 : vector<4x16xf32> to vector<4x1x16xf32>
    %399 = vector.broadcast %398 : vector<4x1x16xf32> to vector<4x8x16xf32>
    %400 = arith.mulf %396, %399 : vector<4x8x16xf32>
    %cst_157 = arith.constant dense<0.000000e+00> : vector<4x8xf32>
    %401 = vector.multi_reduction <add>, %400, %cst_157 [2] : vector<4x8x16xf32> to vector<4x8xf32>
    %402 = tpu.reciprocal %397 {approx = true} : vector<4x8xf32> -> vector<4x8xf32>
    %403 = arith.mulf %397, %402 : vector<4x8xf32>
    %cst_158 = arith.constant 2.000000e+00 : f32
    %404 = vector.broadcast %cst_158 : f32 to vector<4x8xf32>
    %405 = arith.subf %404, %403 : vector<4x8xf32>
    %406 = arith.mulf %402, %405 : vector<4x8xf32>
    %407 = arith.mulf %401, %406 : vector<4x8xf32>
    %cst_159 = arith.constant 0.000000e+00 : f32
    %408 = vector.shape_cast %28 : vector<1x16xi1> to vector<1x16xi1>
    %409 = vector.broadcast %408 : vector<1x16xi1> to vector<8x16xi1>
    %410 = vector.broadcast %cst_159 : f32 to vector<8x16xf32>
    %411 = arith.select %409, %374, %410 : vector<8x16xi1>, vector<8x16xf32>
    %cst_160 = arith.constant dense<0.000000e+00> : vector<8x16xf32>
    %412 = tpu.matmul %411, %375, %cst_160 {dimension_numbers = #tpu.dot_dimension_numbers<[1], [1], [0], [0], [0, 0, 1, 0], [], []>} : vector<8x16xf32>, vector<16x16xf32>, vector<8x16xf32> -> vector<8x16xf32>
    %cst_161 = arith.constant 0.353553385 : f32
    %413 = vector.broadcast %cst_161 : f32 to vector<8x16xf32>
    %414 = arith.mulf %412, %413 : vector<8x16xf32>
    %415 = vector.shape_cast %414 : vector<8x16xf32> to vector<1x8x16xf32>
    %416 = vector.shape_cast %379 : vector<4x16xf32> to vector<4x1x16xf32>
    %417 = vector.broadcast %415 : vector<1x8x16xf32> to vector<4x8x16xf32>
    %418 = vector.broadcast %416 : vector<4x1x16xf32> to vector<4x8x16xf32>
    %419 = arith.addf %417, %418 : vector<4x8x16xf32>
    %cst_162 = arith.constant dense<0xFF800000> : vector<4x8xf32>
    %420 = vector.multi_reduction <maximumf>, %419, %cst_162 [2] : vector<4x8x16xf32> to vector<4x8xf32>
    %421 = vector.shape_cast %420 : vector<4x8xf32> to vector<4x8x1xf32>
    %422 = vector.broadcast %421 : vector<4x8x1xf32> to vector<4x8x16xf32>
    %423 = arith.subf %419, %422 : vector<4x8x16xf32>
    %424 = math.exp %423 : vector<4x8x16xf32>
    %cst_163 = arith.constant dense<0.000000e+00> : vector<4x8xf32>
    %425 = vector.multi_reduction <add>, %424, %cst_163 [2] : vector<4x8x16xf32> to vector<4x8xf32>
    %426 = vector.shape_cast %377 : vector<4x16xf32> to vector<4x1x16xf32>
    %427 = vector.broadcast %426 : vector<4x1x16xf32> to vector<4x8x16xf32>
    %428 = arith.mulf %424, %427 : vector<4x8x16xf32>
    %cst_164 = arith.constant dense<0.000000e+00> : vector<4x8xf32>
    %429 = vector.multi_reduction <add>, %428, %cst_164 [2] : vector<4x8x16xf32> to vector<4x8xf32>
    %430 = tpu.reciprocal %425 {approx = true} : vector<4x8xf32> -> vector<4x8xf32>
    %431 = arith.mulf %425, %430 : vector<4x8xf32>
    %cst_165 = arith.constant 2.000000e+00 : f32
    %432 = vector.broadcast %cst_165 : f32 to vector<4x8xf32>
    %433 = arith.subf %432, %431 : vector<4x8xf32>
    %434 = arith.mulf %430, %433 : vector<4x8xf32>
    %435 = arith.mulf %429, %434 : vector<4x8xf32>
    %436 = tpu.concatenate %407, %435 in 0 : vector<4x8xf32>, vector<4x8xf32> -> vector<8x8xf32>
    %cst_166 = arith.constant dense<0.000000e+00> : vector<8x32xf32>
    %437 = tpu.matmul %436, %8, %cst_166 {dimension_numbers = #tpu.dot_dimension_numbers<[0], [0], [1], [1], [0, 1, 1, 1], [], []>} : vector<8x8xf32>, vector<8x32xf32>, vector<8x32xf32> -> vector<8x32xf32>
    %438 = vector.broadcast %9 : vector<1x32xf32> to vector<8x32xf32>
    %439 = arith.addf %437, %438 : vector<8x32xf32>
    %c5_167 = arith.constant 5 : index
    %c0_168 = arith.constant 0 : index
    %c0_169 = arith.constant 0 : index
    %440 = vector.load %arg6[%c5_167, %c0_168, %c0_169] : memref<8x8x32xf32, #tpu.memory_space<vmem>>, vector<1x8x32xf32>
    %441 = vector.shape_cast %440 : vector<1x8x32xf32> to vector<8x32xf32>
    %442 = vector.shape_cast %439 : vector<8x32xf32> to vector<1x8x32xf32>
    tpu.vector_store %arg6[%c5_167, %c0_168, %c0_169], %442 {strides = array<i32>} : memref<8x8x32xf32, #tpu.memory_space<vmem>>, vector<1x8x32xf32>,
    %443 = vector.extract_strided_slice %13 {offsets = [48, 0], sizes = [8, 16], strides = [1, 1]} : vector<64x16xf32> to vector<8x16xf32>
    %444 = vector.extract_strided_slice %17 {offsets = [96, 0], sizes = [16, 16], strides = [1, 1]} : vector<128x16xf32> to vector<16x16xf32>
    %c6 = arith.constant 6 : index
    %c0_170 = arith.constant 0 : index
    %c0_171 = arith.constant 0 : index
    %c0_172 = arith.constant 0 : index
    %445 = vector.load %arg3[%c6, %c0_170, %c0_171, %c0_172] : memref<8x2x4x16xf32, #tpu.memory_space<vmem>>, vector<1x1x4x16xf32>
    %446 = vector.shape_cast %445 : vector<1x1x4x16xf32> to vector<4x16xf32>
    %c6_173 = arith.constant 6 : index
    %c1_174 = arith.constant 1 : index
    %c0_175 = arith.constant 0 : index
    %c0_176 = arith.constant 0 : index
    %447 = vector.load %arg3[%c6_173, %c1_174, %c0_175, %c0_176] : memref<8x2x4x16xf32, #tpu.memory_space<vmem>>, vector<1x1x4x16xf32>
    %448 = vector.shape_cast %447 : vector<1x1x4x16xf32> to vector<4x16xf32>
    %cst_177 = arith.constant 0.000000e+00 : f32
    %449 = vector.shape_cast %23 : vector<1x16xi1> to vector<1x16xi1>
    %450 = vector.broadcast %449 : vector<1x16xi1> to vector<8x16xi1>
    %451 = vector.broadcast %cst_177 : f32 to vector<8x16xf32>
    %452 = arith.select %450, %443, %451 : vector<8x16xi1>, vector<8x16xf32>
    %cst_178 = arith.constant dense<0.000000e+00> : vector<8x16xf32>
    %453 = tpu.matmul %452, %444, %cst_178 {dimension_numbers = #tpu.dot_dimension_numbers<[1], [1], [0], [0], [0, 0, 1, 0], [], []>} : vector<8x16xf32>, vector<16x16xf32>, vector<8x16xf32> -> vector<8x16xf32>
    %cst_179 = arith.constant 0.353553385 : f32
    %454 = vector.broadcast %cst_179 : f32 to vector<8x16xf32>
    %455 = arith.mulf %453, %454 : vector<8x16xf32>
    %456 = vector.shape_cast %455 : vector<8x16xf32> to vector<1x8x16xf32>
    %457 = vector.shape_cast %448 : vector<4x16xf32> to vector<4x1x16xf32>
    %458 = vector.broadcast %456 : vector<1x8x16xf32> to vector<4x8x16xf32>
    %459 = vector.broadcast %457 : vector<4x1x16xf32> to vector<4x8x16xf32>
    %460 = arith.addf %458, %459 : vector<4x8x16xf32>
    %cst_180 = arith.constant dense<0xFF800000> : vector<4x8xf32>
    %461 = vector.multi_reduction <maximumf>, %460, %cst_180 [2] : vector<4x8x16xf32> to vector<4x8xf32>
    %462 = vector.shape_cast %461 : vector<4x8xf32> to vector<4x8x1xf32>
    %463 = vector.broadcast %462 : vector<4x8x1xf32> to vector<4x8x16xf32>
    %464 = arith.subf %460, %463 : vector<4x8x16xf32>
    %465 = math.exp %464 : vector<4x8x16xf32>
    %cst_181 = arith.constant dense<0.000000e+00> : vector<4x8xf32>
    %466 = vector.multi_reduction <add>, %465, %cst_181 [2] : vector<4x8x16xf32> to vector<4x8xf32>
    %467 = vector.shape_cast %446 : vector<4x16xf32> to vector<4x1x16xf32>
    %468 = vector.broadcast %467 : vector<4x1x16xf32> to vector<4x8x16xf32>
    %469 = arith.mulf %465, %468 : vector<4x8x16xf32>
    %cst_182 = arith.constant dense<0.000000e+00> : vector<4x8xf32>
    %470 = vector.multi_reduction <add>, %469, %cst_182 [2] : vector<4x8x16xf32> to vector<4x8xf32>
    %471 = tpu.reciprocal %466 {approx = true} : vector<4x8xf32> -> vector<4x8xf32>
    %472 = arith.mulf %466, %471 : vector<4x8xf32>
    %cst_183 = arith.constant 2.000000e+00 : f32
    %473 = vector.broadcast %cst_183 : f32 to vector<4x8xf32>
    %474 = arith.subf %473, %472 : vector<4x8xf32>
    %475 = arith.mulf %471, %474 : vector<4x8xf32>
    %476 = arith.mulf %470, %475 : vector<4x8xf32>
    %cst_184 = arith.constant 0.000000e+00 : f32
    %477 = vector.shape_cast %28 : vector<1x16xi1> to vector<1x16xi1>
    %478 = vector.broadcast %477 : vector<1x16xi1> to vector<8x16xi1>
    %479 = vector.broadcast %cst_184 : f32 to vector<8x16xf32>
    %480 = arith.select %478, %443, %479 : vector<8x16xi1>, vector<8x16xf32>
    %cst_185 = arith.constant dense<0.000000e+00> : vector<8x16xf32>
    %481 = tpu.matmul %480, %444, %cst_185 {dimension_numbers = #tpu.dot_dimension_numbers<[1], [1], [0], [0], [0, 0, 1, 0], [], []>} : vector<8x16xf32>, vector<16x16xf32>, vector<8x16xf32> -> vector<8x16xf32>
    %cst_186 = arith.constant 0.353553385 : f32
    %482 = vector.broadcast %cst_186 : f32 to vector<8x16xf32>
    %483 = arith.mulf %481, %482 : vector<8x16xf32>
    %484 = vector.shape_cast %483 : vector<8x16xf32> to vector<1x8x16xf32>
    %485 = vector.shape_cast %448 : vector<4x16xf32> to vector<4x1x16xf32>
    %486 = vector.broadcast %484 : vector<1x8x16xf32> to vector<4x8x16xf32>
    %487 = vector.broadcast %485 : vector<4x1x16xf32> to vector<4x8x16xf32>
    %488 = arith.addf %486, %487 : vector<4x8x16xf32>
    %cst_187 = arith.constant dense<0xFF800000> : vector<4x8xf32>
    %489 = vector.multi_reduction <maximumf>, %488, %cst_187 [2] : vector<4x8x16xf32> to vector<4x8xf32>
    %490 = vector.shape_cast %489 : vector<4x8xf32> to vector<4x8x1xf32>
    %491 = vector.broadcast %490 : vector<4x8x1xf32> to vector<4x8x16xf32>
    %492 = arith.subf %488, %491 : vector<4x8x16xf32>
    %493 = math.exp %492 : vector<4x8x16xf32>
    %cst_188 = arith.constant dense<0.000000e+00> : vector<4x8xf32>
    %494 = vector.multi_reduction <add>, %493, %cst_188 [2] : vector<4x8x16xf32> to vector<4x8xf32>
    %495 = vector.shape_cast %446 : vector<4x16xf32> to vector<4x1x16xf32>
    %496 = vector.broadcast %495 : vector<4x1x16xf32> to vector<4x8x16xf32>
    %497 = arith.mulf %493, %496 : vector<4x8x16xf32>
    %cst_189 = arith.constant dense<0.000000e+00> : vector<4x8xf32>
    %498 = vector.multi_reduction <add>, %497, %cst_189 [2] : vector<4x8x16xf32> to vector<4x8xf32>
    %499 = tpu.reciprocal %494 {approx = true} : vector<4x8xf32> -> vector<4x8xf32>
    %500 = arith.mulf %494, %499 : vector<4x8xf32>
    %cst_190 = arith.constant 2.000000e+00 : f32
    %501 = vector.broadcast %cst_190 : f32 to vector<4x8xf32>
    %502 = arith.subf %501, %500 : vector<4x8xf32>
    %503 = arith.mulf %499, %502 : vector<4x8xf32>
    %504 = arith.mulf %498, %503 : vector<4x8xf32>
    %505 = tpu.concatenate %476, %504 in 0 : vector<4x8xf32>, vector<4x8xf32> -> vector<8x8xf32>
    %cst_191 = arith.constant dense<0.000000e+00> : vector<8x32xf32>
    %506 = tpu.matmul %505, %8, %cst_191 {dimension_numbers = #tpu.dot_dimension_numbers<[0], [0], [1], [1], [0, 1, 1, 1], [], []>} : vector<8x8xf32>, vector<8x32xf32>, vector<8x32xf32> -> vector<8x32xf32>
    %507 = vector.broadcast %9 : vector<1x32xf32> to vector<8x32xf32>
    %508 = arith.addf %506, %507 : vector<8x32xf32>
    %c6_192 = arith.constant 6 : index
    %c0_193 = arith.constant 0 : index
    %c0_194 = arith.constant 0 : index
    %509 = vector.load %arg6[%c6_192, %c0_193, %c0_194] : memref<8x8x32xf32, #tpu.memory_space<vmem>>, vector<1x8x32xf32>
    %510 = vector.shape_cast %509 : vector<1x8x32xf32> to vector<8x32xf32>
    %511 = vector.shape_cast %508 : vector<8x32xf32> to vector<1x8x32xf32>
    tpu.vector_store %arg6[%c6_192, %c0_193, %c0_194], %511 {strides = array<i32>} : memref<8x8x32xf32, #tpu.memory_space<vmem>>, vector<1x8x32xf32>,
    %512 = vector.extract_strided_slice %13 {offsets = [56, 0], sizes = [8, 16], strides = [1, 1]} : vector<64x16xf32> to vector<8x16xf32>
    %513 = vector.extract_strided_slice %17 {offsets = [112, 0], sizes = [16, 16], strides = [1, 1]} : vector<128x16xf32> to vector<16x16xf32>
    %c7 = arith.constant 7 : index
    %c0_195 = arith.constant 0 : index
    %c0_196 = arith.constant 0 : index
    %c0_197 = arith.constant 0 : index
    %514 = vector.load %arg3[%c7, %c0_195, %c0_196, %c0_197] : memref<8x2x4x16xf32, #tpu.memory_space<vmem>>, vector<1x1x4x16xf32>
    %515 = vector.shape_cast %514 : vector<1x1x4x16xf32> to vector<4x16xf32>
    %c7_198 = arith.constant 7 : index
    %c1_199 = arith.constant 1 : index
    %c0_200 = arith.constant 0 : index
    %c0_201 = arith.constant 0 : index
    %516 = vector.load %arg3[%c7_198, %c1_199, %c0_200, %c0_201] : memref<8x2x4x16xf32, #tpu.memory_space<vmem>>, vector<1x1x4x16xf32>
    %517 = vector.shape_cast %516 : vector<1x1x4x16xf32> to vector<4x16xf32>
    %cst_202 = arith.constant 0.000000e+00 : f32
    %518 = vector.shape_cast %23 : vector<1x16xi1> to vector<1x16xi1>
    %519 = vector.broadcast %518 : vector<1x16xi1> to vector<8x16xi1>
    %520 = vector.broadcast %cst_202 : f32 to vector<8x16xf32>
    %521 = arith.select %519, %512, %520 : vector<8x16xi1>, vector<8x16xf32>
    %cst_203 = arith.constant dense<0.000000e+00> : vector<8x16xf32>
    %522 = tpu.matmul %521, %513, %cst_203 {dimension_numbers = #tpu.dot_dimension_numbers<[1], [1], [0], [0], [0, 0, 1, 0], [], []>} : vector<8x16xf32>, vector<16x16xf32>, vector<8x16xf32> -> vector<8x16xf32>
    %cst_204 = arith.constant 0.353553385 : f32
    %523 = vector.broadcast %cst_204 : f32 to vector<8x16xf32>
    %524 = arith.mulf %522, %523 : vector<8x16xf32>
    %525 = vector.shape_cast %524 : vector<8x16xf32> to vector<1x8x16xf32>
    %526 = vector.shape_cast %517 : vector<4x16xf32> to vector<4x1x16xf32>
    %527 = vector.broadcast %525 : vector<1x8x16xf32> to vector<4x8x16xf32>
    %528 = vector.broadcast %526 : vector<4x1x16xf32> to vector<4x8x16xf32>
    %529 = arith.addf %527, %528 : vector<4x8x16xf32>
    %cst_205 = arith.constant dense<0xFF800000> : vector<4x8xf32>
    %530 = vector.multi_reduction <maximumf>, %529, %cst_205 [2] : vector<4x8x16xf32> to vector<4x8xf32>
    %531 = vector.shape_cast %530 : vector<4x8xf32> to vector<4x8x1xf32>
    %532 = vector.broadcast %531 : vector<4x8x1xf32> to vector<4x8x16xf32>
    %533 = arith.subf %529, %532 : vector<4x8x16xf32>
    %534 = math.exp %533 : vector<4x8x16xf32>
    %cst_206 = arith.constant dense<0.000000e+00> : vector<4x8xf32>
    %535 = vector.multi_reduction <add>, %534, %cst_206 [2] : vector<4x8x16xf32> to vector<4x8xf32>
    %536 = vector.shape_cast %515 : vector<4x16xf32> to vector<4x1x16xf32>
    %537 = vector.broadcast %536 : vector<4x1x16xf32> to vector<4x8x16xf32>
    %538 = arith.mulf %534, %537 : vector<4x8x16xf32>
    %cst_207 = arith.constant dense<0.000000e+00> : vector<4x8xf32>
    %539 = vector.multi_reduction <add>, %538, %cst_207 [2] : vector<4x8x16xf32> to vector<4x8xf32>
    %540 = tpu.reciprocal %535 {approx = true} : vector<4x8xf32> -> vector<4x8xf32>
    %541 = arith.mulf %535, %540 : vector<4x8xf32>
    %cst_208 = arith.constant 2.000000e+00 : f32
    %542 = vector.broadcast %cst_208 : f32 to vector<4x8xf32>
    %543 = arith.subf %542, %541 : vector<4x8xf32>
    %544 = arith.mulf %540, %543 : vector<4x8xf32>
    %545 = arith.mulf %539, %544 : vector<4x8xf32>
    %cst_209 = arith.constant 0.000000e+00 : f32
    %546 = vector.shape_cast %28 : vector<1x16xi1> to vector<1x16xi1>
    %547 = vector.broadcast %546 : vector<1x16xi1> to vector<8x16xi1>
    %548 = vector.broadcast %cst_209 : f32 to vector<8x16xf32>
    %549 = arith.select %547, %512, %548 : vector<8x16xi1>, vector<8x16xf32>
    %cst_210 = arith.constant dense<0.000000e+00> : vector<8x16xf32>
    %550 = tpu.matmul %549, %513, %cst_210 {dimension_numbers = #tpu.dot_dimension_numbers<[1], [1], [0], [0], [0, 0, 1, 0], [], []>} : vector<8x16xf32>, vector<16x16xf32>, vector<8x16xf32> -> vector<8x16xf32>
    %cst_211 = arith.constant 0.353553385 : f32
    %551 = vector.broadcast %cst_211 : f32 to vector<8x16xf32>
    %552 = arith.mulf %550, %551 : vector<8x16xf32>
    %553 = vector.shape_cast %552 : vector<8x16xf32> to vector<1x8x16xf32>
    %554 = vector.shape_cast %517 : vector<4x16xf32> to vector<4x1x16xf32>
    %555 = vector.broadcast %553 : vector<1x8x16xf32> to vector<4x8x16xf32>
    %556 = vector.broadcast %554 : vector<4x1x16xf32> to vector<4x8x16xf32>
    %557 = arith.addf %555, %556 : vector<4x8x16xf32>
    %cst_212 = arith.constant dense<0xFF800000> : vector<4x8xf32>
    %558 = vector.multi_reduction <maximumf>, %557, %cst_212 [2] : vector<4x8x16xf32> to vector<4x8xf32>
    %559 = vector.shape_cast %558 : vector<4x8xf32> to vector<4x8x1xf32>
    %560 = vector.broadcast %559 : vector<4x8x1xf32> to vector<4x8x16xf32>
    %561 = arith.subf %557, %560 : vector<4x8x16xf32>
    %562 = math.exp %561 : vector<4x8x16xf32>
    %cst_213 = arith.constant dense<0.000000e+00> : vector<4x8xf32>
    %563 = vector.multi_reduction <add>, %562, %cst_213 [2] : vector<4x8x16xf32> to vector<4x8xf32>
    %564 = vector.shape_cast %515 : vector<4x16xf32> to vector<4x1x16xf32>
    %565 = vector.broadcast %564 : vector<4x1x16xf32> to vector<4x8x16xf32>
    %566 = arith.mulf %562, %565 : vector<4x8x16xf32>
    %cst_214 = arith.constant dense<0.000000e+00> : vector<4x8xf32>
    %567 = vector.multi_reduction <add>, %566, %cst_214 [2] : vector<4x8x16xf32> to vector<4x8xf32>
    %568 = tpu.reciprocal %563 {approx = true} : vector<4x8xf32> -> vector<4x8xf32>
    %569 = arith.mulf %563, %568 : vector<4x8xf32>
    %cst_215 = arith.constant 2.000000e+00 : f32
    %570 = vector.broadcast %cst_215 : f32 to vector<4x8xf32>
    %571 = arith.subf %570, %569 : vector<4x8xf32>
    %572 = arith.mulf %568, %571 : vector<4x8xf32>
    %573 = arith.mulf %567, %572 : vector<4x8xf32>
    %574 = tpu.concatenate %545, %573 in 0 : vector<4x8xf32>, vector<4x8xf32> -> vector<8x8xf32>
    %cst_216 = arith.constant dense<0.000000e+00> : vector<8x32xf32>
    %575 = tpu.matmul %574, %8, %cst_216 {dimension_numbers = #tpu.dot_dimension_numbers<[0], [0], [1], [1], [0, 1, 1, 1], [], []>} : vector<8x8xf32>, vector<8x32xf32>, vector<8x32xf32> -> vector<8x32xf32>
    %576 = vector.broadcast %9 : vector<1x32xf32> to vector<8x32xf32>
    %577 = arith.addf %575, %576 : vector<8x32xf32>
    %c7_217 = arith.constant 7 : index
    %c0_218 = arith.constant 0 : index
    %c0_219 = arith.constant 0 : index
    %578 = vector.load %arg6[%c7_217, %c0_218, %c0_219] : memref<8x8x32xf32, #tpu.memory_space<vmem>>, vector<1x8x32xf32>
    %579 = vector.shape_cast %578 : vector<1x8x32xf32> to vector<8x32xf32>
    %580 = vector.shape_cast %577 : vector<8x32xf32> to vector<1x8x32xf32>
    tpu.vector_store %arg6[%c7_217, %c0_218, %c0_219], %580 {strides = array<i32>} : memref<8x8x32xf32, #tpu.memory_space<vmem>>, vector<1x8x32xf32>,
    return
  }
  func.func @transform_0(%arg0: i32) -> (i32, i32) {
    %c0_i32 = arith.constant 0 : i32
    %c0_i32_0 = arith.constant 0 : i32
    return %arg0, %c0_i32 : i32, i32
  }
  func.func @transform_1(%arg0: i32) -> (i32, i32) {
    %c0_i32 = arith.constant 0 : i32
    %c0_i32_0 = arith.constant 0 : i32
    return %arg0, %c0_i32 : i32, i32
  }
  func.func @transform_2(%arg0: i32) -> (i32, i32, i32, i32) {
    %c0_i32 = arith.constant 0 : i32
    %c0_i32_0 = arith.constant 0 : i32
    %c0_i32_1 = arith.constant 0 : i32
    %c0_i32_2 = arith.constant 0 : i32
    return %arg0, %c0_i32, %c0_i32_0, %c0_i32_1 : i32, i32, i32, i32
  }
  func.func @transform_3(%arg0: i32) -> (i32, i32, i32) {
    %c0_i32 = arith.constant 0 : i32
    %c0_i32_0 = arith.constant 0 : i32
    %c0_i32_1 = arith.constant 0 : i32
    %c0_i32_2 = arith.constant 0 : i32
    return %c0_i32, %c0_i32_0, %c0_i32_1 : i32, i32, i32
  }
  func.func @transform_4(%arg0: i32) -> (i32, i32) {
    %c0_i32 = arith.constant 0 : i32
    %c0_i32_0 = arith.constant 0 : i32
    %c0_i32_1 = arith.constant 0 : i32
    return %c0_i32, %c0_i32_0 : i32, i32
  }
  func.func @transform_5(%arg0: i32) -> (i32, i32, i32) {
    %c0_i32 = arith.constant 0 : i32
    %c0_i32_0 = arith.constant 0 : i32
    %c0_i32_1 = arith.constant 0 : i32
    return %arg0, %c0_i32, %c0_i32_0 : i32, i32, i32
  }
}

</mosaic_0001>

<bundles_post_ra>
// kernel: tpu_custom_call.1
= control target key start
LH: loop header
LB: loop body
LE: loop exit
PB: predicated region body
PF: predicated region fallthrough
CT: control target
= control target key end

     0   :  { %10 = vsyncpa [#allocation3], 0  ;;  %s7492_s0 = inlined_call_operand.vmem [shape: f32[128,16], index: 0, kind: input, shape index: {}]   ;;  %s7493_s1 = inlined_call_operand.vmem [shape: f32[256,16], index: 1, kind: input, shape index: {}]   ;;  %s7494_s2 = inlined_call_operand.vmem [shape: f32[16,2,4,16], index: 2, kind: input, shape index: {}]   ;;  %s7495_s3 = inlined_call_operand.vmem [shape: f32[2,17,16], index: 3, kind: input, shape index: {}]   ;;  %s7496_s4 = inlined_call_operand.vmem [shape: f32[9,32], index: 4, kind: input, shape index: {}]   ;;  %s7497_s5 = inlined_call_operand.hbm [shape: f32[16,8,32], index: 5, kind: output, shape index: {}]  }
   0x1   :  { %12 = vsyncpa [#allocation3 + $0x1], 0  ;;  %s6135_s18 = smov 0   ;;  %s6137_s19 = smov 0  }
   0x2   :  { %s6139_s20 = smov 0   ;;  %s6141_s21 = smov 0  }
   0x3 LB: > { %s6156_s22 = sadd.s32 4294967295, %s6096_s21   ;;  %s5224_s23 = sadd.s32 4294967294, %s6096_s21   ;;  %s6096_s21 = sphi %s6141_s21, %s7528_s21   ;;  %s6092_s20 = sphi %s6139_s20, %s7527_s20   ;;  %s6088_s19 = sphi %s6137_s19, %s7526_s19   ;;  %s6084_s18 = sphi %s6135_s18, %s7525_s18  }
   0x4   : > { %s6160_s24 = sadd.s32 1, %s6096_s21   ;;  %s145_s25 = sadd.s32 1, %s6092_s20 }
   0x5   : > { %s142_s26 = ssub.s32 %s6096_s21, %s6160_s24  ;;  %p155_p0 = scmp.ne.s32.totalorder %s6092_s20, %s6088_s19 }
   0x6   : > { %p143_p1 = scmp.eq.s32.totalorder %s142_s26, 0  ;;  %p156_p2 = scmp.eq.s32.totalorder %s6156_s22, 1 }
   0x7   : > { %p161_p3 = scmp.ne.s32.totalorder %s6088_s19, %s6084_s18  ;;  %p162_p4 = scmp.eq.s32.totalorder %s5224_s23, 1 }
   0x8   : > { %s6171_s27 = scalar_select %p143_p1, %s6092_s20, %s145_s25  }
   0x9   : > { %p6173_p5 = por %p156_p2, %p155_p0  ;;  %p6177_p6 = por %p162_p4, %p161_p3 }
   0xa   : > { %p5227_p7 = scmp.ge.s32.totalorder %s6096_s21, 1  ;;  %p214_p8 = scmp.lt.s32.totalorder %s6096_s21, 3 }
   0xc   : > { %p215_p9 = pnand %p5227_p7, %p214_p8 }
   0xe   : > { %218 = sbr.rel (%p215_p9) target bundleno = 6051 (0x17a3), region = 40 }
  0x15   : > { %v5236_v0 = vld [vmem:[%s7495_s3 + $0x18] sm:$0xff]  ;;  %v5237_v1 = vld [vmem:[%s7495_s3 + $0x20] sm:$0xff]  ;;  %s5231_s9 = sshll.u32 %s6156_s22, 4  ;;  %s5229_s12 = sshll.u32 %s6156_s22, 3  ;;  %v274_v4 = vld [vmem:[%s7495_s3 + $0x8] sm:$0xff]  ;;  %vm294_vm0 = vcmask 130048   ;;  %v637_v25 = vlaneseq }
  0x16   : > { %v273_v2 = vld [vmem:[%s7495_s3] sm:$0xff]  ;;  %v5659_v3 = vpack.c.bf16 %v5237_v1, %v5236_v0  ;;  %p260_p10 = scmp.lt.s32.totalorder %s5231_s9, 31  ;;  %p254_p11 = scmp.lt.s32.totalorder %s5229_s12, 15  ;;  %v7498_v24 = vmov 0.0|0.0   ;;  %vm6099_vm1 = vmmov 0   ;;  %v7500_v32 = vmov 0.0   ;;  %vm6283_vm2 = vmpackc.low %vm294_vm0, %vm294_vm0 }
  0x17   : > { %v5655_v5 = vpack.c.bf16 %v274_v4, %v273_v2  ;;  %v6256_v30 = vand.u32 127, %v637_v25  ;;  %v6258_v31 = vshrl.u32 %v637_v25, 7  ;;  %v6277_v36 = vld [vmem:[%s7495_s3 + $0x28] ss:$0 sm:$0xff]  ;;  %v6290_v44 = vld [vmem:[%s7495_s3 + $0x10] ss:$0 sm:$0xff] }
  0x18   : > { %5660 = vmatprep.subr.bf16.mxu1 %v5659_v3  ;;  %s7530_s9 = smov (!%p260_p10, %s5231_s9), 31  ;;  %s7532_s12 = smov (!%p254_p11, %s5229_s12), 15  ;;  %vm1070_vm7 = vcmask 1041409   ;;  %vm1072_vm8 = vcmask 1042434   ;;  %vm1097_vm9 = vcmask 1045509   ;;  %vm1099_vm10 = vcmask 1046534  }
  0x19   : > { %5662 = vmatpush3.bf16.msra.mxu1 %v5659_v3  ;;  %5656 = vmatprep.subr.bf16.mxu0 %v5655_v5  ;;  %s5232_s15 = sshll.u32 %s7530_s9, 3  ;;  %s5230_s25 = sshll.u32 %s7532_s12, 3  ;;  %v6266_v33 = vsub.s32 %v6256_v30, %v6258_v31  ;;  %vm640_vm3 = vcmp.lt.s32.totalorder %v6256_v30, 8  ;;  %vm642_vm4 = vcmp.ge.s32.totalorder %v6256_v30, 8  ;;  %vm643_vm5 = vcmp.lt.s32.totalorder %v6256_v30, 16 }
  0x1a   : > { %5658 = vmatpush3.bf16.msra.mxu0 %v5655_v5  ;;  %s6202_s23 = scalar_lea.vmem %s7493_s1, %s5232_s15  ;;  %s6213_s6 = scalar_lea.vmem %s7492_s0, %s5230_s25  ;;  %5671 = vmatprep.subr.bf16.mxu1 %v7498_v24  ;;  %vm6325_vm6 = vmand %vm642_vm4, %vm643_vm5  ;;  %vm1074_vm11 = vcmask 1043459   ;;  %vm1101_vm12 = vcmask 1047559   ;;  %vm1104_vm13 = vcmask 1043456   ;;  %vm1142_vm14 = vcmask 64512  }
  0x1b   : > { %v424_v6 = vld [vmem:[%s6202_s23] sm:$0xff]  ;;  %v425_v7 = vld [vmem:[%s6202_s23 + $0x8] sm:$0xff]  ;;  %v426_v8 = vld [vmem:[%s6202_s23 + $0x10] sm:$0xff]  ;;  %5663 = vmatprep.subr.bf16.mxu0 %v7498_v24  ;;  %s6374_s14 = scalar_lea.vmem %s7494_s2, %s5230_s25  ;;  %s250_s16 = sand.u32 1, %s6088_s19   ;;  %vm1216_vm15 = vcmask 261120  }
  0x1c   : > { %5479 = vmatprep.mubr.msk.f32.mxu1 %vm294_vm0, %v424_v6  ;;  %v282_v9 = vld [vmem:[%s6213_s6] sm:$0xff]  ;;  %v283_v10 = vld [vmem:[%s6213_s6 + $0x8] sm:$0xff]  ;;  %v427_v11 = vld [vmem:[%s6202_s23 + $0x18] sm:$0xff]  ;;  %s5228_s17 = sshll.u32 %s250_s16, 6  ;;  %s7451_s8 = scalar_lea.sflag [#allocation3], %s250_s16 }
  0x1d   : > { %5480 = vmatmul.mubr.msk.f32.vlgmr.msra.gmra.mrb[0].mxu1 %vm294_vm0, %v425_v7  ;;  %5463 = vmatprep.mubr.msk.f32.mxu0 %vm294_vm0, %v282_v9  ;;  %v284_v12 = vld [vmem:[%s6213_s6 + $0x10] sm:$0xff]  ;;  %v428_v13 = vld [vmem:[%s6202_s23 + $0x20] sm:$0xff]  ;;  %v429_v14 = vld [vmem:[%s6202_s23 + $0x28] sm:$0xff]  ;;  %s6545_s26 = scalar_lea.vmem [#allocation2], %s5228_s17  ;;  %s6102_s9 = smov [#allocation2]  }
  0x1e   : > { %5482 = vmatprep.mubr.msk.f32.mxu1 %vm294_vm0, %v426_v8  ;;  %5464 = vmatmul.mubr.msk.f32.vlgmr.msra.gmra.mrb[0].mxu0 %vm294_vm0, %v283_v10  ;;  %v430_v15 = vld [vmem:[%s6202_s23 + $0x30] sm:$0xff]  ;;  %v431_v16 = vld [vmem:[%s6202_s23 + $0x38] sm:$0xff]  ;;  %v432_v17 = vld [vmem:[%s6202_s23 + $0x40] sm:$0xff]  ;;  %s5138_s25 = sshll.u32 %s6545_s26, 4  ;;  %s6038_s10 = sshll.u32 %s6102_s9, 4  ;;  %s7444_s25 = int_to_ptr.vmem [resolvable:$true] %s5138_s25  ;;  %s6039_s10 = int_to_ptr.vmem [resolvable:$false] %s6038_s10 }
  0x1f   : > { %5466 = vmatprep.mubr.msk.f32.mxu0 %vm294_vm0, %v284_v12  ;;  %v285_v18 = vld [vmem:[%s6213_s6 + $0x18] sm:$0xff]  ;;  %v433_v19 = vld [vmem:[%s6202_s23 + $0x48] sm:$0xff]  ;;  %v286_v20 = vld [vmem:[%s6213_s6 + $0x20] sm:$0xff]  ;;  %s6040_s11 = scalar_lea.vmem %s6039_s10, 2048  ;;  %p6041_p1 = scmp.lt.s32.totalorder %s7444_s25, %s6039_s10 }
  0x20   : > { %v434_v21 = vld [vmem:[%s6202_s23 + $0x50] sm:$0xff]  ;;  %v287_v22 = vld [vmem:[%s6213_s6 + $0x28] sm:$0xff]  ;;  %v435_v23 = vld [vmem:[%s6202_s23 + $0x58] sm:$0xff] }
  0x21   : > { %5483 = vmatmul.mubr.msk.f32.gmra.mrb[2].mxu1 %vm294_vm0, %v427_v11  ;;  %v288_v26 = vld [vmem:[%s6213_s6 + $0x30] sm:$0xff]  ;;  %v436_v27 = vld [vmem:[%s6202_s23 + $0x60] sm:$0xff]  ;;  %v289_v28 = vld [vmem:[%s6213_s6 + $0x38] sm:$0xff] }
  0x22   : > { %5485 = vmatprep.mubr.msk.f32.mxu1 %vm294_vm0, %v428_v13  ;;  %5467 = vmatmul.mubr.msk.f32.gmra.mrb[2].mxu0 %vm294_vm0, %v285_v18  ;;  %v437_v29 = vld [vmem:[%s6202_s23 + $0x68] sm:$0xff]  ;;  %v438_v34 = vld [vmem:[%s6202_s23 + $0x70] sm:$0xff]  ;;  %v439_v35 = vld [vmem:[%s6202_s23 + $0x78] sm:$0xff]  ;;  %s5366_s23 = sshll.u32 %s6156_s22, 10  ;;  %s6034_s22 = scalar_lea.vmem %s7444_s25, 1024 }
  0x23   : > { %5469 = vmatprep.mubr.msk.f32.mxu0 %vm294_vm0, %v286_v20  ;;  %s7442_s7 = scalar_lea.hbm %s7497_s5, %s5366_s23  ;;  %p6035_p12 = scmp.ne.s32.totalorder %s7444_s25, %s6034_s22 }
  0x24   : > { %p6042_p2 = scmp.lt.s32.totalorder %s6040_s11, %s6034_s22 }
  0x25   : > { %5486 = vmatmul.mubr.msk.f32.gmra.mrb[4].mxu1 %vm294_vm0, %v429_v14  ;;  %p6036_p13 = pnand %p6035_p12, %p6173_p5 }
  0x26   : > { %5488 = vmatprep.mubr.msk.f32.mxu1 %vm294_vm0, %v430_v15  ;;  %5470 = vmatmul.mubr.msk.f32.gmra.mrb[4].mxu0 %vm294_vm0, %v287_v22  ;;  %p6043_p3 = por %p6042_p2, %p6041_p1 }
  0x27   : > { %5472 = vmatprep.mubr.msk.f32.mxu0 %vm294_vm0, %v288_v26  ;;  %p6037_p0 = pneg %p6036_p13 }
  0x29   : > { %5489 = vmatmul.mubr.msk.f32.gmra.mrb[6].mxu1 %vm294_vm0, %v431_v16  ;;  %p6044_p4 = pnand %p6043_p3, %p6037_p0 }
  0x2a   : > { %5491 = vmatprep.mubr.msk.f32.mxu1 %vm294_vm0, %v432_v17  ;;  %5473 = vmatmul.mubr.msk.f32.gmra.mrb[6].mxu0 %vm294_vm0, %v289_v28 }
  0x2b   : > { %5507 = vmatprep.mubr.msk.f32.mxu0 %vm6099_vm1, %v7500_v32 }
  0x2d   : > { %5492 = vmatmul.mubr.msk.f32.gmra.mrb[8].mxu1 %vm294_vm0, %v433_v19 }
  0x2e   : > { %5494 = vmatprep.mubr.msk.f32.mxu1 %vm294_vm0, %v434_v21 }
  0x31   : > { %5495 = vmatmul.mubr.msk.f32.gmra.mrb[10].mxu1 %vm294_vm0, %v435_v23 }
  0x32   : > { %5497 = vmatprep.mubr.msk.f32.mxu1 %vm294_vm0, %v436_v27 }
  0x35   : > { %5498 = vmatmul.mubr.msk.f32.gmra.mrb[12].mxu1 %vm294_vm0, %v437_v29 }
  0x36   : > { %5500 = vmatprep.mubr.msk.f32.mxu1 %vm294_vm0, %v438_v34  ;;  %v6101_v34 = vmov 1966171168  }
  0x39   : > { %5501 = vmatmul.mubr.msk.f32.gmra.mrb[14].mxu1 %vm294_vm0, %v439_v35  ;;  %v741_v35 = vunpack.c.l.s4 %v6101_v34 }
  0x3a   : > { %5526 = vmatprep.mubr.msk.f32.mxu1 %vm6099_vm1, %v7500_v32 }
  0xf0   : > { %v5481_v37 = vpop.f32.mrb[0].mxu1 }
  0xf1   : > { %v564_v38 = vadd.f32 %v5481_v37, %v6277_v36  ;;  %v558_v39 = vpop.f32.mrb[1].mxu1  ;;  %v5465_v40 = vpop.f32.mrb[0].mxu0  ;;  %v742_v37 = vunpack.c.0.s8 %v741_v35 }
  0xf2   : > { %v559_v41 = vadd.f32 %v6277_v36, %v558_v39  ;;  %v385_v42 = vpop.f32.mrb[1].mxu0  ;;  %v6310_v57 = vadd.f32 %v5465_v40, %v6290_v44  ;;  %v6381_v40 = vsub.s32 0, %v6258_v31 }
  0xf3   : > { %v386_v50 = vadd.f32 %v6290_v44, %v385_v42  ;;  %v6378_v39 = vsub.s32 %v742_v37, %v6258_v31 }
  0xf4   : > { %v5664_v45 = vpack.c.bf16 %v564_v38, %v559_v41  ;;  %v5484_v46 = vpop.f32.mrb[2].mxu1  ;;  %v1222_v59 = vsel %vm640_vm3, %v6310_v57, 0.0  ;;  %v5269_v38 = vld.sshfl [vmem:[%s6374_s14 + $0x4] sm:$0x33 pattern:$0x75316420] }
  0xf5   : > { %v574_v47 = vadd.f32 %v5484_v46, %v6277_v36  ;;  %v568_v48 = vpop.f32.mrb[3].mxu1  ;;  %v650_v55 = vsel %vm640_vm3, %v386_v50, 0.0  ;;  %v899_v61 = vsel %vm6325_vm6, %v386_v50, 0.0  ;;  %v6339_v2 = vpop.f32.mrb[2].mxu0  ;;  %v746_v41 = vrot.slane %v5269_v38, %v6378_v39 }
  0xf6   : > { %5666 = vmatpush3.bf16.xpose.msk.msra.mxu0 %vm6283_vm2, %v5664_v45  ;;  %v569_v49 = vadd.f32 %v6277_v36, %v568_v48  ;;  %v6343_v5 = vpop.f32.mrb[3].mxu0 }
  0xf7   : > { %5667 = vmatprep.subr.bf16.mxu0 %v7498_v24  ;;  %v759_v42 = vrot.slane %v746_v41, %v6381_v40  ;;  %v754_v50 = vcombine.high %v746_v41, %v746_v41 }
  0xf8   : > { %v6299_v51 = vpack.c.bf16 %v574_v47, %v569_v49  ;;  %v5487_v52 = vpop.f32.mrb[4].mxu1 }
  0xf9   : > { %v584_v53 = vadd.f32 %v5487_v52, %v6277_v36  ;;  %v578_v54 = vpop.f32.mrb[5].mxu1  ;;  %v6347_v9 = vpop.f32.mrb[4].mxu0 }
  0xfa   : > { %5674 = vmatpush3.bf16.xpose.msk.msra.mxu1 %vm6283_vm2, %v6299_v51  ;;  %v579_v56 = vadd.f32 %v6277_v36, %v578_v54  ;;  %7511 = vst [vmem:[#allocation5_spill] sm:$0xff] %v6347_v9  ;;  %v6351_v11 = vpop.f32.mrb[5].mxu0 }
  0xfb   : > { %5536 = vmatprep.subr.mxu1 %v7500_v32 }
  0xfc   : > { %v6312_v58 = vpack.c.bf16 %v584_v53, %v579_v56  ;;  %v5490_v62 = vpop.f32.mrb[6].mxu1  ;;  %v767_v56 = vrot.slane %v754_v50, %v6381_v40 }
  0xfd   : > { %5508 = vmatmul.mubr.msk.f32.vlgmr.msra.gmra.mrb[8].mxu0 %vm294_vm0, %v650_v55  ;;  %v594_v63 = vadd.f32 %v5490_v62, %v6277_v36  ;;  %v588_v0 = vpop.f32.mrb[7].mxu1  ;;  %v6353_v12 = vpop.f32.mrb[6].mxu0 }
  0xfe   : > { %5670 = vmatpush3.bf16.xpose.msk.msra.mxu0 %vm6283_vm2, %v5664_v45  ;;  %5514 = vmatprep.mubr.msk.f32.mxu0 %vm6099_vm1, %v7500_v32  ;;  %v589_v1 = vadd.f32 %v6277_v36, %v588_v0  ;;  %7512 = vst [vmem:[#allocation6_spill] sm:$0xff] %v6353_v12  ;;  %v6355_v13 = vpop.f32.mrb[7].mxu0 }
  0xff   : > { %5517 = vmatprep.subr.mxu0 %v7500_v32  ;;  %7513 = vst [vmem:[#allocation7_spill] sm:$0xff] %v6355_v13 }
 0x100   : > { %v6341_v3 = vpack.c.bf16 %v594_v63, %v589_v1  ;;  %v5493_v4 = vpop.f32.mrb[8].mxu1 }
 0x101   : > { %5527 = vmatmul.mubr.msk.f32.vlgmr.msra.gmra.mrb[16].mxu1 %vm294_vm0, %v1222_v59  ;;  %v604_v6 = vadd.f32 %v5493_v4, %v6277_v36  ;;  %v598_v7 = vpop.f32.mrb[9].mxu1 }
 0x102   : > { %5538 = vmatprep.mubr.msk.f32.mxu1 %vm6099_vm1, %v7500_v32  ;;  %v599_v8 = vadd.f32 %v6277_v36, %v598_v7 }
 0x104   : > { %v6349_v10 = vpack.c.bf16 %v604_v6, %v599_v8  ;;  %v5496_v14 = vpop.f32.mrb[10].mxu1 }
 0x105   : > { %5515 = vmatmul.mubr.msk.f32.vlgmr.msra.gmra.mrb[10].mxu0 %vm294_vm0, %v899_v61  ;;  %v608_v15 = vpop.f32.mrb[11].mxu1  ;;  %v614_v17 = vadd.f32 %v5496_v14, %v6277_v36 }
 0x106   : > { %5519 = vmatprep.mubr.msk.f32.mxu0 %vm6099_vm1, %v7500_v32  ;;  %v609_v18 = vadd.f32 %v6277_v36, %v608_v15 }
 0x108   : > { %v5499_v16 = vpop.f32.mrb[12].mxu1  ;;  %v6361_v23 = vpack.c.bf16 %v614_v17, %v609_v18 }
 0x109   : > { %v624_v19 = vadd.f32 %v5499_v16, %v6277_v36  ;;  %v618_v20 = vpop.f32.mrb[13].mxu1 }
 0x10a   : > { %v619_v21 = vadd.f32 %v6277_v36, %v618_v20  ;;  %7514 = vst [vmem:[#allocation8_spill] sm:$0xff] %v6361_v23 }
 0x10c   : > { %v5502_v22 = vpop.f32.mrb[14].mxu1  ;;  %v6364_v27 = vpack.c.bf16 %v624_v19, %v619_v21 }
 0x10d   : > { %v634_v25 = vadd.f32 %v5502_v22, %v6277_v36  ;;  %v628_v26 = vpop.f32.mrb[15].mxu1 }
 0x10e   : > { %7515 = vst [vmem:[#allocation9_spill] sm:$0xff] %v6364_v27  ;;  %v629_v28 = vadd.f32 %v6277_v36, %v628_v26  ;;  %v739_v36 = vcombine.high %v5269_v38, %v5269_v38 }
 0x110   : > { %v6367_v29 = vpack.c.bf16 %v634_v25, %v629_v28  ;;  %v753_v45 = vrot.slane %v739_v36, %v6378_v39 }
 0x112   : > { %7516 = vst [vmem:[#allocation10_spill] sm:$0xff] %v6367_v29  ;;  %v763_v49 = vrot.slane %v753_v45, %v6381_v40  ;;  %v755_v59 = vcombine.high %v753_v45, %v753_v45 }
 0x114   : > { %v771_v4 = vrot.slane %v755_v59, %v6381_v40 }
 0x1d0   : > { %v726_v46 = vpop.f32.mrb[8].mxu0 }
 0x1d1   : > { %v730_v47 = vmul.f32 0.35355338, %v726_v46  ;;  %v5509_v48 = vpop.f32.mrb[9].mxu0 }
 0x1d3   : > { %v776_v52 = vadd.f32 %v759_v42, %v730_v47  ;;  %v777_v55 = vadd.f32 %v763_v49, %v730_v47  ;;  %v778_v1 = vadd.f32 %v767_v56, %v730_v47  ;;  %v779_v14 = vadd.f32 %v771_v4, %v730_v47 }
 0x1d4   : > { %v6387_v53 = vpop.f32.mrb[16].mxu1 }
 0x1d5   : > { %v780_v54 = vsel %vm294_vm0, %v776_v52, -inf  ;;  %v5528_v31 = vpop.f32.mrb[17].mxu1  ;;  %v783_v0 = vsel %vm294_vm0, %v777_v55, -inf  ;;  %v786_v7 = vsel %vm294_vm0, %v778_v1, -inf  ;;  %v789_v16 = vsel %vm294_vm0, %v779_v14, -inf }
 0x1d6   : > { %781 = vmax.xlane.f32.xlu0 %v780_v54 }
 0x1d8   : > { %v969_v61 = vpop.f32.mrb[10].mxu0 }
 0x1d9   : > { %v973_v62 = vmul.f32 0.35355338, %v969_v61  ;;  %v5516_v63 = vpop.f32.mrb[11].mxu0 }
 0x1da   : > { %784 = vmax.xlane.f32.xlu0 %v783_v0 }
 0x1db   : > { %v974_v6 = vadd.f32 %v973_v62, %v759_v42  ;;  %v975_v15 = vadd.f32 %v973_v62, %v763_v49  ;;  %v976_v18 = vadd.f32 %v973_v62, %v767_v56  ;;  %v977_v20 = vadd.f32 %v973_v62, %v771_v4 }
 0x1dd   : > { %v978_v8 = vsel %vm294_vm0, %v974_v6, -inf  ;;  %v981_v17 = vsel %vm294_vm0, %v975_v15, -inf  ;;  %v984_v19 = vsel %vm294_vm0, %v976_v18, -inf  ;;  %v987_v21 = vsel %vm294_vm0, %v977_v20, -inf }
 0x1de   : > { %787 = vmax.xlane.f32.xlu0 %v786_v7  ;;  %979 = vmax.xlane.f32.xlu1 %v978_v8 }
 0x1e2   : > { %790 = vmax.xlane.f32.xlu0 %v789_v16  ;;  %982 = vmax.xlane.f32.xlu1 %v981_v17 }
 0x1e6   : > { %985 = vmax.xlane.f32.xlu1 %v984_v19 }
 0x1ea   : > { %988 = vmax.xlane.f32.xlu1 %v987_v21 }
 0x263   : > { %v782_v22 = vpop.xlane.xlu0 %781 }
 0x264   : > { %v792_v25 = vsub.f32 %v776_v52, %v782_v22 }
 0x266   : > { %v796_v26 = vmul.f32 1.442695, %v792_v25 }
 0x267   : > { %v785_v28 = vpop.xlane.xlu0 %784 }
 0x268   : > { %5772 = vpow2.f32 %v796_v26  ;;  %v793_v34 = vsub.f32 %v777_v55, %v785_v28 }
 0x26a   : > { %v798_v35 = vmul.f32 1.442695, %v793_v34 }
 0x26b   : > { %v788_v37 = vpop.xlane.xlu0 %787  ;;  %v980_v38 = vpop.xlane.xlu1 %979 }
 0x26c   : > { %5774 = vpow2.f32 %v798_v35  ;;  %v794_v36 = vsub.f32 %v778_v1, %v788_v37  ;;  %v990_v41 = vsub.f32 %v974_v6, %v980_v38  ;;  %v5270_v1 = vld.sshfl [vmem:[%s6374_s14] sm:$0x33 pattern:$0x75316420] }
 0x26d   : > { %v831_v8 = vrot.slane %v5270_v1, %v6378_v39 }
 0x26e   : > { %v800_v42 = vmul.f32 1.442695, %v794_v36  ;;  %v994_v45 = vmul.f32 1.442695, %v990_v41 }
 0x26f   : > { %v791_v46 = vpop.xlane.xlu0 %790  ;;  %v983_v47 = vpop.xlane.xlu1 %982  ;;  %v839_v19 = vcombine.high %v831_v8, %v831_v8 }
 0x270   : > { %5776 = vpow2.f32 %v800_v42  ;;  %v795_v48 = vsub.f32 %v779_v14, %v791_v46  ;;  %v991_v49 = vsub.f32 %v975_v15, %v983_v47  ;;  %v824_v15 = vcombine.high %v5270_v1, %v5270_v1 }
 0x271   : > { %5778 = vpow2.f32 %v994_v45  ;;  %v852_v35 = vrot.slane %v839_v19, %v6381_v40 }
 0x272   : > { %v5773_v50 = vpop.eup %5772  ;;  %v802_v52 = vmul.f32 1.442695, %v795_v48  ;;  %v996_v54 = vmul.f32 1.442695, %v991_v49  ;;  %v838_v22 = vrot.slane %v824_v15, %v6378_v39 }
 0x273   : > { %v986_v31 = vpop.xlane.xlu1 %985  ;;  %v804_v55 = vsel %vm294_vm0, %v5773_v50, 0.0 }
 0x274   : > { %v992_v56 = vsub.f32 %v976_v18, %v986_v31  ;;  %805 = vadd.xlane.f32.xlu0 %v804_v55  ;;  %5780 = vpow2.f32 %v996_v54  ;;  %v844_v18 = vrot.slane %v831_v8, %v6381_v40  ;;  %v848_v37 = vrot.slane %v838_v22, %v6381_v40  ;;  %v5281_v55 = vld.sshfl [vmem:[%s6374_s14 + $0xc] sm:$0x33 pattern:$0x75316420] }
 0x275   : > { %5782 = vpow2.f32 %v802_v52  ;;  %v840_v45 = vcombine.high %v838_v22, %v838_v22 }
 0x276   : > { %v5775_v59 = vpop.eup %5774  ;;  %v998_v61 = vmul.f32 1.442695, %v992_v56  ;;  %v861_v34 = vmul.f32 %v5773_v50, %v844_v18 }
 0x277   : > { %v989_v62 = vpop.xlane.xlu1 %988  ;;  %v807_v63 = vsel %vm294_vm0, %v5775_v59, 0.0  ;;  %v862_v46 = vmul.f32 %v5775_v59, %v848_v37  ;;  %v856_v49 = vrot.slane %v840_v45, %v6381_v40  ;;  %v1318_v59 = vrot.slane %v5281_v55, %v6378_v39 }
 0x278   : > { %5784 = vpow2.f32 %v998_v61  ;;  %v993_v0 = vsub.f32 %v977_v20, %v989_v62  ;;  %808 = vadd.xlane.f32.xlu1 %v807_v63  ;;  %v865_v36 = vsel %vm294_vm0, %v861_v34, 0.0  ;;  %v1311_v62 = vcombine.high %v5281_v55, %v5281_v55  ;;  %v6461_v34 = vld [vmem:[%s7496_s4] sm:$0xff] }
 0x279   : > { %v868_v50 = vsel %vm294_vm0, %v862_v46, 0.0  ;;  %5518 = vmatpush3.msra.mxu0 %v6461_v34  ;;  %5537 = vmatpush3.msra.mxu1 %v6461_v34 }
 0x27a   : > { %v5777_v4 = vpop.eup %5776  ;;  %v1000_v6 = vmul.f32 1.442695, %v993_v0  ;;  %v1302_v0 = vmul.f32 0.35355338, %v6387_v53  ;;  %5675 = vmatprep.subr.bf16.mxu0 %v7498_v24  ;;  %5683 = vmatprep.subr.bf16.mxu1 %v7498_v24 }
 0x27b   : > { %v810_v7 = vsel %vm294_vm0, %v5777_v4, 0.0  ;;  %v5779_v14 = vpop.eup %5778  ;;  %v863_v42 = vmul.f32 %v5777_v4, %v852_v35 }
 0x27c   : > { %5786 = vpow2.f32 %v1000_v6  ;;  %811 = vadd.xlane.f32.xlu0 %v810_v7  ;;  %v1002_v17 = vsel %vm294_vm0, %v5779_v14, 0.0  ;;  %v1014_v48 = vmul.f32 %v5779_v14, %v844_v18  ;;  %v6425_v6 = vrot.slane %v1318_v59, %v6381_v40 }
 0x27d   : > { %v871_v47 = vsel %vm294_vm0, %v863_v42, 0.0  ;;  %v1325_v7 = vrot.slane %v1311_v62, %v6378_v39 }
 0x27e   : > { %v5781_v16 = vpop.eup %5780  ;;  %v1018_v54 = vsel %vm294_vm0, %v1014_v48, 0.0  ;;  %v6430_v14 = vadd.f32 %v6425_v6, %v1302_v0 }
 0x27f   : > { %v5783_v21 = vpop.eup %5782  ;;  %v1005_v20 = vsel %vm294_vm0, %v5781_v16, 0.0  ;;  %v1015_v52 = vmul.f32 %v5781_v16, %v848_v37  ;;  %v6433_v15 = vrot.slane %v1325_v7, %v6381_v40  ;;  %v1326_v16 = vcombine.high %v1318_v59, %v1318_v59 }
 0x280   : > { %1003 = vadd.xlane.f32.xlu0 %v1002_v17  ;;  %1006 = vadd.xlane.f32.xlu1 %v1005_v20  ;;  %v813_v26 = vsel %vm294_vm0, %v5783_v21, 0.0  ;;  %v864_v31 = vmul.f32 %v5783_v21, %v856_v49  ;;  %v1352_v53 = vsel %vm294_vm0, %v6430_v14, -inf  ;;  %v1327_v19 = vcombine.high %v1325_v7, %v1325_v7 }
 0x281   : > { %v1021_v56 = vsel %vm294_vm0, %v1015_v52, 0.0  ;;  %v6438_v17 = vadd.f32 %v6433_v15, %v1302_v0  ;;  %v6441_v18 = vrot.slane %v1326_v16, %v6381_v40 }
 0x282   : > { %v5785_v25 = vpop.eup %5784  ;;  %v874_v63 = vsel %vm294_vm0, %v864_v31, 0.0  ;;  %v6449_v22 = vrot.slane %v1327_v19, %v6381_v40 }
 0x283   : > { %v1008_v28 = vsel %vm294_vm0, %v5785_v25, 0.0  ;;  %v1016_v61 = vmul.f32 %v5785_v25, %v852_v35  ;;  %v1355_v21 = vsel %vm294_vm0, %v6438_v17, -inf  ;;  %v6446_v20 = vadd.f32 %v6441_v18, %v1302_v0 }
 0x284   : > { %814 = vadd.xlane.f32.xlu0 %v813_v26  ;;  %1009 = vadd.xlane.f32.xlu1 %v1008_v28  ;;  %v6454_v26 = vadd.f32 %v6449_v22, %v1302_v0 }
 0x285   : > { %v1024_v1 = vsel %vm294_vm0, %v1016_v61, 0.0  ;;  %v1358_v25 = vsel %vm294_vm0, %v6446_v20, -inf }
 0x286   : > { %v5787_v38 = vpop.eup %5786  ;;  %v1361_v28 = vsel %vm294_vm0, %v6454_v26, -inf }
 0x287   : > { %v1011_v41 = vsel %vm294_vm0, %v5787_v38, 0.0  ;;  %v1017_v4 = vmul.f32 %v5787_v38, %v856_v49 }
 0x288   : > { %866 = vadd.xlane.f32.xlu0 %v865_v36  ;;  %1012 = vadd.xlane.f32.xlu1 %v1011_v41 }
 0x289   : > { %v1027_v8 = vsel %vm294_vm0, %v1017_v4, 0.0 }
 0x28c   : > { %872 = vadd.xlane.f32.xlu0 %v871_v47  ;;  %869 = vadd.xlane.f32.xlu1 %v868_v50 }
 0x290   : > { %1019 = vadd.xlane.f32.xlu0 %v1018_v54  ;;  %1022 = vadd.xlane.f32.xlu1 %v1021_v56 }
 0x294   : > { %875 = vadd.xlane.f32.xlu0 %v874_v63  ;;  %1025 = vadd.xlane.f32.xlu1 %v1024_v1 }
 0x298   : > { %1028 = vadd.xlane.f32.xlu1 %v1027_v8 }
 0x29c   : > { %1353 = vmax.xlane.f32.xlu1 %v1352_v53 }
 0x2a0   : > { %1356 = vmax.xlane.f32.xlu1 %v1355_v21 }
 0x2a4   : > { %1359 = vmax.xlane.f32.xlu1 %v1358_v25 }
 0x2a8   : > { %1362 = vmax.xlane.f32.xlu1 %v1361_v28 }
 0x301   : > { %v806_v35 = vpop.xlane.xlu0 %805 }
 0x302   : > { %5788 = vrcp.f32 %v806_v35 }
 0x305   : > { %v809_v37 = vpop.xlane.xlu1 %808 }
 0x306   : > { %5790 = vrcp.f32 %v809_v37 }
 0x309   : > { %v812_v38 = vpop.xlane.xlu0 %811 }
 0x30a   : > { %5792 = vrcp.f32 %v812_v38 }
 0x30c   : > { %v5789_v45 = vpop.eup %5788 }
 0x30d   : > { %v1004_v36 = vpop.xlane.xlu0 %1003  ;;  %v1007_v41 = vpop.xlane.xlu1 %1006  ;;  %v881_v54 = vmul.f32 %v5789_v45, %v806_v35 }
 0x30e   : > { %5794 = vrcp.f32 %v1004_v36 }
 0x30f   : > { %5796 = vrcp.f32 %v1007_v41  ;;  %v885_v1 = vsub.f32 2.0, %v881_v54 }
 0x310   : > { %v5791_v47 = vpop.eup %5790 }
 0x311   : > { %v815_v42 = vpop.xlane.xlu0 %814  ;;  %v1010_v46 = vpop.xlane.xlu1 %1009  ;;  %v882_v50 = vmul.f32 %v5791_v47, %v809_v37  ;;  %v889_v32 = vmul.f32 %v5789_v45, %v885_v1 }
 0x312   : > { %5798 = vrcp.f32 %v815_v42 }
 0x313   : > { %5800 = vrcp.f32 %v1010_v46  ;;  %v886_v62 = vsub.f32 2.0, %v882_v50 }
 0x314   : > { %v5793_v48 = vpop.eup %5792 }
 0x315   : > { %v867_v49 = vpop.xlane.xlu0 %866  ;;  %v1013_v52 = vpop.xlane.xlu1 %1012  ;;  %v883_v31 = vmul.f32 %v5793_v48, %v812_v38  ;;  %v890_v28 = vmul.f32 %v5791_v47, %v886_v62 }
 0x316   : > { %5802 = vrcp.f32 %v1013_v52  ;;  %v893_v29 = vmul.f32 %v889_v32, %v867_v49 }
 0x317   : > { %v887_v4 = vsub.f32 2.0, %v883_v31 }
 0x318   : > { %v5795_v55 = vpop.eup %5794  ;;  %v1057_v45 = vrot.slane %v893_v29, %v6266_v33 }
 0x319   : > { %v5797_v56 = vpop.eup %5796  ;;  %v1034_v61 = vmul.f32 %v5795_v55, %v1004_v36  ;;  %v873_v59 = vpop.xlane.xlu0 %872  ;;  %v891_v36 = vmul.f32 %v5793_v48, %v887_v4 }
 0x31a   : > { %v1035_v63 = vmul.f32 %v5797_v56, %v1007_v41  ;;  %v870_v0 = vpop.xlane.xlu1 %869 }
 0x31b   : > { %v1038_v7 = vsub.f32 2.0, %v1034_v61  ;;  %v894_v50 = vmul.f32 %v890_v28, %v870_v0  ;;  %v895_v9 = vmul.f32 %v891_v36, %v873_v59 }
 0x31c   : > { %v5799_v8 = vpop.eup %5798  ;;  %v1039_v16 = vsub.f32 2.0, %v1035_v63 }
 0x31d   : > { %v5801_v53 = vpop.eup %5800  ;;  %v884_v19 = vmul.f32 %v5799_v8, %v815_v42  ;;  %v1020_v21 = vpop.xlane.xlu0 %1019  ;;  %v1042_v35 = vmul.f32 %v5795_v55, %v1038_v7  ;;  %v1061_v47 = vrot.slane %v894_v50, %v6266_v33 }
 0x31e   : > { %v1036_v25 = vmul.f32 %v5801_v53, %v1010_v46  ;;  %v1043_v37 = vmul.f32 %v5797_v56, %v1039_v16  ;;  %v1023_v38 = vpop.xlane.xlu1 %1022 }
 0x31f   : > { %v888_v24 = vsub.f32 2.0, %v884_v19  ;;  %v1046_v13 = vmul.f32 %v1042_v35, %v1020_v21 }
 0x320   : > { %v1040_v12 = vsub.f32 2.0, %v1036_v25  ;;  %v5803_v41 = vpop.eup %5802  ;;  %v1047_v63 = vmul.f32 %v1043_v37, %v1023_v38  ;;  %v6484_v25 = vld.sshfl [vmem:[%s6374_s14 + $0x8] sm:$0x33 pattern:$0x75316420] }
 0x321   : > { %v892_v54 = vmul.f32 %v5799_v8, %v888_v24  ;;  %v876_v31 = vpop.xlane.xlu0 %875  ;;  %v1037_v61 = vmul.f32 %v5803_v41, %v1013_v52  ;;  %v1084_v48 = vrot.slane %v1046_v13, %v6266_v33  ;;  %v1065_v52 = vrot.slane %v895_v9, %v6266_v33 }
 0x322   : > { %v1044_v27 = vmul.f32 %v5801_v53, %v1040_v12  ;;  %v1026_v42 = vpop.xlane.xlu1 %1025  ;;  %v1088_v32 = vrot.slane %v1047_v63, %v6266_v33  ;;  %v1396_v28 = vcombine.high %v6484_v25, %v6484_v25 }
 0x323   : > { %v1041_v46 = vsub.f32 2.0, %v1037_v61  ;;  %v896_v55 = vmul.f32 %v892_v54, %v876_v31 }
 0x324   : > { %v1048_v56 = vmul.f32 %v1044_v27, %v1026_v42  ;;  %v1071_v27 = vsel %vm1070_vm7, %v1061_v47, %v1057_v45  ;;  %v1098_v0 = vsel %vm1097_vm9, %v1088_v32, %v1084_v48  ;;  %v6489_v37 = vrot.slane %v1396_v28, %v6378_v39 }
 0x325   : > { %v1045_v24 = vmul.f32 %v5803_v41, %v1041_v46  ;;  %v1069_v59 = vrot.slane %v896_v55, %v6266_v33  ;;  %v1073_v9 = vsel %vm1072_vm8, %v1065_v52, %v1071_v27  ;;  %v7518_v42 = vmov 0.0|0.0  }
 0x326   : > { %v1029_v49 = vpop.xlane.xlu1 %1028  ;;  %v1092_v12 = vrot.slane %v1048_v56, %v6266_v33  ;;  %v1412_v38 = vcombine.high %v6489_v37, %v6489_v37  ;;  %v1469_v46 = vsel %vm6325_vm6, %v6310_v57, 0.0 }
 0x327   : > { %v1049_v62 = vmul.f32 %v1045_v24, %v1029_v49  ;;  %v1075_v4 = vsel %vm1074_vm11, %v1069_v59, %v1073_v9 }
 0x328   : > { %v1100_v1 = vsel %vm1099_vm10, %v1092_v12, %v1098_v0  ;;  %v6494_v36 = vrot.slane %v1412_v38, %v6381_v40 }
 0x329   : > { %v1096_v13 = vrot.slane %v1049_v62, %v6266_v33 }
 0x32a   : > { %v1354_v29 = vpop.xlane.xlu1 %1353 }
 0x32b   : > { %v1102_v7 = vsel %vm1101_vm12, %v1096_v13, %v1100_v1  ;;  %v1364_v56 = vsub.f32 %v6430_v14, %v1354_v29  ;;  %v1403_v1 = vrot.slane %v6484_v25, %v6378_v39 }
 0x32c   : > { %v1105_v8 = vsel %vm1104_vm13, %v1075_v4, %v1102_v7 }
 0x32d   : > { %1110 = vxpose.xlu0.b32.start.end [1/1] (short) (narrow) %v1105_v8, 8  ;;  %v1368_v49 = vmul.f32 1.442695, %v1364_v56  ;;  %v1416_v7 = vrot.slane %v1403_v1, %v6381_v40 }
 0x32e   : > { %v1357_v16 = vpop.xlane.xlu1 %1356 }
 0x32f   : > { %v1365_v52 = vsub.f32 %v6438_v17, %v1357_v16  ;;  %v1420_v16 = vrot.slane %v6489_v37, %v6381_v40 }
 0x331   : > { %v1370_v62 = vmul.f32 1.442695, %v1365_v52 }
 0x332   : > { %v1360_v53 = vpop.xlane.xlu1 %1359 }
 0x336   : > { %v1363_v19 = vpop.xlane.xlu1 %1362 }
 0x337   : > { %v1367_v21 = vsub.f32 %v6454_v26, %v1363_v19  ;;  %v1366_v26 = vsub.f32 %v6446_v20, %v1360_v53  ;;  %v7517_v20 = vmov 0.0   ;;  %v1411_v53 = vcombine.high %v1403_v1, %v1403_v1 }
 0x339   : > { %v1374_v35 = vmul.f32 1.442695, %v1367_v21  ;;  %v1372_v54 = vmul.f32 1.442695, %v1366_v26  ;;  %v1424_v25 = vrot.slane %v1411_v53, %v6381_v40 }
 0x33b   : > { %5804 = vpow2.f32 %v1374_v35 }
 0x33c   : > { %5806 = vpow2.f32 %v1372_v54 }
 0x33d   : > { %5808 = vpow2.f32 %v1368_v49 }
 0x33e   : > { %5810 = vpow2.f32 %v1370_v62 }
 0x345   : > { %v6496_v50 = vpop.eup %5804 }
 0x346   : > { %v6501_v41 = vmul.f32 %v6496_v50, %v6494_v36  ;;  %v6503_v31 = vpop.eup %5806 }
 0x347   : > { %v1382_v61 = vsel %vm294_vm0, %v6503_v31, 0.0  ;;  %v1435_v35 = vmul.f32 %v6503_v31, %v1424_v25 }
 0x349   : > { %v1443_v38 = vsel %vm294_vm0, %v1435_v35, 0.0 }
 0x35a   : > { %1383 = vadd.xlane.f32.xlu0 %v1382_v61 }
 0x3ad   : > { %v1126_v63 = vpop.trf.xlu0 }
 0x3ae   : > { %5520 = vmatmul.mubr.msk.f32.vlgmr.msra.gmra.mrb[12].mxu0 %vm1142_vm14, %v1126_v63 }
 0x3af   : > { %5678 = vmatpush3.bf16.xpose.msk.msra.mxu0 %vm6283_vm2, %v6299_v51  ;;  %5533 = vmatprep.mubr.msk.f32.mxu0 %vm6099_vm1, %v7517_v20  ;;  %v6526_v51 = vadd.f32 %v6290_v44, %v6343_v5  ;;  %v6542_v44 = vld [vmem:[%s7496_s4 + $0x8] ss:$0 sm:$0xff] }
 0x3b0   : > { %5679 = vmatprep.subr.bf16.mxu0 %v7518_v42 }
 0x3b1   : > { %v1780_v47 = vsel %vm640_vm3, %v6526_v51, 0.0 }
 0x3b6   : > { %5534 = vmatmul.mubr.msk.f32.vlgmr.msra.gmra.mrb[14].mxu0 %vm294_vm0, %v1469_v46 }
 0x3b7   : > { %5682 = vmatpush3.bf16.xpose.msk.msra.mxu0 %vm6283_vm2, %v6312_v58  ;;  %5545 = vmatprep.mubr.msk.f32.mxu0 %vm6099_vm1, %v7517_v20 }
 0x3b8   : > { %5555 = vmatprep.subr.mxu0 %v7517_v20 }
 0x3be   : > { %5546 = vmatmul.mubr.msk.f32.vlgmr.msra.gmra.mrb[16].mxu0 %vm294_vm0, %v1780_v47 }
 0x3bf   : > { %5556 = vmatpush3.msra.mxu0 %v6461_v34  ;;  %5557 = vmatprep.mubr.msk.f32.mxu0 %vm6099_vm1, %v7517_v20 }
 0x3c0   : > { %5691 = vmatprep.subr.bf16.mxu0 %v7518_v42 }
 0x481   : > { %v1212_v57 = vpop.f32.mrb[12].mxu0 }
 0x482   : > { %v1213_v5 = vadd.f32 %v6542_v44, %v1212_v57  ;;  %v5521_v55 = vpop.f32.mrb[13].mxu0 }
 0x484   : > { %1217 = vst.msk [vmem:[%s6545_s26] sm:$0xff] %vm1216_vm15, %v1213_v5 }
 0x489   : > { %v1539_v45 = vpop.f32.mrb[14].mxu0 }
 0x48a   : > { %v1543_v48 = vmul.f32 0.35355338, %v1539_v45  ;;  %v5535_v32 = vpop.f32.mrb[15].mxu0 }
 0x48c   : > { %v1544_v24 = vadd.f32 %v1543_v48, %v6425_v6  ;;  %v1545_v59 = vadd.f32 %v1543_v48, %v6433_v15  ;;  %v1546_v29 = vadd.f32 %v1543_v48, %v6441_v18  ;;  %v1547_v17 = vadd.f32 %v1543_v48, %v6449_v22  ;;  %v5809_v15 = vpop.eup %5808 }
 0x48d   : > { %v1376_v9 = vsel %vm294_vm0, %v5809_v15, 0.0  ;;  %v5811_v4 = vpop.eup %5810  ;;  %v1385_v22 = vsel %vm294_vm0, %v6496_v50, 0.0  ;;  %v1433_v8 = vmul.f32 %v5809_v15, %v1416_v7 }
 0x48e   : > { %v1548_v12 = vsel %vm294_vm0, %v1544_v24, -inf  ;;  %v1551_v14 = vsel %vm294_vm0, %v1545_v59, -inf  ;;  %v1554_v6 = vsel %vm294_vm0, %v1546_v29, -inf  ;;  %v1557_v0 = vsel %vm294_vm0, %v1547_v17, -inf }
 0x48f   : > { %1549 = vmax.xlane.f32.xlu1 %v1548_v12  ;;  %v1379_v18 = vsel %vm294_vm0, %v5811_v4, 0.0  ;;  %v1437_v19 = vsel %vm294_vm0, %v1433_v8, 0.0  ;;  %v1434_v21 = vmul.f32 %v5811_v4, %v1420_v16 }
 0x491   : > { %v6554_v27 = vpop.f32.mrb[16].mxu0  ;;  %v1440_v28 = vsel %vm294_vm0, %v1434_v21, 0.0 }
 0x492   : > { %v5547_v13 = vpop.f32.mrb[17].mxu0 }
 0x493   : > { %1552 = vmax.xlane.f32.xlu1 %v1551_v14 }
 0x497   : > { %1555 = vmax.xlane.f32.xlu1 %v1554_v6 }
 0x49b   : > { %1558 = vmax.xlane.f32.xlu1 %v1557_v0 }
 0x49f   : > { %1377 = vadd.xlane.f32.xlu1 %v1376_v9  ;;  %v1860_v9 = vmul.f32 0.35355338, %v6554_v27 }
 0x4a3   : > { %1380 = vadd.xlane.f32.xlu1 %v1379_v18 }
 0x4a7   : > { %1386 = vadd.xlane.f32.xlu1 %v1385_v22 }
 0x4ab   : > { %1438 = vadd.xlane.f32.xlu1 %v1437_v19 }
 0x4af   : > { %1441 = vadd.xlane.f32.xlu1 %v1440_v28 }
 0x4b3   : > { %1444 = vadd.xlane.f32.xlu1 %v1443_v38 }
 0x51c   : > { %v1550_v50 = vpop.xlane.xlu1 %1549 }
 0x51d   : > { %v1560_v26 = vsub.f32 %v1544_v24, %v1550_v50 }
 0x51f   : > { %v1564_v54 = vmul.f32 1.442695, %v1560_v26 }
 0x520   : > { %v1553_v37 = vpop.xlane.xlu1 %1552 }
 0x521   : > { %5812 = vpow2.f32 %v1564_v54  ;;  %v1561_v61 = vsub.f32 %v1545_v59, %v1553_v37  ;;  %v1446_v59 = vsel %vm294_vm0, %v6501_v41, 0.0 }
 0x523   : > { %v1566_v63 = vmul.f32 1.442695, %v1561_v61 }
 0x524   : > { %v1556_v46 = vpop.xlane.xlu1 %1555 }
 0x525   : > { %5814 = vpow2.f32 %v1566_v63  ;;  %v1562_v47 = vsub.f32 %v1546_v29, %v1556_v46  ;;  %v5293_v29 = vld.sshfl [vmem:[%s6374_s14 + $0x14] sm:$0x33 pattern:$0x75316420] }
 0x526   : > { %v1876_v0 = vrot.slane %v5293_v29, %v6378_v39  ;;  %v1869_v15 = vcombine.high %v5293_v29, %v5293_v29 }
 0x527   : > { %v1568_v57 = vmul.f32 1.442695, %v1562_v47 }
 0x528   : > { %v1559_v5 = vpop.xlane.xlu1 %1558  ;;  %v6589_v4 = vrot.slane %v1876_v0, %v6381_v40  ;;  %v1883_v18 = vrot.slane %v1869_v15, %v6378_v39 }
 0x529   : > { %5816 = vpow2.f32 %v1568_v57  ;;  %v1563_v55 = vsub.f32 %v1547_v17, %v1559_v5  ;;  %v1384_v57 = vpop.xlane.xlu0 %1383 }
 0x52a   : > { %v6594_v22 = vadd.f32 %v6589_v4, %v1860_v9  ;;  %v6597_v8 = vrot.slane %v1883_v18, %v6381_v40  ;;  %v1885_v19 = vcombine.high %v1883_v18, %v1883_v18 }
 0x52b   : > { %v5813_v56 = vpop.eup %5812  ;;  %v1570_v31 = vmul.f32 1.442695, %v1563_v55 }
 0x52c   : > { %v1572_v45 = vsel %vm294_vm0, %v5813_v56, 0.0  ;;  %v1584_v62 = vmul.f32 %v5813_v56, %v1416_v7  ;;  %v1910_v27 = vsel %vm294_vm0, %v6594_v22, -inf  ;;  %v6613_v28 = vrot.slane %v1885_v19, %v6381_v40  ;;  %v1378_v26 = vpop.xlane.xlu1 %1377 }
 0x52d   : > { %5818 = vpow2.f32 %v1570_v31  ;;  %1573 = vadd.xlane.f32.xlu1 %v1572_v45 }
 0x52e   : > { %v1588_v13 = vsel %vm294_vm0, %v1584_v62, 0.0  ;;  %v6618_v38 = vadd.f32 %v6613_v28, %v1860_v9 }
 0x52f   : > { %v5815_v48 = vpop.eup %5814 }
 0x530   : > { %v1575_v32 = vsel %vm294_vm0, %v5815_v48, 0.0  ;;  %v1585_v14 = vmul.f32 %v5815_v48, %v1420_v16  ;;  %v1884_v16 = vcombine.high %v1876_v0, %v1876_v0  ;;  %v1919_v50 = vsel %vm294_vm0, %v6618_v38, -inf  ;;  %v1381_v54 = vpop.xlane.xlu1 %1380 }
 0x531   : > { %1576 = vadd.xlane.f32.xlu1 %v1575_v32  ;;  %5820 = vrcp.f32 %v1381_v54 }
 0x532   : > { %v1591_v6 = vsel %vm294_vm0, %v1585_v14, 0.0  ;;  %v6605_v53 = vrot.slane %v1884_v16, %v6381_v40  ;;  %5822 = vrcp.f32 %v1378_v26 }
 0x533   : > { %v5817_v24 = vpop.eup %5816 }
 0x534   : > { %v1578_v49 = vsel %vm294_vm0, %v5817_v24, 0.0  ;;  %v1586_v17 = vmul.f32 %v5817_v24, %v1424_v25  ;;  %v6610_v25 = vadd.f32 %v6605_v53, %v1860_v9  ;;  %v1387_v37 = vpop.xlane.xlu1 %1386 }
 0x535   : > { %1579 = vadd.xlane.f32.xlu1 %v1578_v49  ;;  %5824 = vrcp.f32 %v1387_v37 }
 0x536   : > { %v1594_v1 = vsel %vm294_vm0, %v1586_v17, 0.0  ;;  %v1916_v35 = vsel %vm294_vm0, %v6610_v25, -inf }
 0x537   : > { %v5819_v52 = vpop.eup %5818 }
 0x538   : > { %v1581_v12 = vsel %vm294_vm0, %v5819_v52, 0.0  ;;  %v1587_v41 = vmul.f32 %v5819_v52, %v6494_v36  ;;  %v6602_v36 = vadd.f32 %v6597_v8, %v1860_v9  ;;  %v1439_v61 = vpop.xlane.xlu1 %1438 }
 0x539   : > { %1582 = vadd.xlane.f32.xlu1 %v1581_v12 }
 0x53a   : > { %v1597_v7 = vsel %vm294_vm0, %v1587_v41, 0.0  ;;  %v1913_v21 = vsel %vm294_vm0, %v6602_v36, -inf }
 0x53b   : > { %v5821_v56 = vpop.eup %5820 }
 0x53c   : > { %v1442_v63 = vpop.xlane.xlu1 %1441  ;;  %v5823_v31 = vpop.eup %5822  ;;  %v1454_v48 = vmul.f32 %v5821_v56, %v1381_v54 }
 0x53d   : > { %1447 = vadd.xlane.f32.xlu1 %v1446_v59  ;;  %v1453_v24 = vmul.f32 %v5823_v31, %v1378_v26 }
 0x53e   : > { %v1458_v62 = vsub.f32 2.0, %v1454_v48 }
 0x53f   : > { %v5825_v32 = vpop.eup %5824  ;;  %v1457_v14 = vsub.f32 2.0, %v1453_v24 }
 0x540   : > { %v1445_v46 = vpop.xlane.xlu1 %1444  ;;  %v1456_v29 = vmul.f32 %v5825_v32, %v1387_v37 }
 0x541   : > { %1589 = vadd.xlane.f32.xlu1 %v1588_v13 }
 0x542   : > { %v1460_v18 = vsub.f32 2.0, %v1456_v29 }
 0x544   : > { %v1464_v48 = vmul.f32 %v5825_v32, %v1460_v18  ;;  %v2027_v18 = vsel %vm6325_vm6, %v6526_v51, 0.0 }
 0x545   : > { %1592 = vadd.xlane.f32.xlu1 %v1591_v6 }
 0x549   : > { %1595 = vadd.xlane.f32.xlu1 %v1594_v1  ;;  %v1462_v1 = vmul.f32 %v5821_v56, %v1458_v62 }
 0x54b   : > { %v1466_v26 = vmul.f32 %v1462_v1, %v1442_v63 }
 0x54d   : > { %1598 = vadd.xlane.f32.xlu1 %v1597_v7  ;;  %v1461_v7 = vmul.f32 %v5823_v31, %v1457_v14  ;;  %v1631_v56 = vrot.slane %v1466_v26, %v6266_v33 }
 0x551   : > { %1911 = vmax.xlane.f32.xlu1 %v1910_v27 }
 0x555   : > { %1914 = vmax.xlane.f32.xlu1 %v1913_v21 }
 0x559   : > { %1917 = vmax.xlane.f32.xlu1 %v1916_v35 }
 0x55d   : > { %1920 = vmax.xlane.f32.xlu1 %v1919_v50 }
 0x5ba   : > { %v1574_v47 = vpop.xlane.xlu1 %1573 }
 0x5be   : > { %v1577_v5 = vpop.xlane.xlu1 %1576 }
 0x5bf   : > { %5826 = vrcp.f32 %v1577_v5 }
 0x5c0   : > { %5828 = vrcp.f32 %v1574_v47 }
 0x5c1   : > { %5830 = vrcp.f32 %v1384_v57 }
 0x5c2   : > { %v1580_v55 = vpop.xlane.xlu1 %1579 }
 0x5c3   : > { %5832 = vrcp.f32 %v1580_v55 }
 0x5c6   : > { %v1583_v45 = vpop.xlane.xlu1 %1582 }
 0x5c7   : > { %5834 = vrcp.f32 %v1583_v45 }
 0x5c9   : > { %v5827_v49 = vpop.eup %5826 }
 0x5ca   : > { %v5829_v52 = vpop.eup %5828  ;;  %v1448_v12 = vpop.xlane.xlu1 %1447  ;;  %v1605_v13 = vmul.f32 %v5827_v49, %v1577_v5  ;;  %v1465_v5 = vmul.f32 %v1461_v7, %v1439_v61 }
 0x5cb   : > { %v5831_v59 = vpop.eup %5830  ;;  %v1604_v17 = vmul.f32 %v5829_v52, %v1574_v47  ;;  %v1468_v62 = vmul.f32 %v1464_v48, %v1448_v12 }
 0x5cc   : > { %v1455_v0 = vmul.f32 %v5831_v59, %v1384_v57  ;;  %v1609_v41 = vsub.f32 2.0, %v1605_v13  ;;  %v1627_v29 = vrot.slane %v1465_v5, %v6266_v33 }
 0x5cd   : > { %v5833_v6 = vpop.eup %5832  ;;  %v1608_v27 = vsub.f32 2.0, %v1604_v17 }
 0x5ce   : > { %v1606_v15 = vmul.f32 %v5833_v6, %v1580_v55  ;;  %v1590_v9 = vpop.xlane.xlu1 %1589  ;;  %v1459_v21 = vsub.f32 2.0, %v1455_v0  ;;  %v1613_v54 = vmul.f32 %v5827_v49, %v1609_v41  ;;  %v1640_v49 = vsel %vm1070_vm7, %v1631_v56, %v1627_v29 }
 0x5cf   : > { %v1612_v24 = vmul.f32 %v5829_v52, %v1608_v27  ;;  %v1639_v52 = vrot.slane %v1468_v62, %v6266_v33 }
 0x5d0   : > { %v1610_v19 = vsub.f32 2.0, %v1606_v15  ;;  %v1463_v55 = vmul.f32 %v5831_v59, %v1459_v21 }
 0x5d1   : > { %v5835_v16 = vpop.eup %5834  ;;  %v1616_v31 = vmul.f32 %v1612_v24, %v1590_v9 }
 0x5d2   : > { %v1607_v35 = vmul.f32 %v5835_v16, %v1583_v45  ;;  %v1593_v50 = vpop.xlane.xlu1 %1592  ;;  %v1614_v57 = vmul.f32 %v5833_v6, %v1610_v19  ;;  %v1467_v14 = vmul.f32 %v1463_v55, %v1445_v46 }
 0x5d3   : > { %v1617_v47 = vmul.f32 %v1613_v54, %v1593_v50  ;;  %v1651_v59 = vrot.slane %v1616_v31, %v6266_v33 }
 0x5d4   : > { %v1611_v37 = vsub.f32 2.0, %v1607_v35  ;;  %v1635_v12 = vrot.slane %v1467_v14, %v6266_v33 }
 0x5d5   : > { %v1655_v45 = vrot.slane %v1617_v47, %v6266_v33 }
 0x5d6   : > { %v1596_v23 = vpop.xlane.xlu1 %1595  ;;  %v1615_v63 = vmul.f32 %v5835_v16, %v1611_v37  ;;  %v1641_v17 = vsel %vm1072_vm8, %v1635_v12, %v1640_v49 }
 0x5d7   : > { %v1618_v13 = vmul.f32 %v1614_v57, %v1596_v23  ;;  %v1664_v23 = vsel %vm1097_vm9, %v1655_v45, %v1651_v59  ;;  %v1642_v15 = vsel %vm1074_vm11, %v1639_v52, %v1641_v17 }
 0x5d9   : > { %v1659_v61 = vrot.slane %v1618_v13, %v6266_v33 }
 0x5da   : > { %v1599_v32 = vpop.xlane.xlu1 %1598 }
 0x5db   : > { %v1619_v6 = vmul.f32 %v1615_v63, %v1599_v32  ;;  %v1665_v0 = vsel %vm1099_vm10, %v1659_v61, %v1664_v23 }
 0x5dd   : > { %v1663_v46 = vrot.slane %v1619_v6, %v6266_v33 }
 0x5de   : > { %v1912_v21 = vpop.xlane.xlu1 %1911 }
 0x5df   : > { %v1666_v9 = vsel %vm1101_vm12, %v1663_v46, %v1665_v0  ;;  %v5294_v0 = vld.sshfl [vmem:[%s6374_s14 + $0x10] sm:$0x33 pattern:$0x75316420] }
 0x5e0   : > { %v1668_v1 = vsel %vm1104_vm13, %v1642_v15, %v1666_v9 }
 0x5e1   : > { %1669 = vxpose.xlu0.b32.start.end [1/1] (short) (narrow) %v1668_v1, 8  ;;  %v1954_v1 = vcombine.high %v5294_v0, %v5294_v0 }
 0x5e2   : > { %v1915_v50 = vpop.xlane.xlu1 %1914 }
 0x5e3   : > { %v1923_v48 = vsub.f32 %v6602_v36, %v1915_v50  ;;  %v5305_v50 = vld.sshfl [vmem:[%s6374_s14 + $0x1c] sm:$0x33 pattern:$0x75316420] }
 0x5e5   : > { %v1928_v47 = vmul.f32 1.442695, %v1923_v48  ;;  %v2434_v48 = vrot.slane %v5305_v50, %v6378_v39 }
 0x5e6   : > { %v1918_v29 = vpop.xlane.xlu1 %1917 }
 0x5e7   : > { %v1924_v45 = vsub.f32 %v6610_v25, %v1918_v29 }
 0x661   : > { %v1685_v41 = vpop.trf.xlu0 }
 0x662   : > { %5539 = vmatmul.mubr.msk.f32.vlgmr.msra.gmra.mrb[18].mxu1 %vm1142_vm14, %v1685_v41  ;;  %v1961_v41 = vrot.slane %v5294_v0, %v6378_v39 }
 0x663   : > { %5686 = vmatpush3.bf16.xpose.msk.msra.mxu1 %vm6283_vm2, %v6312_v58  ;;  %5552 = vmatprep.mubr.msk.f32.mxu1 %vm6099_vm1, %v7517_v20  ;;  %v6657_v58 = vld [vmem:[%s7495_s3 + $0x10] ss:$0 sm:$0xff] }
 0x664   : > { %5687 = vmatprep.subr.bf16.mxu1 %v7518_v42  ;;  %v6661_v51 = vadd.f32 %v6657_v58, %v6339_v2  ;;  %v1922_v2 = vsub.f32 %v6594_v22, %v1912_v21 }
 0x666   : > { %v2338_v7 = vsel %vm640_vm3, %v6661_v51, 0.0  ;;  %v1926_v5 = vmul.f32 1.442695, %v1922_v2  ;;  %v1974_v2 = vrot.slane %v1961_v41, %v6381_v40 }
 0x668   : > { %5836 = vpow2.f32 %v1926_v5 }
 0x669   : > { %5838 = vpow2.f32 %v1928_v47 }
 0x66a   : > { %5553 = vmatmul.mubr.msk.f32.vlgmr.msra.gmra.mrb[20].mxu1 %vm294_vm0, %v2027_v18 }
 0x66b   : > { %5690 = vmatpush3.bf16.xpose.msk.msra.mxu1 %vm6283_vm2, %v6341_v3  ;;  %5564 = vmatprep.mubr.msk.f32.mxu1 %vm6099_vm1, %v7517_v20 }
 0x66c   : > { %5574 = vmatprep.subr.mxu1 %v7517_v20 }
 0x672   : > { %5565 = vmatmul.mubr.msk.f32.vlgmr.msra.gmra.mrb[22].mxu1 %vm294_vm0, %v2338_v7 }
 0x673   : > { %5575 = vmatpush3.msra.mxu1 %v6461_v34  ;;  %5576 = vmatprep.mubr.msk.f32.mxu1 %vm6099_vm1, %v7517_v20 }
 0x674   : > { %5699 = vmatprep.subr.bf16.mxu1 %v7518_v42 }
 0x735   : > { %v1770_v16 = vpop.f32.mrb[18].mxu1 }
 0x736   : > { %v1771_v27 = vadd.f32 %v6542_v44, %v1770_v16  ;;  %v5540_v19 = vpop.f32.mrb[19].mxu1 }
 0x738   : > { %5287 = vst.msk [vmem:[%s6545_s26 + $0x8] sm:$0xff] %vm1216_vm15, %v1771_v27  ;;  %v1968_v27 = vrot.slane %v1954_v1, %v6378_v39 }
 0x73d   : > { %v2097_v35 = vpop.f32.mrb[20].mxu1 }
 0x73e   : > { %v2101_v26 = vmul.f32 0.35355338, %v2097_v35  ;;  %v5554_v54 = vpop.f32.mrb[21].mxu1 }
 0x73f   : > { %v1978_v54 = vrot.slane %v1968_v27, %v6381_v40 }
 0x740   : > { %v2102_v34 = vadd.f32 %v2101_v26, %v6589_v4  ;;  %v2103_v24 = vadd.f32 %v2101_v26, %v6597_v8  ;;  %v2104_v56 = vadd.f32 %v2101_v26, %v6605_v53  ;;  %v2105_v36 = vadd.f32 %v2101_v26, %v6613_v28  ;;  %v5837_v8 = vpop.eup %5836  ;;  %v1921_v53 = vpop.xlane.xlu1 %1920 }
 0x741   : > { %v1934_v31 = vsel %vm294_vm0, %v5837_v8, 0.0  ;;  %v5839_v13 = vpop.eup %5838  ;;  %v1930_v28 = vmul.f32 1.442695, %v1924_v45  ;;  %v1925_v32 = vsub.f32 %v6618_v38, %v1921_v53  ;;  %v1970_v26 = vcombine.high %v1968_v27, %v1968_v27 }
 0x742   : > { %v2106_v37 = vsel %vm294_vm0, %v2102_v34, -inf  ;;  %v2109_v22 = vsel %vm294_vm0, %v2103_v24, -inf  ;;  %v2112_v4 = vsel %vm294_vm0, %v2104_v56, -inf  ;;  %v2115_v62 = vsel %vm294_vm0, %v2105_v36, -inf }
 0x743   : > { %2107 = vmax.xlane.f32.xlu1 %v2106_v37  ;;  %v1937_v14 = vsel %vm294_vm0, %v5839_v13, 0.0  ;;  %v1932_v6 = vmul.f32 1.442695, %v1925_v32  ;;  %v1991_v5 = vmul.f32 %v5837_v8, %v1974_v2  ;;  %v2427_v37 = vcombine.high %v5305_v50, %v5305_v50 }
 0x744   : > { %v1986_v47 = vrot.slane %v1970_v26, %v6381_v40  ;;  %v1969_v53 = vcombine.high %v1961_v41, %v1961_v41 }
 0x745   : > { %v6679_v57 = vpop.f32.mrb[22].mxu1 }
 0x746   : > { %v5566_v55 = vpop.f32.mrb[23].mxu1 }
 0x747   : > { %2110 = vmax.xlane.f32.xlu1 %v2109_v22  ;;  %v6707_v55 = vrot.slane %v2434_v48, %v6381_v40 }
 0x74b   : > { %2113 = vmax.xlane.f32.xlu1 %v2112_v4 }
 0x74f   : > { %2116 = vmax.xlane.f32.xlu1 %v2115_v62  ;;  %v2441_v62 = vrot.slane %v2427_v37, %v6378_v39 }
 0x753   : > { %1935 = vadd.xlane.f32.xlu1 %v1934_v31 }
 0x757   : > { %1938 = vadd.xlane.f32.xlu1 %v1937_v14  ;;  %v2442_v14 = vcombine.high %v2434_v48, %v2434_v48 }
 0x7d0   : > { %v2108_v63 = vpop.xlane.xlu1 %2107 }
 0x7d1   : > { %v2118_v61 = vsub.f32 %v2102_v34, %v2108_v63 }
 0x7d3   : > { %v2122_v49 = vmul.f32 1.442695, %v2118_v61  ;;  %v6725_v61 = vrot.slane %v2442_v14, %v6381_v40 }
 0x7d4   : > { %v2111_v52 = vpop.xlane.xlu1 %2110 }
 0x7d5   : > { %5840 = vpow2.f32 %v2122_v49  ;;  %v2119_v59 = vsub.f32 %v2103_v24, %v2111_v52  ;;  %v2418_v24 = vmul.f32 0.35355338, %v6679_v57  ;;  %v6716_v57 = vrot.slane %v2441_v62, %v6381_v40 }
 0x7d6   : > { %5842 = vpow2.f32 %v1930_v28  ;;  %v2443_v28 = vcombine.high %v2441_v62, %v2441_v62  ;;  %v1982_v49 = vrot.slane %v1969_v53, %v6381_v40 }
 0x7d7   : > { %v2124_v12 = vmul.f32 1.442695, %v2119_v59  ;;  %v6713_v31 = vadd.f32 %v6707_v55, %v2418_v24  ;;  %v6722_v63 = vadd.f32 %v6716_v57, %v2418_v24  ;;  %v2466_v59 = vadd.f32 %v6725_v61, %v2418_v24 }
 0x7d8   : > { %v2114_v23 = vpop.xlane.xlu1 %2113 }
 0x7d9   : > { %5844 = vpow2.f32 %v2124_v12  ;;  %v2120_v15 = vsub.f32 %v2104_v56, %v2114_v23  ;;  %v1995_v56 = vsel %vm294_vm0, %v1991_v5, 0.0  ;;  %v2471_v52 = vsel %vm294_vm0, %v6722_v63, -inf }
 0x7da   : > { %5846 = vpow2.f32 %v1932_v6  ;;  %v6733_v6 = vrot.slane %v2443_v28, %v6381_v40 }
 0x7db   : > { %v2126_v16 = vmul.f32 1.442695, %v2120_v15 }
 0x7dc   : > { %v2117_v46 = vpop.xlane.xlu1 %2116 }
 0x7dd   : > { %v2121_v17 = vsub.f32 %v2105_v36, %v2117_v46  ;;  %v1992_v36 = vmul.f32 %v5839_v13, %v1978_v54  ;;  %v2468_v13 = vsel %vm294_vm0, %v6713_v31, -inf  ;;  %v2474_v46 = vsel %vm294_vm0, %v2466_v59, -inf }
 0x7df   : > { %v6691_v25 = vpop.eup %5840  ;;  %v2128_v9 = vmul.f32 1.442695, %v2121_v17  ;;  %v1998_v29 = vsel %vm294_vm0, %v1992_v36, 0.0  ;;  %v6738_v17 = vadd.f32 %v6733_v6, %v2418_v24 }
 0x7e0   : > { %v2130_v38 = vsel %vm294_vm0, %v6691_v25, 0.0  ;;  %v5843_v18 = vpop.eup %5842  ;;  %v2142_v15 = vmul.f32 %v6691_v25, %v1974_v2  ;;  %v1936_v25 = vpop.xlane.xlu1 %1935 }
 0x7e1   : > { %5848 = vpow2.f32 %v2128_v9  ;;  %2131 = vadd.xlane.f32.xlu1 %v2130_v38  ;;  %v1940_v19 = vsel %vm294_vm0, %v5843_v18, 0.0  ;;  %v1993_v23 = vmul.f32 %v5843_v18, %v1982_v49  ;;  %v2477_v9 = vsel %vm294_vm0, %v6738_v17, -inf }
 0x7e2   : > { %5850 = vpow2.f32 %v2126_v16  ;;  %v2146_v1 = vsel %vm294_vm0, %v2142_v15, 0.0 }
 0x7e3   : > { %v5845_v7 = vpop.eup %5844  ;;  %v2001_v0 = vsel %vm294_vm0, %v1993_v23, 0.0  ;;  %5852 = vrcp.f32 %v1936_v25 }
 0x7e4   : > { %v2133_v21 = vsel %vm294_vm0, %v5845_v7, 0.0  ;;  %v5847_v35 = vpop.eup %5846  ;;  %v2143_v38 = vmul.f32 %v5845_v7, %v1978_v54 }
 0x7e5   : > { %1941 = vadd.xlane.f32.xlu1 %v1940_v19  ;;  %2134 = vadd.xlane.f32.xlu0 %v2133_v21  ;;  %v1943_v34 = vsel %vm294_vm0, %v5847_v35, 0.0  ;;  %v1994_v27 = vmul.f32 %v5847_v35, %v1986_v47  ;;  %v1939_v21 = vpop.xlane.xlu1 %1938 }
 0x7e6   : > { %v2149_v41 = vsel %vm294_vm0, %v2143_v38, 0.0 }
 0x7e7   : > { %v2004_v19 = vsel %vm294_vm0, %v1994_v27, 0.0 }
 0x7e9   : > { %1944 = vadd.xlane.f32.xlu1 %v1943_v34 }
 0x7eb   : > { %v5849_v22 = vpop.eup %5848 }
 0x7ec   : > { %v2145_v4 = vmul.f32 %v5849_v22, %v1986_v47  ;;  %v5851_v45 = vpop.eup %5850  ;;  %v2139_v12 = vsel %vm294_vm0, %v5849_v22, 0.0 }
 0x7ed   : > { %1996 = vadd.xlane.f32.xlu1 %v1995_v56  ;;  %v2136_v32 = vsel %vm294_vm0, %v5851_v45, 0.0  ;;  %v2144_v18 = vmul.f32 %v5851_v45, %v1982_v49  ;;  %v5853_v24 = vpop.eup %5852 }
 0x7ee   : > { %v2155_v8 = vsel %vm294_vm0, %v2145_v4, 0.0  ;;  %v2011_v53 = vmul.f32 %v5853_v24, %v1936_v25 }
 0x7ef   : > { %2156 = vadd.xlane.f32.xlu0 %v2155_v8  ;;  %v2152_v16 = vsel %vm294_vm0, %v2144_v18, 0.0 }
 0x7f0   : > { %v2015_v38 = vsub.f32 2.0, %v2011_v53 }
 0x7f1   : > { %1999 = vadd.xlane.f32.xlu1 %v1998_v29 }
 0x7f3   : > { %2469 = vmax.xlane.f32.xlu0 %v2468_v13 }
 0x7f5   : > { %2137 = vadd.xlane.f32.xlu1 %v2136_v32  ;;  %v5306_v32 = vld.sshfl [vmem:[%s6374_s14 + $0x18] sm:$0x33 pattern:$0x75316420] }
 0x7f7   : > { %2472 = vmax.xlane.f32.xlu0 %v2471_v52 }
 0x7f9   : > { %2140 = vadd.xlane.f32.xlu1 %v2139_v12 }
 0x7fb   : > { %2475 = vmax.xlane.f32.xlu0 %v2474_v46 }
 0x7fd   : > { %2002 = vadd.xlane.f32.xlu1 %v2001_v0 }
 0x7ff   : > { %2478 = vmax.xlane.f32.xlu0 %v2477_v9 }
 0x801   : > { %2147 = vadd.xlane.f32.xlu1 %v2146_v1  ;;  %v6759_v1 = vrot.slane %v5306_v32, %v6378_v39 }
 0x805   : > { %2150 = vadd.xlane.f32.xlu1 %v2149_v41 }
 0x809   : > { %2153 = vadd.xlane.f32.xlu1 %v2152_v16 }
 0x80d   : > { %2005 = vadd.xlane.f32.xlu1 %v2004_v19  ;;  %v2527_v19 = vcombine.high %v6759_v1, %v6759_v1 }
 0x86e   : > { %v2132_v2 = vpop.xlane.xlu1 %2131 }
 0x872   : > { %v1942_v50 = vpop.xlane.xlu1 %1941  ;;  %v2135_v34 = vpop.xlane.xlu0 %2134 }
 0x873   : > { %5854 = vrcp.f32 %v2135_v34 }
 0x874   : > { %5856 = vrcp.f32 %v1939_v21 }
 0x875   : > { %5858 = vrcp.f32 %v2132_v2 }
 0x876   : > { %v1945_v26 = vpop.xlane.xlu1 %1944  ;;  %5860 = vrcp.f32 %v1942_v50 }
 0x87a   : > { %v6748_v5 = vpop.xlane.xlu1 %1996 }
 0x87c   : > { %v6750_v7 = vpop.xlane.xlu0 %2156 }
 0x87d   : > { %v5855_v47 = vpop.eup %5854 }
 0x87e   : > { %v2000_v54 = vpop.xlane.xlu1 %1999  ;;  %v5857_v56 = vpop.eup %5856  ;;  %v2163_v8 = vmul.f32 %v5855_v47, %v2135_v34 }
 0x87f   : > { %v5859_v4 = vpop.eup %5858  ;;  %v2012_v45 = vmul.f32 %v5857_v56, %v1939_v21 }
 0x880   : > { %v6752_v35 = vpop.xlane.xlu0 %2469  ;;  %v5861_v62 = vpop.eup %5860  ;;  %v2162_v13 = vmul.f32 %v5859_v4, %v2132_v2  ;;  %v2167_v23 = vsub.f32 2.0, %v2163_v8 }
 0x881   : > { %v2013_v49 = vmul.f32 %v5861_v62, %v1942_v50  ;;  %v2016_v41 = vsub.f32 2.0, %v2012_v45 }
 0x882   : > { %v2138_v48 = vpop.xlane.xlu1 %2137  ;;  %v2166_v18 = vsub.f32 2.0, %v2162_v13 }
 0x883   : > { %5862 = vrcp.f32 %v2138_v48  ;;  %v2017_v27 = vsub.f32 2.0, %v2013_v49  ;;  %v2020_v8 = vmul.f32 %v5857_v56, %v2016_v41 }
 0x884   : > { %5864 = vrcp.f32 %v1945_v26  ;;  %v6754_v37 = vpop.xlane.xlu0 %2472 }
 0x885   : > { %v2021_v13 = vmul.f32 %v5861_v62, %v2017_v27  ;;  %v2024_v49 = vmul.f32 %v2020_v8, %v2000_v54 }
 0x886   : > { %v2141_v22 = vpop.xlane.xlu1 %2140 }
 0x887   : > { %5866 = vrcp.f32 %v2141_v22  ;;  %v2189_v54 = vrot.slane %v2024_v49, %v6266_v33 }
 0x888   : > { %v2476_v36 = vpop.xlane.xlu0 %2475 }
 0x889   : > { %v2482_v14 = vsub.f32 %v2466_v59, %v2476_v36  ;;  %v2512_v59 = vcombine.high %v5306_v32, %v5306_v32  ;;  %v2019_v36 = vmul.f32 %v5853_v24, %v2015_v38  ;;  %v6769_v32 = vrot.slane %v2527_v19, %v6381_v40 }
 0x88a   : > { %v2003_v29 = vpop.xlane.xlu1 %2002 }
 0x88b   : > { %v2488_v28 = vmul.f32 1.442695, %v2482_v14  ;;  %v2170_v14 = vmul.f32 %v5859_v4, %v2166_v18  ;;  %v2023_v24 = vmul.f32 %v2019_v36, %v6748_v5 }
 0x88c   : > { %v2479_v52 = vpop.xlane.xlu0 %2478 }
 0x88d   : > { %v5863_v12 = vpop.eup %5862  ;;  %5868 = vpow2.f32 %v2488_v28  ;;  %v2483_v46 = vsub.f32 %v6738_v17, %v2479_v52  ;;  %v2171_v17 = vmul.f32 %v5855_v47, %v2167_v23  ;;  %v2025_v23 = vmul.f32 %v2021_v13, %v2003_v29 }
 0x88e   : > { %v5865_v0 = vpop.eup %5864  ;;  %v2164_v15 = vmul.f32 %v5863_v12, %v2138_v48  ;;  %v2148_v9 = vpop.xlane.xlu1 %2147  ;;  %v6764_v48 = vrot.slane %v2512_v59, %v6378_v39 }
 0x88f   : > { %v2490_v16 = vmul.f32 1.442695, %v2483_v46  ;;  %v2014_v21 = vmul.f32 %v5865_v0, %v1945_v26  ;;  %v2174_v47 = vmul.f32 %v2170_v14, %v2148_v9  ;;  %v2193_v5 = vrot.slane %v2025_v23, %v6266_v33 }
 0x890   : > { %v2168_v2 = vsub.f32 2.0, %v2164_v15  ;;  %v2528_v28 = vcombine.high %v6764_v48, %v6764_v48 }
 0x891   : > { %v5867_v25 = vpop.eup %5866  ;;  %5870 = vpow2.f32 %v2490_v16  ;;  %v2018_v26 = vsub.f32 2.0, %v2014_v21 }
 0x892   : > { %v2165_v50 = vmul.f32 %v5867_v25, %v2141_v22  ;;  %v2151_v34 = vpop.xlane.xlu1 %2150  ;;  %v2172_v22 = vmul.f32 %v5863_v12, %v2168_v2  ;;  %v6775_v59 = vrot.slane %v2528_v28, %v6381_v40  ;;  %v2209_v12 = vrot.slane %v2174_v47, %v6266_v33 }
 0x893   : > { %v2175_v53 = vmul.f32 %v2171_v17, %v2151_v34  ;;  %v2022_v9 = vmul.f32 %v5865_v0, %v2018_v26  ;;  %v2480_v26 = vsub.f32 %v6713_v31, %v6752_v35 }
 0x894   : > { %v2169_v45 = vsub.f32 2.0, %v2165_v50 }
 0x895   : > { %v2213_v56 = vrot.slane %v2175_v53, %v6266_v33  ;;  %v2585_v53 = vsel %vm6325_vm6, %v6661_v51, 0.0  ;;  %v6829_v51 = vld [vmem:[%s7496_s4] sm:$0xff]  ;;  %v2484_v23 = vmul.f32 1.442695, %v2480_v26 }
 0x896   : > { %v2173_v52 = vmul.f32 %v5867_v25, %v2169_v45  ;;  %v2154_v46 = vpop.xlane.xlu1 %2153 }
 0x897   : > { %v5869_v15 = vpop.eup %5868  ;;  %v2176_v4 = vmul.f32 %v2172_v22, %v2154_v46  ;;  %v2222_v16 = vsel %vm1097_vm9, %v2213_v56, %v2209_v12  ;;  %v2481_v46 = vsub.f32 %v6722_v63, %v6754_v37  ;;  %5872 = vpow2.f32 %v2484_v23 }
 0x898   : > { %v2177_v62 = vmul.f32 %v2173_v52, %v6750_v7  ;;  %v6778_v38 = vmul.f32 %v5869_v15, %v6769_v32  ;;  %v2185_v7 = vrot.slane %v2023_v24, %v6266_v33  ;;  %v2498_v8 = vsel %vm294_vm0, %v5869_v15, 0.0 }
 0x899   : > { %v2217_v29 = vrot.slane %v2176_v4, %v6266_v33 }
 0x89a   : > { %v2006_v41 = vpop.xlane.xlu1 %2005  ;;  %v2221_v19 = vrot.slane %v2177_v62, %v6266_v33  ;;  %v2198_v0 = vsel %vm1070_vm7, %v2189_v54, %v2185_v7 }
 0x89b   : > { %v6784_v18 = vpop.eup %5870  ;;  %v2026_v27 = vmul.f32 %v2022_v9, %v2006_v41  ;;  %v2223_v25 = vsel %vm1099_vm10, %v2217_v29, %v2222_v16  ;;  %v2199_v17 = vsel %vm1072_vm8, %v2193_v5, %v2198_v0 }
 0x89c   : > { %v6792_v21 = vmul.f32 %v6784_v18, %v6775_v59  ;;  %v2224_v34 = vsel %vm1101_vm12, %v2221_v19, %v2223_v25  ;;  %v2501_v29 = vsel %vm294_vm0, %v6784_v18, 0.0 }
 0x89d   : > { %v2197_v2 = vrot.slane %v2026_v27, %v6266_v33 }
 0x89f   : > { %v2200_v50 = vsel %vm1074_vm11, %v2197_v2, %v2199_v17 }
 0x8a0   : > { %v2226_v36 = vsel %vm1104_vm13, %v2200_v50, %v2224_v34 }
 0x8a1   : > { %2227 = vxpose.xlu1.b32.start.end [1/1] (short) (narrow) %v2226_v36, 8  ;;  %v5873_v37 = vpop.eup %5872 }
 0x8c8   : > { %2499 = vadd.xlane.f32.xlu1 %v2498_v8 }
 0x921   : > { %v2243_v14 = vpop.trf.xlu1 }
 0x922   : > { %5558 = vmatmul.mubr.msk.f32.vlgmr.msra.gmra.mrb[18].mxu0 %vm1142_vm14, %v2243_v14 }
 0x923   : > { %5694 = vmatpush3.bf16.xpose.msk.msra.mxu0 %vm6283_vm2, %v6341_v3  ;;  %5571 = vmatprep.mubr.msk.f32.mxu0 %vm6099_vm1, %v7517_v20  ;;  %v6820_v3 = vadd.f32 %v6657_v58, %v6351_v11 }
 0x924   : > { %5695 = vmatprep.subr.bf16.mxu0 %v7518_v42 }
 0x925   : > { %v2896_v45 = vsel %vm640_vm3, %v6820_v3, 0.0 }
 0x92a   : > { %5572 = vmatmul.mubr.msk.f32.vlgmr.msra.gmra.mrb[20].mxu0 %vm294_vm0, %v2585_v53 }
 0x92b   : > { %5698 = vmatpush3.bf16.xpose.msk.msra.mxu0 %vm6283_vm2, %v6349_v10  ;;  %5583 = vmatprep.mubr.msk.f32.mxu0 %vm6099_vm1, %v7517_v20 }
 0x92c   : > { %5593 = vmatprep.subr.mxu0 %v7517_v20 }
 0x932   : > { %5584 = vmatmul.mubr.msk.f32.vlgmr.msra.gmra.mrb[22].mxu0 %vm294_vm0, %v2896_v45  ;;  %v5317_v45 = vld.sshfl [vmem:[%s6374_s14 + $0x24] sm:$0x33 pattern:$0x75316420] }
 0x933   : > { %5594 = vmatpush3.msra.mxu0 %v6829_v51  ;;  %5595 = vmatprep.mubr.msk.f32.mxu0 %vm6099_vm1, %v7517_v20  ;;  %v2985_v26 = vcombine.high %v5317_v45, %v5317_v45 }
 0x934   : > { %5707 = vmatprep.subr.bf16.mxu0 %v7518_v42 }
 0x9f5   : > { %v2328_v11 = vpop.f32.mrb[18].mxu0 }
 0x9f6   : > { %v2329_v13 = vadd.f32 %v6542_v44, %v2328_v11  ;;  %v5559_v28 = vpop.f32.mrb[19].mxu0  ;;  %v2486_v44 = vmul.f32 1.442695, %v2481_v46  ;;  %v2999_v46 = vrot.slane %v2985_v26, %v6378_v39 }
 0x9f7   : > { %v2992_v28 = vrot.slane %v5317_v45, %v6378_v39 }
 0x9f8   : > { %5299 = vst.msk [vmem:[%s6545_s26 + $0x10] sm:$0xff] %vm1216_vm15, %v2329_v13  ;;  %5874 = vpow2.f32 %v2486_v44  ;;  %v6876_v44 = vrot.slane %v2999_v46, %v6381_v40 }
 0x9fd   : > { %v2655_v49 = vpop.f32.mrb[20].mxu0 }
 0x9fe   : > { %v2659_v47 = vmul.f32 0.35355338, %v2655_v49  ;;  %v5573_v22 = vpop.f32.mrb[21].mxu0 }
 0xa00   : > { %v2660_v52 = vadd.f32 %v2659_v47, %v6707_v55  ;;  %v2661_v24 = vadd.f32 %v2659_v47, %v6716_v57  ;;  %v2662_v35 = vadd.f32 %v2659_v47, %v6725_v61  ;;  %v2663_v62 = vadd.f32 %v2659_v47, %v6733_v6 }
 0xa01   : > { %v2492_v57 = vsel %vm294_vm0, %v5873_v37, 0.0  ;;  %v2532_v61 = vrot.slane %v6759_v1, %v6381_v40  ;;  %v2536_v6 = vrot.slane %v6764_v48, %v6381_v40  ;;  %v6866_v47 = vrot.slane %v2992_v28, %v6381_v40 }
 0xa02   : > { %v2664_v15 = vsel %vm294_vm0, %v2660_v52, -inf  ;;  %v2667_v31 = vsel %vm294_vm0, %v2661_v24, -inf  ;;  %v2670_v55 = vsel %vm294_vm0, %v2662_v35, -inf  ;;  %v2673_v63 = vsel %vm294_vm0, %v2663_v62, -inf  ;;  %v5875_v54 = vpop.eup %5874 }
 0xa03   : > { %2665 = vmax.xlane.f32.xlu0 %v2664_v15  ;;  %v2495_v12 = vsel %vm294_vm0, %v5875_v54, 0.0  ;;  %v2549_v9 = vmul.f32 %v5873_v37, %v2532_v61  ;;  %v2550_v41 = vmul.f32 %v5875_v54, %v2536_v6 }
 0xa05   : > { %v2972_v56 = vpop.f32.mrb[22].mxu0  ;;  %v2553_v5 = vsel %vm294_vm0, %v2549_v9, 0.0  ;;  %v2556_v7 = vsel %vm294_vm0, %v2550_v41, 0.0  ;;  %v2562_v41 = vsel %vm294_vm0, %v6792_v21, 0.0 }
 0xa06   : > { %v5585_v4 = vpop.f32.mrb[23].mxu0  ;;  %v2976_v49 = vmul.f32 0.35355338, %v2972_v56  ;;  %v3000_v56 = vcombine.high %v2992_v28, %v2992_v28 }
 0xa07   : > { %2668 = vmax.xlane.f32.xlu0 %v2667_v31  ;;  %v2559_v4 = vsel %vm294_vm0, %v6778_v38, 0.0 }
 0xa0b   : > { %2671 = vmax.xlane.f32.xlu0 %v2670_v55  ;;  %v6886_v55 = vrot.slane %v3000_v56, %v6381_v40 }
 0xa0f   : > { %2674 = vmax.xlane.f32.xlu0 %v2673_v63 }
 0xa13   : > { %2493 = vadd.xlane.f32.xlu0 %v2492_v57  ;;  %v6892_v57 = vadd.f32 %v6886_v55, %v2976_v49 }
 0xa17   : > { %2496 = vadd.xlane.f32.xlu0 %v2495_v12 }
 0xa1b   : > { %2502 = vadd.xlane.f32.xlu0 %v2501_v29  ;;  %v3032_v29 = vsel %vm294_vm0, %v6892_v57, -inf }
 0xa1f   : > { %2554 = vadd.xlane.f32.xlu0 %v2553_v5 }
 0xa23   : > { %2557 = vadd.xlane.f32.xlu0 %v2556_v7 }
 0xa90   : > { %v2666_v16 = vpop.xlane.xlu0 %2665 }
 0xa91   : > { %v2676_v27 = vsub.f32 %v2660_v52, %v2666_v16 }
 0xa93   : > { %v2680_v19 = vmul.f32 1.442695, %v2676_v27 }
 0xa94   : > { %v2669_v1 = vpop.xlane.xlu0 %2668 }
 0xa95   : > { %5876 = vpow2.f32 %v2680_v19  ;;  %v2677_v25 = vsub.f32 %v2661_v24, %v2669_v1  ;;  %v6873_v24 = vadd.f32 %v6866_v47, %v2976_v49  ;;  %v2500_v1 = vpop.xlane.xlu1 %2499 }
 0xa97   : > { %v2682_v0 = vmul.f32 1.442695, %v2677_v25 }
 0xa98   : > { %v2672_v18 = vpop.xlane.xlu0 %2671 }
 0xa99   : > { %5878 = vpow2.f32 %v2682_v0  ;;  %v2678_v2 = vsub.f32 %v2662_v35, %v2672_v18  ;;  %v6883_v35 = vadd.f32 %v6876_v44, %v2976_v49 }
 0xa9b   : > { %v2684_v48 = vmul.f32 1.442695, %v2678_v2  ;;  %v3029_v38 = vsel %vm294_vm0, %v6883_v35, -inf }
 0xa9c   : > { %v2675_v17 = vpop.xlane.xlu0 %2674 }
 0xa9d   : > { %5880 = vpow2.f32 %v2684_v48  ;;  %v2679_v50 = vsub.f32 %v2663_v62, %v2675_v17  ;;  %v3001_v62 = vcombine.high %v2999_v46, %v2999_v46 }
 0xa9f   : > { %v5877_v34 = vpop.eup %5876  ;;  %v2686_v36 = vmul.f32 1.442695, %v2679_v50  ;;  %v6895_v54 = vrot.slane %v3001_v62, %v6381_v40 }
 0xaa0   : > { %v2688_v8 = vsel %vm294_vm0, %v5877_v34, 0.0  ;;  %v2700_v31 = vmul.f32 %v5877_v34, %v2532_v61 }
 0xaa1   : > { %5882 = vpow2.f32 %v2686_v36  ;;  %2689 = vadd.xlane.f32.xlu0 %v2688_v8  ;;  %v6902_v9 = vadd.f32 %v6895_v54, %v2976_v49 }
 0xaa2   : > { %v2704_v63 = vsel %vm294_vm0, %v2700_v31, 0.0  ;;  %5884 = vrcp.f32 %v2500_v1 }
 0xaa3   : > { %v5879_v14 = vpop.eup %5878  ;;  %v3035_v5 = vsel %vm294_vm0, %v6902_v9, -inf }
 0xaa4   : > { %v2691_v53 = vsel %vm294_vm0, %v5879_v14, 0.0  ;;  %v2701_v37 = vmul.f32 %v5879_v14, %v2536_v6 }
 0xaa5   : > { %2692 = vadd.xlane.f32.xlu0 %v2691_v53 }
 0xaa6   : > { %v2707_v12 = vsel %vm294_vm0, %v2701_v37, 0.0 }
 0xaa7   : > { %v5881_v11 = vpop.eup %5880 }
 0xaa8   : > { %v2694_v13 = vsel %vm294_vm0, %v5881_v11, 0.0  ;;  %v2702_v61 = vmul.f32 %v5881_v11, %v6769_v32  ;;  %v2494_v32 = vpop.xlane.xlu0 %2493 }
 0xaa9   : > { %2695 = vadd.xlane.f32.xlu0 %v2694_v13 }
 0xaaa   : > { %v2710_v6 = vsel %vm294_vm0, %v2702_v61, 0.0 }
 0xaab   : > { %v5883_v22 = vpop.eup %5882 }
 0xaac   : > { %v2697_v52 = vsel %vm294_vm0, %v5883_v22, 0.0  ;;  %v2703_v23 = vmul.f32 %v5883_v22, %v6775_v59  ;;  %v3026_v59 = vsel %vm294_vm0, %v6873_v24, -inf  ;;  %v2497_v7 = vpop.xlane.xlu0 %2496  ;;  %v5885_v2 = vpop.eup %5884 }
 0xaad   : > { %2698 = vadd.xlane.f32.xlu0 %v2697_v52  ;;  %5886 = vrcp.f32 %v2497_v7  ;;  %v2571_v11 = vmul.f32 %v5885_v2, %v2500_v1 }
 0xaae   : > { %v2713_v15 = vsel %vm294_vm0, %v2703_v23, 0.0  ;;  %5888 = vrcp.f32 %v2494_v32 }
 0xaaf   : > { %2714 = vadd.xlane.f32.xlu1 %v2713_v15  ;;  %v2575_v15 = vsub.f32 2.0, %v2571_v11 }
 0xab0   : > { %v2503_v16 = vpop.xlane.xlu0 %2502 }
 0xab1   : > { %2560 = vadd.xlane.f32.xlu0 %v2559_v4 }
 0xab3   : > { %3027 = vmax.xlane.f32.xlu1 %v3026_v59 }
 0xab4   : > { %v2555_v27 = vpop.xlane.xlu0 %2554 }
 0xab5   : > { %2705 = vadd.xlane.f32.xlu0 %v2704_v63 }
 0xab7   : > { %3030 = vmax.xlane.f32.xlu1 %v3029_v38  ;;  %v5887_v48 = vpop.eup %5886 }
 0xab8   : > { %v2558_v19 = vpop.xlane.xlu0 %2557  ;;  %v5889_v17 = vpop.eup %5888  ;;  %v2570_v36 = vmul.f32 %v5887_v48, %v2497_v7 }
 0xab9   : > { %2708 = vadd.xlane.f32.xlu0 %v2707_v12  ;;  %v2569_v53 = vmul.f32 %v5889_v17, %v2494_v32 }
 0xaba   : > { %v2574_v28 = vsub.f32 2.0, %v2570_v36 }
 0xabb   : > { %3033 = vmax.xlane.f32.xlu1 %v3032_v29  ;;  %v2573_v23 = vsub.f32 2.0, %v2569_v53 }
 0xabc   : > { %v2578_v31 = vmul.f32 %v5887_v48, %v2574_v28 }
 0xabd   : > { %2711 = vadd.xlane.f32.xlu0 %v2710_v6  ;;  %v2577_v38 = vmul.f32 %v5889_v17, %v2573_v23  ;;  %v2579_v6 = vmul.f32 %v5885_v2, %v2575_v15  ;;  %v7519_v15 = vld [vmem:[#allocation8_spill] sm:$0xff] }
 0xabf   : > { %3036 = vmax.xlane.f32.xlu1 %v3035_v5 }
 0xac1   : > { %2563 = vadd.xlane.f32.xlu0 %v2562_v41  ;;  %v2582_v41 = vmul.f32 %v2578_v31, %v2558_v19  ;;  %v6956_v31 = vld [vmem:[%s7496_s4 + $0x8] ss:$0 sm:$0xff] }
 0xb2e   : > { %v2690_v25 = vpop.xlane.xlu0 %2689 }
 0xb2f   : > { %5890 = vrcp.f32 %v2690_v25 }
 0xb32   : > { %v2693_v0 = vpop.xlane.xlu0 %2692 }
 0xb33   : > { %5892 = vrcp.f32 %v2693_v0 }
 0xb36   : > { %v2696_v18 = vpop.xlane.xlu0 %2695 }
 0xb37   : > { %5894 = vrcp.f32 %v2696_v18 }
 0xb38   : > { %5896 = vrcp.f32 %v2503_v16 }
 0xb39   : > { %v5891_v50 = vpop.eup %5890 }
 0xb3a   : > { %v2699_v21 = vpop.xlane.xlu0 %2698  ;;  %v2720_v45 = vmul.f32 %v5891_v50, %v2690_v25 }
 0xb3b   : > { %5898 = vrcp.f32 %v2699_v21 }
 0xb3c   : > { %v2724_v46 = vsub.f32 2.0, %v2720_v45  ;;  %v2715_v36 = vpop.xlane.xlu1 %2714 }
 0xb3d   : > { %v5893_v34 = vpop.eup %5892 }
 0xb3e   : > { %v2721_v8 = vmul.f32 %v5893_v34, %v2693_v0  ;;  %v2561_v14 = vpop.xlane.xlu0 %2560  ;;  %v2728_v12 = vmul.f32 %v5891_v50, %v2724_v46  ;;  %v3143_v46 = vsel %vm6325_vm6, %v6820_v3, 0.0 }
 0xb3f   : > { %v2583_v25 = vmul.f32 %v2579_v6, %v2561_v14 }
 0xb40   : > { %v2725_v26 = vsub.f32 2.0, %v2721_v8 }
 0xb41   : > { %v5895_v13 = vpop.eup %5894  ;;  %v2751_v19 = vrot.slane %v2583_v25, %v6266_v33 }
 0xb42   : > { %v5897_v49 = vpop.eup %5896  ;;  %v2722_v22 = vmul.f32 %v5895_v13, %v2696_v18  ;;  %v2706_v52 = vpop.xlane.xlu0 %2705  ;;  %v2729_v62 = vmul.f32 %v5893_v34, %v2725_v26  ;;  %v2581_v18 = vmul.f32 %v2577_v38, %v2555_v27 }
 0xb43   : > { %v2572_v4 = vmul.f32 %v5897_v49, %v2503_v16  ;;  %v2732_v32 = vmul.f32 %v2728_v12, %v2706_v52 }
 0xb44   : > { %v2726_v59 = vsub.f32 2.0, %v2722_v22  ;;  %v2743_v53 = vrot.slane %v2581_v18, %v6266_v33 }
 0xb45   : > { %v5899_v56 = vpop.eup %5898  ;;  %v2576_v5 = vsub.f32 2.0, %v2572_v4  ;;  %v2767_v17 = vrot.slane %v2732_v32, %v6266_v33 }
 0xb46   : > { %v2723_v63 = vmul.f32 %v5899_v56, %v2699_v21  ;;  %v2709_v37 = vpop.xlane.xlu0 %2708  ;;  %v2730_v7 = vmul.f32 %v5895_v13, %v2726_v59  ;;  %v2747_v21 = vrot.slane %v2582_v41, %v6266_v33 }
 0xb47   : > { %v2733_v61 = vmul.f32 %v2729_v62, %v2709_v37  ;;  %v2580_v2 = vmul.f32 %v5897_v49, %v2576_v5  ;;  %v3028_v62 = vpop.xlane.xlu1 %3027 }
 0xb48   : > { %v2727_v29 = vsub.f32 2.0, %v2723_v63  ;;  %v2756_v13 = vsel %vm1070_vm7, %v2747_v21, %v2743_v53  ;;  %v3038_v63 = vsub.f32 %v6873_v24, %v3028_v62 }
 0xb49   : > { %v2771_v16 = vrot.slane %v2733_v61, %v6266_v33  ;;  %v2757_v26 = vsel %vm1072_vm8, %v2751_v19, %v2756_v13 }
 0xb4a   : > { %v2731_v1 = vmul.f32 %v5899_v56, %v2727_v29  ;;  %v2712_v0 = vpop.xlane.xlu0 %2711  ;;  %v3042_v6 = vmul.f32 1.442695, %v3038_v63  ;;  %v5329_v63 = vld.sshfl [vmem:[%s6374_s14 + $0x2c] sm:$0x33 pattern:$0x75316420] }
 0xb4b   : > { %v2734_v48 = vmul.f32 %v2730_v7, %v2712_v0  ;;  %v2780_v27 = vsel %vm1097_vm9, %v2771_v16, %v2767_v17  ;;  %v3031_v38 = vpop.xlane.xlu1 %3030 }
 0xb4c   : > { %v2735_v34 = vmul.f32 %v2731_v1, %v2715_v36  ;;  %v3039_v5 = vsub.f32 %v6883_v35, %v3031_v38  ;;  %5900 = vpow2.f32 %v3042_v6  ;;  %v3543_v6 = vcombine.high %v5329_v63, %v5329_v63 }
 0xb4d   : > { %v2775_v50 = vrot.slane %v2734_v48, %v6266_v33 }
 0xb4e   : > { %v2564_v8 = vpop.xlane.xlu0 %2563  ;;  %v2779_v14 = vrot.slane %v2735_v34, %v6266_v33  ;;  %v3044_v7 = vmul.f32 1.442695, %v3039_v5 }
 0xb4f   : > { %v2584_v45 = vmul.f32 %v2580_v2, %v2564_v8  ;;  %v2781_v11 = vsel %vm1099_vm10, %v2775_v50, %v2780_v27  ;;  %v3034_v34 = vpop.xlane.xlu1 %3033 }
 0xb50   : > { %v2782_v22 = vsel %vm1101_vm12, %v2779_v14, %v2781_v11  ;;  %5902 = vpow2.f32 %v3044_v7  ;;  %v3040_v21 = vsub.f32 %v6892_v57, %v3034_v34 }
 0xb51   : > { %v2755_v28 = vrot.slane %v2584_v45, %v6266_v33 }
 0xb53   : > { %v2758_v49 = vsel %vm1074_vm11, %v2755_v28, %v2757_v26  ;;  %v5318_v28 = vld.sshfl [vmem:[%s6374_s14 + $0x20] sm:$0x33 pattern:$0x75316420] }
 0xb54   : > { %v2784_v52 = vsel %vm1104_vm13, %v2758_v49, %v2782_v22  ;;  %v3070_v22 = vcombine.high %v5318_v28, %v5318_v28 }
 0xb55   : > { %2785 = vxpose.xlu0.b32.start.end [1/1] (short) (narrow) %v2784_v52, 8  ;;  %v3077_v52 = vrot.slane %v5318_v28, %v6378_v39 }
 0xbd5   : > { %v2801_v23 = vpop.trf.xlu0 }
 0xbd6   : > { %5577 = vmatmul.mubr.msk.f32.vlgmr.msra.gmra.mrb[24].mxu1 %vm1142_vm14, %v2801_v23 }
 0xbd7   : > { %5702 = vmatpush3.bf16.xpose.msk.msra.mxu1 %vm6283_vm2, %v6349_v10  ;;  %5590 = vmatprep.mubr.msk.f32.mxu1 %vm6099_vm1, %v7517_v20  ;;  %v7520_v10 = vld [vmem:[#allocation5_spill] sm:$0xff] }
 0xbd8   : > { %5703 = vmatprep.subr.bf16.mxu1 %v7518_v42  ;;  %v6943_v56 = vadd.f32 %v6657_v58, %v7520_v10 }
 0xbda   : > { %v3454_v3 = vsel %vm640_vm3, %v6943_v56, 0.0 }
 0xbde   : > { %5591 = vmatmul.mubr.msk.f32.vlgmr.msra.gmra.mrb[26].mxu1 %vm294_vm0, %v3143_v46 }
 0xbdf   : > { %5706 = vmatpush3.bf16.xpose.msk.msra.mxu1 %vm6283_vm2, %v7519_v15  ;;  %5602 = vmatprep.mubr.msk.f32.mxu1 %vm6099_vm1, %v7517_v20 }
 0xbe0   : > { %5612 = vmatprep.subr.mxu1 %v7517_v20 }
 0xbe6   : > { %5603 = vmatmul.mubr.msk.f32.vlgmr.msra.gmra.mrb[28].mxu1 %vm294_vm0, %v3454_v3  ;;  %v3084_v3 = vrot.slane %v3070_v22, %v6378_v39 }
 0xbe7   : > { %5613 = vmatpush3.msra.mxu1 %v6829_v51  ;;  %5614 = vmatprep.mubr.msk.f32.mxu1 %vm6099_vm1, %v7517_v20 }
 0xbe8   : > { %5715 = vmatprep.subr.bf16.mxu1 %v7518_v42  ;;  %v3094_v38 = vrot.slane %v3084_v3, %v6381_v40 }
 0xca9   : > { %v2886_v4 = vpop.f32.mrb[24].mxu1 }
 0xcaa   : > { %v2887_v58 = vadd.f32 %v6956_v31, %v2886_v4  ;;  %v5578_v59 = vpop.f32.mrb[25].mxu1 }
 0xcab   : > { %v3090_v59 = vrot.slane %v3077_v52, %v6381_v40 }
 0xcac   : > { %5311 = vst.msk [vmem:[%s6545_s26 + $0x18] sm:$0xff] %vm1216_vm15, %v2887_v58 }
 0xcb1   : > { %v3213_v37 = vpop.f32.mrb[26].mxu1 }
 0xcb2   : > { %v3217_v12 = vmul.f32 0.35355338, %v3213_v37  ;;  %v5592_v61 = vpop.f32.mrb[27].mxu1  ;;  %v3086_v37 = vcombine.high %v3084_v3, %v3084_v3 }
 0xcb4   : > { %v3218_v29 = vadd.f32 %v3217_v12, %v6866_v47  ;;  %v3219_v32 = vadd.f32 %v3217_v12, %v6876_v44  ;;  %v3220_v0 = vadd.f32 %v3217_v12, %v6886_v55  ;;  %v3221_v35 = vadd.f32 %v3217_v12, %v6895_v54  ;;  %v5901_v44 = vpop.eup %5900  ;;  %v3037_v55 = vpop.xlane.xlu1 %3036 }
 0xcb5   : > { %v3050_v36 = vsel %vm294_vm0, %v5901_v44, 0.0  ;;  %v5903_v16 = vpop.eup %5902  ;;  %v3046_v54 = vmul.f32 1.442695, %v3040_v21  ;;  %v3041_v2 = vsub.f32 %v6902_v9, %v3037_v55  ;;  %v3107_v61 = vmul.f32 %v5901_v44, %v3090_v59 }
 0xcb6   : > { %v3222_v41 = vsel %vm294_vm0, %v3218_v29, -inf  ;;  %v3225_v24 = vsel %vm294_vm0, %v3219_v32, -inf  ;;  %v3228_v47 = vsel %vm294_vm0, %v3220_v0, -inf  ;;  %v3231_v18 = vsel %vm294_vm0, %v3221_v35, -inf }
 0xcb7   : > { %3223 = vmax.xlane.f32.xlu1 %v3222_v41  ;;  %v3053_v48 = vsel %vm294_vm0, %v5903_v16, 0.0  ;;  %v3048_v14 = vmul.f32 1.442695, %v3041_v2  ;;  %v3102_v41 = vrot.slane %v3086_v37, %v6381_v40 }
 0xcb9   : > { %v6966_v1 = vpop.f32.mrb[28].mxu1 }
 0xcba   : > { %v5604_v25 = vpop.f32.mrb[29].mxu1  ;;  %v3534_v5 = vmul.f32 0.35355338, %v6966_v1 }
 0xcbb   : > { %3226 = vmax.xlane.f32.xlu1 %v3225_v24  ;;  %v3111_v25 = vsel %vm294_vm0, %v3107_v61, 0.0 }
 0xcbf   : > { %3229 = vmax.xlane.f32.xlu1 %v3228_v47  ;;  %v3557_v47 = vrot.slane %v3543_v6, %v6378_v39 }
 0xcc1   : > { %v7003_v1 = vrot.slane %v3557_v47, %v6381_v40 }
 0xcc3   : > { %3232 = vmax.xlane.f32.xlu1 %v3231_v18  ;;  %v7009_v55 = vadd.f32 %v7003_v1, %v3534_v5 }
 0xcc5   : > { %v3587_v2 = vsel %vm294_vm0, %v7009_v55, -inf }
 0xcc7   : > { %3051 = vadd.xlane.f32.xlu1 %v3050_v36 }
 0xccb   : > { %3054 = vadd.xlane.f32.xlu1 %v3053_v48  ;;  %v3085_v48 = vcombine.high %v3077_v52, %v3077_v52 }
 0xd44   : > { %v3224_v17 = vpop.xlane.xlu1 %3223 }
 0xd45   : > { %v3234_v50 = vsub.f32 %v3218_v29, %v3224_v17  ;;  %v3550_v29 = vrot.slane %v5329_v63, %v6378_v39  ;;  %v3559_v17 = vcombine.high %v3557_v47, %v3557_v47 }
 0xd47   : > { %v3238_v19 = vmul.f32 1.442695, %v3234_v50  ;;  %v3558_v44 = vcombine.high %v3550_v29, %v3550_v29 }
 0xd48   : > { %v3227_v8 = vpop.xlane.xlu1 %3226 }
 0xd49   : > { %5904 = vpow2.f32 %v3238_v19  ;;  %v3235_v53 = vsub.f32 %v3219_v32, %v3227_v8  ;;  %v6994_v32 = vrot.slane %v3550_v29, %v6381_v40  ;;  %v7012_v21 = vrot.slane %v3558_v44, %v6381_v40 }
 0xd4a   : > { %5906 = vpow2.f32 %v3046_v54  ;;  %v3098_v54 = vrot.slane %v3085_v48, %v6381_v40  ;;  %v7020_v8 = vrot.slane %v3559_v17, %v6381_v40 }
 0xd4b   : > { %v3240_v27 = vmul.f32 1.442695, %v3235_v53  ;;  %v7000_v18 = vadd.f32 %v6994_v32, %v3534_v5  ;;  %v3582_v19 = vadd.f32 %v7012_v21, %v3534_v5 }
 0xd4c   : > { %v3230_v45 = vpop.xlane.xlu1 %3229 }
 0xd4d   : > { %5908 = vpow2.f32 %v3240_v27  ;;  %v3236_v26 = vsub.f32 %v3220_v0, %v3230_v45  ;;  %v3108_v0 = vmul.f32 %v5903_v16, %v3094_v38  ;;  %v3584_v16 = vsel %vm294_vm0, %v7000_v18, -inf }
 0xd4e   : > { %5910 = vpow2.f32 %v3048_v14  ;;  %v3590_v27 = vsel %vm294_vm0, %v3582_v19, -inf  ;;  %v7025_v45 = vadd.f32 %v7020_v8, %v3534_v5 }
 0xd4f   : > { %v3242_v10 = vmul.f32 1.442695, %v3236_v26  ;;  %v3114_v36 = vsel %vm294_vm0, %v3108_v0, 0.0 }
 0xd50   : > { %v3233_v11 = vpop.xlane.xlu1 %3232  ;;  %v3593_v28 = vsel %vm294_vm0, %v7025_v45, -inf }
 0xd51   : > { %v3237_v13 = vsub.f32 %v3221_v35, %v3233_v11 }
 0xd53   : > { %v6978_v57 = vpop.eup %5904  ;;  %v3244_v49 = vmul.f32 1.442695, %v3237_v13 }
 0xd54   : > { %v3246_v9 = vsel %vm294_vm0, %v6978_v57, 0.0  ;;  %v5907_v23 = vpop.eup %5906  ;;  %v3258_v13 = vmul.f32 %v6978_v57, %v3090_v59  ;;  %v3052_v57 = vpop.xlane.xlu1 %3051 }
 0xd55   : > { %5912 = vpow2.f32 %v3244_v49  ;;  %3247 = vadd.xlane.f32.xlu1 %v3246_v9  ;;  %v3056_v4 = vsel %vm294_vm0, %v5907_v23, 0.0  ;;  %v3109_v14 = vmul.f32 %v5907_v23, %v3098_v54 }
 0xd56   : > { %5914 = vpow2.f32 %v3242_v10  ;;  %v3262_v26 = vsel %vm294_vm0, %v3258_v13, 0.0 }
 0xd57   : > { %v5909_v46 = vpop.eup %5908  ;;  %v3117_v11 = vsel %vm294_vm0, %v3109_v14, 0.0  ;;  %5916 = vrcp.f32 %v3052_v57 }
 0xd58   : > { %v3249_v58 = vsel %vm294_vm0, %v5909_v46, 0.0  ;;  %v5911_v62 = vpop.eup %5910  ;;  %v3259_v49 = vmul.f32 %v5909_v46, %v3094_v38  ;;  %v3055_v3 = vpop.xlane.xlu1 %3054 }
 0xd59   : > { %3057 = vadd.xlane.f32.xlu1 %v3056_v4  ;;  %3250 = vadd.xlane.f32.xlu0 %v3249_v58  ;;  %v3059_v12 = vsel %vm294_vm0, %v5911_v62, 0.0  ;;  %v3110_v23 = vmul.f32 %v5911_v62, %v3102_v41 }
 0xd5a   : > { %v3265_v22 = vsel %vm294_vm0, %v3259_v49, 0.0 }
 0xd5b   : > { %v3120_v10 = vsel %vm294_vm0, %v3110_v23, 0.0 }
 0xd5d   : > { %3060 = vadd.xlane.f32.xlu1 %v3059_v12 }
 0xd5f   : > { %v5913_v7 = vpop.eup %5912 }
 0xd60   : > { %v3261_v24 = vmul.f32 %v5913_v7, %v3102_v41  ;;  %v5915_v34 = vpop.eup %5914  ;;  %v3255_v53 = vsel %vm294_vm0, %v5913_v7, 0.0 }
 0xd61   : > { %3112 = vadd.xlane.f32.xlu1 %v3111_v25  ;;  %v3252_v50 = vsel %vm294_vm0, %v5915_v34, 0.0  ;;  %v3260_v9 = vmul.f32 %v5915_v34, %v3098_v54  ;;  %v5917_v29 = vpop.eup %5916 }
 0xd62   : > { %v3271_v35 = vsel %vm294_vm0, %v3261_v24, 0.0  ;;  %v3127_v44 = vmul.f32 %v5917_v29, %v3052_v57 }
 0xd63   : > { %3272 = vadd.xlane.f32.xlu0 %v3271_v35  ;;  %v3268_v52 = vsel %vm294_vm0, %v3260_v9, 0.0 }
 0xd65   : > { %3115 = vadd.xlane.f32.xlu1 %v3114_v36 }
 0xd67   : > { %3585 = vmax.xlane.f32.xlu0 %v3584_v16  ;;  %v5330_v16 = vld.sshfl [vmem:[%s6374_s14 + $0x28] sm:$0x33 pattern:$0x75316420] }
 0xd68   : > { %v7046_v13 = vrot.slane %v5330_v16, %v6378_v39 }
 0xd69   : > { %3253 = vadd.xlane.f32.xlu1 %v3252_v50 }
 0xd6b   : > { %3588 = vmax.xlane.f32.xlu0 %v3587_v2 }
 0xd6d   : > { %3256 = vadd.xlane.f32.xlu1 %v3255_v53 }
 0xd6f   : > { %3591 = vmax.xlane.f32.xlu0 %v3590_v27 }
 0xd71   : > { %3118 = vadd.xlane.f32.xlu1 %v3117_v11 }
 0xd73   : > { %3594 = vmax.xlane.f32.xlu0 %v3593_v28  ;;  %v3131_v28 = vsub.f32 2.0, %v3127_v44 }
 0xd75   : > { %3263 = vadd.xlane.f32.xlu1 %v3262_v26 }
 0xd79   : > { %3266 = vadd.xlane.f32.xlu1 %v3265_v22 }
 0xd7d   : > { %3269 = vadd.xlane.f32.xlu1 %v3268_v52  ;;  %v3643_v52 = vcombine.high %v7046_v13, %v7046_v13 }
 0xd81   : > { %3121 = vadd.xlane.f32.xlu1 %v3120_v10 }
 0xde2   : > { %v3248_v4 = vpop.xlane.xlu1 %3247 }
 0xde6   : > { %v3058_v58 = vpop.xlane.xlu1 %3057  ;;  %v3251_v63 = vpop.xlane.xlu0 %3250 }
 0xde7   : > { %5918 = vrcp.f32 %v3251_v63 }
 0xde8   : > { %5920 = vrcp.f32 %v3055_v3 }
 0xde9   : > { %5922 = vrcp.f32 %v3248_v4 }
 0xdea   : > { %v3061_v59 = vpop.xlane.xlu1 %3060  ;;  %5924 = vrcp.f32 %v3058_v58 }
 0xdee   : > { %v7035_v37 = vpop.xlane.xlu1 %3112 }
 0xdf0   : > { %v7037_v46 = vpop.xlane.xlu0 %3272 }
 0xdf1   : > { %v5919_v6 = vpop.eup %5918 }
 0xdf2   : > { %v3116_v38 = vpop.xlane.xlu1 %3115  ;;  %v5921_v41 = vpop.eup %5920  ;;  %v3279_v0 = vmul.f32 %v5919_v6, %v3251_v63  ;;  %v3135_v63 = vmul.f32 %v5917_v29, %v3131_v28 }
 0xdf3   : > { %v5923_v7 = vpop.eup %5922  ;;  %v3128_v36 = vmul.f32 %v5921_v41, %v3055_v3 }
 0xdf4   : > { %v7039_v62 = vpop.xlane.xlu0 %3585  ;;  %v5925_v24 = vpop.eup %5924  ;;  %v3278_v48 = vmul.f32 %v5923_v7, %v3248_v4  ;;  %v3283_v2 = vsub.f32 2.0, %v3279_v0  ;;  %v3139_v29 = vmul.f32 %v3135_v63, %v7035_v37 }
 0xdf5   : > { %v3129_v17 = vmul.f32 %v5925_v24, %v3058_v58  ;;  %v3132_v26 = vsub.f32 2.0, %v3128_v36 }
 0xdf6   : > { %v3254_v12 = vpop.xlane.xlu1 %3253  ;;  %v3282_v49 = vsub.f32 2.0, %v3278_v48  ;;  %v7056_v48 = vrot.slane %v3643_v52, %v6381_v40 }
 0xdf7   : > { %5926 = vrcp.f32 %v3254_v12  ;;  %v3133_v9 = vsub.f32 2.0, %v3129_v17 }
 0xdf8   : > { %5928 = vrcp.f32 %v3061_v59  ;;  %v7041_v61 = vpop.xlane.xlu0 %3588 }
 0xdf9   : > { %v3137_v44 = vmul.f32 %v5925_v24, %v3133_v9 }
 0xdfa   : > { %v3257_v5 = vpop.xlane.xlu1 %3256 }
 0xdfb   : > { %5930 = vrcp.f32 %v3257_v5 }
 0xdfc   : > { %v3592_v25 = vpop.xlane.xlu0 %3591 }
 0xdfd   : > { %v3598_v47 = vsub.f32 %v3582_v19, %v3592_v25  ;;  %v3628_v19 = vcombine.high %v5330_v16, %v5330_v16  ;;  %v3286_v25 = vmul.f32 %v5923_v7, %v3282_v49 }
 0xdfe   : > { %v3119_v35 = vpop.xlane.xlu1 %3118 }
 0xdff   : > { %v3604_v34 = vmul.f32 1.442695, %v3598_v47  ;;  %v7051_v58 = vrot.slane %v3628_v19, %v6378_v39  ;;  %v3141_v17 = vmul.f32 %v3137_v44, %v3119_v35 }
 0xe00   : > { %v3595_v50 = vpop.xlane.xlu0 %3594 }
 0xe01   : > { %v5927_v54 = vpop.eup %5926  ;;  %5932 = vpow2.f32 %v3604_v34  ;;  %v3599_v53 = vsub.f32 %v7025_v45, %v3595_v50  ;;  %v3287_v45 = vmul.f32 %v5919_v6, %v3283_v2  ;;  %v3644_v36 = vcombine.high %v7051_v58, %v7051_v58 }
 0xe02   : > { %v5929_v14 = vpop.eup %5928  ;;  %v3280_v27 = vmul.f32 %v5927_v54, %v3254_v12  ;;  %v3264_v11 = vpop.xlane.xlu1 %3263  ;;  %v3136_v12 = vmul.f32 %v5921_v41, %v3132_v26  ;;  %v3309_v37 = vrot.slane %v3141_v17, %v6266_v33 }
 0xe03   : > { %v3606_v22 = vmul.f32 1.442695, %v3599_v53  ;;  %v3130_v10 = vmul.f32 %v5929_v14, %v3061_v59  ;;  %v3290_v6 = vmul.f32 %v3286_v25, %v3264_v11  ;;  %v7062_v53 = vrot.slane %v3644_v36, %v6381_v40  ;;  %v7521_v25 = vld [vmem:[#allocation9_spill] sm:$0xff] }
 0xe04   : > { %v3284_v57 = vsub.f32 2.0, %v3280_v27  ;;  %v3140_v34 = vmul.f32 %v3136_v12, %v3116_v38  ;;  %v3701_v12 = vsel %vm6325_vm6, %v6943_v56, 0.0 }
 0xe05   : > { %v5931_v23 = vpop.eup %5930  ;;  %5934 = vpow2.f32 %v3606_v22  ;;  %v3134_v59 = vsub.f32 2.0, %v3130_v10 }
 0xe06   : > { %v3281_v3 = vmul.f32 %v5931_v23, %v3257_v5  ;;  %v3267_v4 = vpop.xlane.xlu1 %3266  ;;  %v3288_v5 = vmul.f32 %v5927_v54, %v3284_v57  ;;  %v3305_v38 = vrot.slane %v3140_v34, %v6266_v33  ;;  %v3325_v54 = vrot.slane %v3290_v6, %v6266_v33 }
 0xe07   : > { %v3291_v0 = vmul.f32 %v3287_v45, %v3267_v4  ;;  %v3138_v11 = vmul.f32 %v5929_v14, %v3134_v59  ;;  %v3596_v34 = vsub.f32 %v7000_v18, %v7039_v62 }
 0xe08   : > { %v3285_v47 = vsub.f32 2.0, %v3281_v3 }
 0xe09   : > { %v3329_v41 = vrot.slane %v3291_v0, %v6266_v33  ;;  %v7522_v0 = vld [vmem:[#allocation7_spill] sm:$0xff] }
 0xe0a   : > { %v3289_v16 = vmul.f32 %v5931_v23, %v3285_v47  ;;  %v3270_v50 = vpop.xlane.xlu1 %3269 }
 0xe0b   : > { %v5933_v2 = vpop.eup %5932  ;;  %v3292_v7 = vmul.f32 %v3288_v5, %v3270_v50  ;;  %v3338_v49 = vsel %vm1097_vm9, %v3329_v41, %v3325_v54  ;;  %v3597_v50 = vsub.f32 %v7009_v55, %v7041_v61 }
 0xe0c   : > { %v3293_v24 = vmul.f32 %v3289_v16, %v7037_v46  ;;  %v7065_v27 = vmul.f32 %v5933_v2, %v7056_v48  ;;  %v3301_v46 = vrot.slane %v3139_v29, %v6266_v33  ;;  %v3614_v4 = vsel %vm294_vm0, %v5933_v2, 0.0 }
 0xe0d   : > { %v3333_v35 = vrot.slane %v3292_v7, %v6266_v33  ;;  %v3602_v41 = vmul.f32 1.442695, %v3597_v50 }
 0xe0e   : > { %v3122_v19 = vpop.xlane.xlu1 %3121  ;;  %v3337_v26 = vrot.slane %v3293_v24, %v6266_v33  ;;  %v3314_v14 = vsel %vm1070_vm7, %v3305_v38, %v3301_v46 }
 0xe0f   : > { %v7071_v28 = vpop.eup %5934  ;;  %v3142_v22 = vmul.f32 %v3138_v11, %v3122_v19  ;;  %v3339_v9 = vsel %vm1099_vm10, %v3333_v35, %v3338_v49  ;;  %v3315_v10 = vsel %vm1072_vm8, %v3309_v37, %v3314_v14 }
 0xe10   : > { %v7079_v52 = vmul.f32 %v7071_v28, %v7062_v53  ;;  %v3340_v45 = vsel %vm1101_vm12, %v3337_v26, %v3339_v9  ;;  %v3617_v11 = vsel %vm294_vm0, %v7071_v28, 0.0 }
 0xe11   : > { %v3313_v23 = vrot.slane %v3142_v22, %v6266_v33 }
 0xe13   : > { %v3316_v57 = vsel %vm1074_vm11, %v3313_v23, %v3315_v10 }
 0xe14   : > { %v3342_v3 = vsel %vm1104_vm13, %v3316_v57, %v3340_v45 }
 0xe15   : > { %3343 = vxpose.xlu1.b32.start.end [1/1] (short) (narrow) %v3342_v3, 8 }
 0xe3c   : > { %3615 = vadd.xlane.f32.xlu1 %v3614_v4 }
 0xe95   : > { %v3359_v63 = vpop.trf.xlu1 }
 0xe96   : > { %5596 = vmatmul.mubr.msk.f32.vlgmr.msra.gmra.mrb[24].mxu0 %vm1142_vm14, %v3359_v63 }
 0xe97   : > { %5710 = vmatpush3.bf16.xpose.msk.msra.mxu0 %vm6283_vm2, %v7519_v15  ;;  %5609 = vmatprep.mubr.msk.f32.mxu0 %vm6099_vm1, %v7517_v20  ;;  %v7108_v15 = vld [vmem:[%s7495_s3 + $0x10] ss:$0 sm:$0xff] }
 0xe98   : > { %5711 = vmatprep.subr.bf16.mxu0 %v7518_v42  ;;  %v7112_v47 = vadd.f32 %v7108_v15, %v7522_v0 }
 0xe9a   : > { %v4012_v56 = vsel %vm640_vm3, %v7112_v47, 0.0 }
 0xe9e   : > { %5610 = vmatmul.mubr.msk.f32.vlgmr.msra.gmra.mrb[26].mxu0 %vm294_vm0, %v3701_v12 }
 0xe9f   : > { %5714 = vmatpush3.bf16.xpose.msk.msra.mxu0 %vm6283_vm2, %v7521_v25  ;;  %5621 = vmatprep.mubr.msk.f32.mxu0 %vm6099_vm1, %v7517_v20 }
 0xea0   : > { %5631 = vmatprep.subr.mxu0 %v7517_v20 }
 0xea6   : > { %5622 = vmatmul.mubr.msk.f32.vlgmr.msra.gmra.mrb[28].mxu0 %vm294_vm0, %v4012_v56  ;;  %v5341_v56 = vld.sshfl [vmem:[%s6374_s14 + $0x34] sm:$0x33 pattern:$0x75316420] }
 0xea7   : > { %5632 = vmatpush3.msra.mxu0 %v6829_v51  ;;  %5633 = vmatprep.mubr.msk.f32.mxu0 %vm6099_vm1, %v7517_v20  ;;  %v3600_v51 = vmul.f32 1.442695, %v3596_v34  ;;  %v4101_v34 = vcombine.high %v5341_v56, %v5341_v56 }
 0xea8   : > { %5723 = vmatprep.subr.bf16.mxu0 %v7518_v42 }
 0xea9   : > { %5936 = vpow2.f32 %v3600_v51  ;;  %v4115_v50 = vrot.slane %v4101_v34, %v6378_v39 }
 0xeaa   : > { %5938 = vpow2.f32 %v3602_v41 }
 0xeab   : > { %v7163_v41 = vrot.slane %v4115_v50, %v6381_v40 }
 0xeb3   : > { %v5937_v61 = vpop.eup %5936 }
 0xeb4   : > { %v5939_v54 = vpop.eup %5938 }
 0xeb5   : > { %v3611_v35 = vsel %vm294_vm0, %v5939_v54, 0.0 }
 0xf69   : > { %v3444_v44 = vpop.f32.mrb[24].mxu0 }
 0xf6a   : > { %v3445_v36 = vadd.f32 %v6956_v31, %v3444_v44  ;;  %v5597_v59 = vpop.f32.mrb[25].mxu0 }
 0xf6b   : > { %v4108_v59 = vrot.slane %v5341_v56, %v6378_v39 }
 0xf6c   : > { %5323 = vst.msk [vmem:[%s6545_s26 + $0x20] sm:$0xff] %vm1216_vm15, %v3445_v36 }
 0xf71   : > { %v3771_v6 = vpop.f32.mrb[26].mxu0 }
 0xf72   : > { %v3775_v5 = vmul.f32 0.35355338, %v3771_v6  ;;  %v5611_v16 = vpop.f32.mrb[27].mxu0 }
 0xf74   : > { %v3776_v17 = vadd.f32 %v3775_v5, %v6994_v32  ;;  %v3777_v29 = vadd.f32 %v3775_v5, %v7003_v1  ;;  %v3778_v62 = vadd.f32 %v3775_v5, %v7012_v21  ;;  %v3779_v38 = vadd.f32 %v3775_v5, %v7020_v8 }
 0xf75   : > { %v3608_v1 = vsel %vm294_vm0, %v5937_v61, 0.0  ;;  %v3648_v21 = vrot.slane %v7046_v13, %v6381_v40  ;;  %v3652_v8 = vrot.slane %v7051_v58, %v6381_v40  ;;  %v7153_v5 = vrot.slane %v4108_v59, %v6381_v40 }
 0xf76   : > { %v3780_v2 = vsel %vm294_vm0, %v3776_v17, -inf  ;;  %v3783_v18 = vsel %vm294_vm0, %v3777_v29, -inf  ;;  %v3786_v32 = vsel %vm294_vm0, %v3778_v62, -inf  ;;  %v3789_v55 = vsel %vm294_vm0, %v3779_v38, -inf }
 0xf77   : > { %3781 = vmax.xlane.f32.xlu0 %v3780_v2  ;;  %v3665_v37 = vmul.f32 %v5937_v61, %v3648_v21  ;;  %v3666_v46 = vmul.f32 %v5939_v54, %v3652_v8 }
 0xf79   : > { %v4088_v7 = vpop.f32.mrb[28].mxu0  ;;  %v3669_v19 = vsel %vm294_vm0, %v3665_v37, 0.0  ;;  %v3672_v26 = vsel %vm294_vm0, %v3666_v46, 0.0  ;;  %v3678_v46 = vsel %vm294_vm0, %v7079_v52, 0.0 }
 0xf7a   : > { %v5623_v24 = vpop.f32.mrb[29].mxu0  ;;  %v4092_v6 = vmul.f32 0.35355338, %v4088_v7  ;;  %v4116_v7 = vcombine.high %v4108_v59, %v4108_v59 }
 0xf7b   : > { %3784 = vmax.xlane.f32.xlu0 %v3783_v18  ;;  %v3675_v24 = vsel %vm294_vm0, %v7065_v27, 0.0 }
 0xf7f   : > { %3787 = vmax.xlane.f32.xlu0 %v3786_v32  ;;  %v7173_v32 = vrot.slane %v4116_v7, %v6381_v40 }
 0xf83   : > { %3790 = vmax.xlane.f32.xlu0 %v3789_v55 }
 0xf87   : > { %3609 = vadd.xlane.f32.xlu0 %v3608_v1  ;;  %v7179_v1 = vadd.f32 %v7173_v32, %v4092_v6 }
 0xf8b   : > { %3612 = vadd.xlane.f32.xlu0 %v3611_v35 }
 0xf8f   : > { %3618 = vadd.xlane.f32.xlu0 %v3617_v11  ;;  %v4148_v11 = vsel %vm294_vm0, %v7179_v1, -inf }
 0xf93   : > { %3670 = vadd.xlane.f32.xlu0 %v3669_v19 }
 0xf97   : > { %3673 = vadd.xlane.f32.xlu0 %v3672_v26 }
0x1004   : > { %v3782_v49 = vpop.xlane.xlu0 %3781 }
0x1005   : > { %v3792_v22 = vsub.f32 %v3776_v17, %v3782_v49 }
0x1007   : > { %v3796_v9 = vmul.f32 1.442695, %v3792_v22 }
0x1008   : > { %v3785_v13 = vpop.xlane.xlu0 %3784 }
0x1009   : > { %5940 = vpow2.f32 %v3796_v9  ;;  %v3793_v14 = vsub.f32 %v3777_v29, %v3785_v13  ;;  %v7160_v29 = vadd.f32 %v7153_v5, %v4092_v6  ;;  %v3616_v13 = vpop.xlane.xlu1 %3615 }
0x100b   : > { %v3798_v23 = vmul.f32 1.442695, %v3793_v14 }
0x100c   : > { %v3788_v28 = vpop.xlane.xlu0 %3787 }
0x100d   : > { %5942 = vpow2.f32 %v3798_v23  ;;  %v3794_v10 = vsub.f32 %v3778_v62, %v3788_v28  ;;  %v7170_v62 = vadd.f32 %v7163_v41, %v4092_v6 }
0x100f   : > { %v3800_v58 = vmul.f32 1.442695, %v3794_v10  ;;  %v4145_v27 = vsel %vm294_vm0, %v7170_v62, -inf }
0x1010   : > { %v3791_v57 = vpop.xlane.xlu0 %3790 }
0x1011   : > { %5944 = vpow2.f32 %v3800_v58  ;;  %v3795_v45 = vsub.f32 %v3779_v38, %v3791_v57  ;;  %v4117_v38 = vcombine.high %v4115_v50, %v4115_v50 }
0x1013   : > { %v5941_v3 = vpop.eup %5940  ;;  %v3802_v4 = vmul.f32 1.442695, %v3795_v45  ;;  %v7182_v54 = vrot.slane %v4117_v38, %v6381_v40 }
0x1014   : > { %v3804_v63 = vsel %vm294_vm0, %v5941_v3, 0.0  ;;  %v3816_v18 = vmul.f32 %v5941_v3, %v3648_v21 }
0x1015   : > { %5946 = vpow2.f32 %v3802_v4  ;;  %3805 = vadd.xlane.f32.xlu0 %v3804_v63  ;;  %v7189_v37 = vadd.f32 %v7182_v54, %v4092_v6 }
0x1016   : > { %v3820_v55 = vsel %vm294_vm0, %v3816_v18, 0.0  ;;  %5948 = vrcp.f32 %v3616_v13 }
0x1017   : > { %v5943_v12 = vpop.eup %5942  ;;  %v4151_v19 = vsel %vm294_vm0, %v7189_v37, -inf }
0x1018   : > { %v3807_v0 = vsel %vm294_vm0, %v5943_v12, 0.0  ;;  %v3817_v61 = vmul.f32 %v5943_v12, %v3652_v8 }
0x1019   : > { %3808 = vadd.xlane.f32.xlu0 %v3807_v0 }
0x101a   : > { %v3823_v35 = vsel %vm294_vm0, %v3817_v61, 0.0 }
0x101b   : > { %v5945_v44 = vpop.eup %5944 }
0x101c   : > { %v3810_v36 = vsel %vm294_vm0, %v5945_v44, 0.0  ;;  %v3818_v21 = vmul.f32 %v5945_v44, %v7056_v48  ;;  %v3610_v48 = vpop.xlane.xlu0 %3609 }
0x101d   : > { %3811 = vadd.xlane.f32.xlu0 %v3810_v36 }
0x101e   : > { %v3826_v8 = vsel %vm294_vm0, %v3818_v21, 0.0 }
0x101f   : > { %v5947_v16 = vpop.eup %5946 }
0x1020   : > { %v3813_v17 = vsel %vm294_vm0, %v5947_v16, 0.0  ;;  %v3819_v51 = vmul.f32 %v5947_v16, %v7062_v53  ;;  %v4142_v53 = vsel %vm294_vm0, %v7160_v29, -inf  ;;  %v3613_v26 = vpop.xlane.xlu0 %3612  ;;  %v5949_v10 = vpop.eup %5948 }
0x1021   : > { %3814 = vadd.xlane.f32.xlu0 %v3813_v17  ;;  %5950 = vrcp.f32 %v3613_v26  ;;  %v3687_v44 = vmul.f32 %v5949_v10, %v3616_v13 }
0x1022   : > { %v3829_v2 = vsel %vm294_vm0, %v3819_v51, 0.0  ;;  %5952 = vrcp.f32 %v3610_v48 }
0x1023   : > { %3830 = vadd.xlane.f32.xlu1 %v3829_v2  ;;  %v3691_v2 = vsub.f32 2.0, %v3687_v44 }
0x1024   : > { %v3619_v49 = vpop.xlane.xlu0 %3618 }
0x1025   : > { %3676 = vadd.xlane.f32.xlu0 %v3675_v24 }
0x1027   : > { %4143 = vmax.xlane.f32.xlu1 %v4142_v53 }
0x1028   : > { %v3671_v22 = vpop.xlane.xlu0 %3670 }
0x1029   : > { %3821 = vadd.xlane.f32.xlu0 %v3820_v55 }
0x102b   : > { %4146 = vmax.xlane.f32.xlu1 %v4145_v27  ;;  %v5951_v58 = vpop.eup %5950 }
0x102c   : > { %v3674_v9 = vpop.xlane.xlu0 %3673  ;;  %v5953_v57 = vpop.eup %5952  ;;  %v3686_v4 = vmul.f32 %v5951_v58, %v3613_v26 }
0x102d   : > { %3824 = vadd.xlane.f32.xlu0 %v3823_v35  ;;  %v3685_v0 = vmul.f32 %v5953_v57, %v3610_v48 }
0x102e   : > { %v3690_v59 = vsub.f32 2.0, %v3686_v4 }
0x102f   : > { %4149 = vmax.xlane.f32.xlu1 %v4148_v11  ;;  %v3689_v51 = vsub.f32 2.0, %v3685_v0 }
0x1030   : > { %v3694_v18 = vmul.f32 %v5951_v58, %v3690_v59 }
0x1031   : > { %3827 = vadd.xlane.f32.xlu0 %v3826_v8  ;;  %v3693_v27 = vmul.f32 %v5953_v57, %v3689_v51  ;;  %v3695_v8 = vmul.f32 %v5949_v10, %v3691_v2  ;;  %v7523_v2 = vld [vmem:[#allocation10_spill] sm:$0xff] }
0x1033   : > { %4152 = vmax.xlane.f32.xlu1 %v4151_v19 }
0x1035   : > { %3679 = vadd.xlane.f32.xlu0 %v3678_v46  ;;  %v3698_v46 = vmul.f32 %v3694_v18, %v3674_v9 }
0x10a2   : > { %v3806_v14 = vpop.xlane.xlu0 %3805 }
0x10a3   : > { %5954 = vrcp.f32 %v3806_v14 }
0x10a6   : > { %v3809_v23 = vpop.xlane.xlu0 %3808 }
0x10a7   : > { %5956 = vrcp.f32 %v3809_v23 }
0x10aa   : > { %v3812_v28 = vpop.xlane.xlu0 %3811 }
0x10ab   : > { %5958 = vrcp.f32 %v3812_v28 }
0x10ac   : > { %5960 = vrcp.f32 %v3619_v49 }
0x10ad   : > { %v5955_v45 = vpop.eup %5954 }
0x10ae   : > { %v3815_v52 = vpop.xlane.xlu0 %3814  ;;  %v3836_v56 = vmul.f32 %v5955_v45, %v3806_v14 }
0x10af   : > { %5962 = vrcp.f32 %v3815_v52 }
0x10b0   : > { %v3840_v50 = vsub.f32 2.0, %v3836_v56  ;;  %v3831_v4 = vpop.xlane.xlu1 %3830 }
0x10b1   : > { %v5957_v3 = vpop.eup %5956 }
0x10b2   : > { %v3837_v63 = vmul.f32 %v5957_v3, %v3809_v23  ;;  %v3677_v12 = vpop.xlane.xlu0 %3676  ;;  %v3844_v35 = vmul.f32 %v5955_v45, %v3840_v50  ;;  %v4259_v50 = vsel %vm6325_vm6, %v7112_v47, 0.0  ;;  %v6032_v47 = vld [vmem:[%s7496_s4] sm:$0xff] }
0x10b3   : > { %v3699_v14 = vmul.f32 %v3695_v8, %v3677_v12 }
0x10b4   : > { %v3841_v34 = vsub.f32 2.0, %v3837_v63 }
0x10b5   : > { %v5959_v36 = vpop.eup %5958  ;;  %v3867_v9 = vrot.slane %v3699_v14, %v6266_v33 }
0x10b6   : > { %v5961_v6 = vpop.eup %5960  ;;  %v3838_v16 = vmul.f32 %v5959_v36, %v3812_v28  ;;  %v3822_v17 = vpop.xlane.xlu0 %3821  ;;  %v3845_v38 = vmul.f32 %v5957_v3, %v3841_v34  ;;  %v3697_v28 = vmul.f32 %v3693_v27, %v3671_v22 }
0x10b7   : > { %v3688_v24 = vmul.f32 %v5961_v6, %v3619_v49  ;;  %v3848_v48 = vmul.f32 %v3844_v35, %v3822_v17 }
0x10b8   : > { %v3842_v53 = vsub.f32 2.0, %v3838_v16  ;;  %v3859_v0 = vrot.slane %v3697_v28, %v6266_v33 }
0x10b9   : > { %v5963_v7 = vpop.eup %5962  ;;  %v3692_v19 = vsub.f32 2.0, %v3688_v24  ;;  %v3883_v57 = vrot.slane %v3848_v48, %v6266_v33 }
0x10ba   : > { %v3839_v55 = vmul.f32 %v5963_v7, %v3815_v52  ;;  %v3825_v61 = vpop.xlane.xlu0 %3824  ;;  %v3846_v26 = vmul.f32 %v5959_v36, %v3842_v53  ;;  %v3863_v52 = vrot.slane %v3698_v46, %v6266_v33 }
0x10bb   : > { %v3849_v21 = vmul.f32 %v3845_v38, %v3825_v61  ;;  %v3696_v10 = vmul.f32 %v5961_v6, %v3692_v19 }
0x10bc   : > { %v3843_v11 = vsub.f32 2.0, %v3839_v55  ;;  %v3872_v36 = vsel %vm1070_vm7, %v3863_v52, %v3859_v0 }
0x10bd   : > { %v3887_v49 = vrot.slane %v3849_v21, %v6266_v33  ;;  %v3873_v34 = vsel %vm1072_vm8, %v3867_v9, %v3872_v36 }
0x10be   : > { %v3847_v13 = vmul.f32 %v5963_v7, %v3843_v11  ;;  %v3828_v23 = vpop.xlane.xlu0 %3827 }
0x10bf   : > { %v3850_v58 = vmul.f32 %v3846_v26, %v3828_v23  ;;  %v3896_v22 = vsel %vm1097_vm9, %v3887_v49, %v3883_v57 }
0x10c0   : > { %v3851_v3 = vmul.f32 %v3847_v13, %v3831_v4 }
0x10c1   : > { %v3891_v45 = vrot.slane %v3850_v58, %v6266_v33 }
0x10c2   : > { %v3680_v63 = vpop.xlane.xlu0 %3679  ;;  %v3895_v12 = vrot.slane %v3851_v3, %v6266_v33 }
0x10c3   : > { %v3700_v56 = vmul.f32 %v3696_v10, %v3680_v63  ;;  %v3897_v44 = vsel %vm1099_vm10, %v3891_v45, %v3896_v22 }
0x10c4   : > { %v3898_v16 = vsel %vm1101_vm12, %v3895_v12, %v3897_v44 }
0x10c5   : > { %v3871_v59 = vrot.slane %v3700_v56, %v6266_v33  ;;  %v5342_v56 = vld.sshfl [vmem:[%s6374_s14 + $0x30] sm:$0x33 pattern:$0x75316420] }
0x10c7   : > { %v3874_v6 = vsel %vm1074_vm11, %v3871_v59, %v3873_v34  ;;  %v4186_v59 = vcombine.high %v5342_v56, %v5342_v56  ;;  %v4193_v34 = vrot.slane %v5342_v56, %v6378_v39 }
0x10c8   : > { %v3900_v17 = vsel %vm1104_vm13, %v3874_v6, %v3898_v16 }
0x10c9   : > { %3901 = vxpose.xlu0.b32.start.end [1/1] (short) (narrow) %v3900_v17, 8 }
0x1149   : > { %v3917_v51 = vpop.trf.xlu0 }
0x114a   : > { %5615 = vmatmul.mubr.msk.f32.vlgmr.msra.gmra.mrb[30].mxu1 %vm1142_vm14, %v3917_v51  ;;  %v4200_v51 = vrot.slane %v4186_v59, %v6378_v39 }
0x114b   : > { %5718 = vmatpush3.bf16.xpose.msk.msra.mxu1 %vm6283_vm2, %v7521_v25  ;;  %5628 = vmatprep.mubr.msk.f32.mxu1 %vm6099_vm1, %v7517_v20  ;;  %v7524_v25 = vld [vmem:[#allocation6_spill] sm:$0xff] }
0x114c   : > { %5719 = vmatprep.subr.bf16.mxu1 %v7518_v42  ;;  %v7230_v7 = vadd.f32 %v7108_v15, %v7524_v25  ;;  %v4144_v15 = vpop.xlane.xlu1 %4143 }
0x114d   : > { %v4154_v30 = vsub.f32 %v7160_v29, %v4144_v15 }
0x114e   : > { %v4570_v42 = vsel %vm640_vm3, %v7230_v7, 0.0 }
0x114f   : > { %v4158_v21 = vmul.f32 1.442695, %v4154_v30 }
0x1150   : > { %v4147_v55 = vpop.xlane.xlu1 %4146 }
0x1151   : > { %v4155_v11 = vsub.f32 %v7170_v62, %v4147_v55  ;;  %5964 = vpow2.f32 %v4158_v21 }
0x1152   : > { %5629 = vmatmul.mubr.msk.f32.vlgmr.msra.gmra.mrb[32].mxu1 %vm294_vm0, %v4259_v50 }
0x1153   : > { %5722 = vmatpush3.bf16.xpose.msk.msra.mxu1 %vm6283_vm2, %v7523_v2  ;;  %5640 = vmatprep.mubr.msk.f32.mxu1 %vm6099_vm1, %v7517_v20 }
0x1154   : > { %5650 = vmatprep.subr.mxu1 %v7517_v20  ;;  %v4150_v4 = vpop.xlane.xlu1 %4149 }
0x1155   : > { %v4156_v49 = vsub.f32 %v7179_v1, %v4150_v4 }
0x115a   : > { %5641 = vmatmul.mubr.msk.f32.vlgmr.msra.gmra.mrb[34].mxu1 %vm294_vm0, %v4570_v42  ;;  %v4206_v42 = vrot.slane %v4193_v34, %v6381_v40 }
0x115b   : > { %5651 = vmatpush3.msra.mxu1 %v6032_v47  ;;  %5652 = vmatprep.mubr.msk.f32.mxu1 %vm6099_vm1, %v7517_v20 }
0x121d   : > { %v4002_v24 = vpop.f32.mrb[30].mxu1 }
0x121e   : > { %v4003_v18 = vadd.f32 %v6956_v31, %v4002_v24  ;;  %v5616_v53 = vpop.f32.mrb[31].mxu1  ;;  %v4160_v31 = vmul.f32 1.442695, %v4155_v11 }
0x121f   : > { %v5353_v24 = vld.sshfl [vmem:[%s6374_s14 + $0x3c] sm:$0x33 pattern:$0x75316420]  ;;  %v4210_v53 = vrot.slane %v4200_v51, %v6381_v40 }
0x1220   : > { %5335 = vst.msk [vmem:[%s6545_s26 + $0x28] sm:$0xff] %vm1216_vm15, %v4003_v18  ;;  %5966 = vpow2.f32 %v4160_v31  ;;  %v4202_v18 = vcombine.high %v4200_v51, %v4200_v51  ;;  %v4659_v55 = vcombine.high %v5353_v24, %v5353_v24 }
0x1222   : > { %v4673_v31 = vrot.slane %v4659_v55, %v6378_v39 }
0x1225   : > { %v4329_v38 = vpop.f32.mrb[32].mxu1 }
0x1226   : > { %v4333_v61 = vmul.f32 0.35355338, %v4329_v38  ;;  %v5630_v27 = vpop.f32.mrb[33].mxu1  ;;  %v4666_v38 = vrot.slane %v5353_v24, %v6378_v39 }
0x1227   : > { %v4218_v27 = vrot.slane %v4202_v18, %v6381_v40 }
0x1228   : > { %v4334_v35 = vadd.f32 %v4333_v61, %v7153_v5  ;;  %v4335_v19 = vadd.f32 %v4333_v61, %v7163_v41  ;;  %v4336_v26 = vadd.f32 %v4333_v61, %v7173_v32  ;;  %v4337_v62 = vadd.f32 %v4333_v61, %v7182_v54  ;;  %v5965_v41 = vpop.eup %5964  ;;  %v4153_v32 = vpop.xlane.xlu1 %4152 }
0x1229   : > { %v4166_v14 = vsel %vm294_vm0, %v5965_v41, 0.0  ;;  %v4162_v54 = vmul.f32 1.442695, %v4156_v49  ;;  %v4157_v52 = vsub.f32 %v7189_v37, %v4153_v32  ;;  %v4223_v30 = vmul.f32 %v5965_v41, %v4206_v42 }
0x122a   : > { %v4338_v8 = vsel %vm294_vm0, %v4334_v35, -inf  ;;  %v4341_v29 = vsel %vm294_vm0, %v4335_v19, -inf  ;;  %v4344_v5 = vsel %vm294_vm0, %v4336_v26, -inf  ;;  %v4347_v13 = vsel %vm294_vm0, %v4337_v62, -inf  ;;  %v5967_v23 = vpop.eup %5966 }
0x122b   : > { %4339 = vmax.xlane.f32.xlu1 %v4338_v8  ;;  %v4169_v28 = vsel %vm294_vm0, %v5967_v23, 0.0  ;;  %v4164_v9 = vmul.f32 1.442695, %v4157_v52  ;;  %v4227_v11 = vsel %vm294_vm0, %v4223_v30, 0.0 }
0x122d   : > { %v7249_v46 = vpop.f32.mrb[34].mxu1 }
0x122e   : > { %v5642_v48 = vpop.f32.mrb[35].mxu1  ;;  %v4650_v61 = vmul.f32 0.35355338, %v7249_v46  ;;  %v7286_v46 = vrot.slane %v4673_v31, %v6381_v40 }
0x122f   : > { %4342 = vmax.xlane.f32.xlu1 %v4341_v29 }
0x1233   : > { %4345 = vmax.xlane.f32.xlu1 %v4344_v5 }
0x1237   : > { %4348 = vmax.xlane.f32.xlu1 %v4347_v13 }
0x123b   : > { %4167 = vadd.xlane.f32.xlu1 %v4166_v14  ;;  %v7292_v14 = vadd.f32 %v7286_v46, %v4650_v61 }
0x123d   : > { %v4703_v49 = vsel %vm294_vm0, %v7292_v14, -inf }
0x123f   : > { %4170 = vadd.xlane.f32.xlu1 %v4169_v28  ;;  %v4675_v28 = vcombine.high %v4673_v31, %v4673_v31 }
0x12b8   : > { %v4340_v58 = vpop.xlane.xlu1 %4339 }
0x12b9   : > { %v4350_v3 = vsub.f32 %v4334_v35, %v4340_v58  ;;  %v7277_v35 = vrot.slane %v4666_v38, %v6381_v40 }
0x12bb   : > { %v4354_v57 = vmul.f32 1.442695, %v4350_v3  ;;  %v7283_v29 = vadd.f32 %v7277_v35, %v4650_v61  ;;  %v7303_v3 = vrot.slane %v4675_v28, %v6381_v40 }
0x12bc   : > { %v4343_v45 = vpop.xlane.xlu1 %4342 }
0x12bd   : > { %5968 = vpow2.f32 %v4354_v57  ;;  %v4351_v10 = vsub.f32 %v4335_v19, %v4343_v45  ;;  %v4224_v19 = vmul.f32 %v5967_v23, %v4210_v53  ;;  %v4700_v41 = vsel %vm294_vm0, %v7283_v29, -inf }
0x12be   : > { %5970 = vpow2.f32 %v4162_v54  ;;  %v7308_v45 = vadd.f32 %v7303_v3, %v4650_v61 }
0x12bf   : > { %v4356_v63 = vmul.f32 1.442695, %v4351_v10  ;;  %v4230_v5 = vsel %vm294_vm0, %v4224_v19, 0.0 }
0x12c0   : > { %v4346_v0 = vpop.xlane.xlu1 %4345 }
0x12c1   : > { %5972 = vpow2.f32 %v4356_v63  ;;  %v4352_v44 = vsub.f32 %v4336_v26, %v4346_v0  ;;  %v4674_v26 = vcombine.high %v4666_v38, %v4666_v38  ;;  %v4709_v63 = vsel %vm294_vm0, %v7308_v45, -inf }
0x12c2   : > { %5974 = vpow2.f32 %v4164_v9 }
0x12c3   : > { %v4358_v17 = vmul.f32 1.442695, %v4352_v44  ;;  %v7295_v23 = vrot.slane %v4674_v26, %v6381_v40  ;;  %v5354_v26 = vld.sshfl [vmem:[%s6374_s14 + $0x38] sm:$0x33 pattern:$0x75316420] }
0x12c4   : > { %v4349_v12 = vpop.xlane.xlu1 %4348 }
0x12c5   : > { %v4353_v22 = vsub.f32 %v4337_v62, %v4349_v12  ;;  %v4201_v62 = vcombine.high %v4193_v34, %v4193_v34  ;;  %v4698_v58 = vadd.f32 %v7295_v23, %v4650_v61 }
0x12c7   : > { %v7261_v1 = vpop.eup %5968  ;;  %v4360_v36 = vmul.f32 1.442695, %v4353_v22  ;;  %v4214_v32 = vrot.slane %v4201_v62, %v6381_v40  ;;  %v4706_v57 = vsel %vm294_vm0, %v4698_v58, -inf }
0x12c8   : > { %v4362_v37 = vsel %vm294_vm0, %v7261_v1, 0.0  ;;  %v5971_v6 = vpop.eup %5970  ;;  %v4374_v9 = vmul.f32 %v7261_v1, %v4206_v42  ;;  %v4168_v1 = vpop.xlane.xlu1 %4167 }
0x12c9   : > { %5976 = vpow2.f32 %v4360_v36  ;;  %4363 = vadd.xlane.f32.xlu1 %v4362_v37  ;;  %v4172_v50 = vsel %vm294_vm0, %v5971_v6, 0.0  ;;  %v4225_v52 = vmul.f32 %v5971_v6, %v4214_v32 }
0x12ca   : > { %5978 = vpow2.f32 %v4358_v17  ;;  %v4378_v0 = vsel %vm294_vm0, %v4374_v9, 0.0 }
0x12cb   : > { %v5973_v16 = vpop.eup %5972  ;;  %v4233_v10 = vsel %vm294_vm0, %v4225_v52, 0.0  ;;  %5980 = vrcp.f32 %v4168_v1 }
0x12cc   : > { %v4365_v25 = vsel %vm294_vm0, %v5973_v16, 0.0  ;;  %v5975_v47 = vpop.eup %5974  ;;  %v4375_v12 = vmul.f32 %v5973_v16, %v4210_v53  ;;  %v4171_v37 = vpop.xlane.xlu1 %4170 }
0x12cd   : > { %4173 = vadd.xlane.f32.xlu1 %v4172_v50  ;;  %4366 = vadd.xlane.f32.xlu0 %v4365_v25  ;;  %v4175_v15 = vsel %vm294_vm0, %v5975_v47, 0.0  ;;  %v4226_v36 = vmul.f32 %v5975_v47, %v4218_v27 }
0x12ce   : > { %v4381_v22 = vsel %vm294_vm0, %v4375_v12, 0.0 }
0x12cf   : > { %v4236_v59 = vsel %vm294_vm0, %v4226_v36, 0.0 }
0x12d1   : > { %4176 = vadd.xlane.f32.xlu1 %v4175_v15 }
0x12d3   : > { %v5977_v21 = vpop.eup %5976 }
0x12d4   : > { %v4377_v8 = vmul.f32 %v5977_v21, %v4218_v27  ;;  %v5979_v13 = vpop.eup %5978  ;;  %v4371_v54 = vsel %vm294_vm0, %v5977_v21, 0.0 }
0x12d5   : > { %4228 = vadd.xlane.f32.xlu1 %v4227_v11  ;;  %v4368_v4 = vsel %vm294_vm0, %v5979_v13, 0.0  ;;  %v4376_v56 = vmul.f32 %v5979_v13, %v4214_v32  ;;  %v5981_v18 = vpop.eup %5980 }
0x12d6   : > { %v4387_v48 = vsel %vm294_vm0, %v4377_v8, 0.0  ;;  %v4243_v8 = vmul.f32 %v5981_v18, %v4168_v1 }
0x12d7   : > { %4388 = vadd.xlane.f32.xlu0 %v4387_v48  ;;  %v4384_v44 = vsel %vm294_vm0, %v4376_v56, 0.0 }
0x12d8   : > { %v4247_v52 = vsub.f32 2.0, %v4243_v8 }
0x12d9   : > { %4231 = vadd.xlane.f32.xlu1 %v4230_v5 }
0x12da   : > { %v4251_v1 = vmul.f32 %v5981_v18, %v4247_v52 }
0x12db   : > { %4701 = vmax.xlane.f32.xlu0 %v4700_v41 }
0x12dd   : > { %4369 = vadd.xlane.f32.xlu1 %v4368_v4 }
0x12df   : > { %4704 = vmax.xlane.f32.xlu0 %v4703_v49 }
0x12e1   : > { %4372 = vadd.xlane.f32.xlu1 %v4371_v54  ;;  %v7329_v54 = vrot.slane %v5354_v26, %v6378_v39 }
0x12e3   : > { %4707 = vmax.xlane.f32.xlu0 %v4706_v57 }
0x12e5   : > { %4234 = vadd.xlane.f32.xlu1 %v4233_v10 }
0x12e7   : > { %4710 = vmax.xlane.f32.xlu0 %v4709_v63 }
0x12e9   : > { %4379 = vadd.xlane.f32.xlu1 %v4378_v0  ;;  %v4759_v0 = vcombine.high %v7329_v54, %v7329_v54 }
0x12ed   : > { %4382 = vadd.xlane.f32.xlu1 %v4381_v22 }
0x12f1   : > { %4385 = vadd.xlane.f32.xlu1 %v4384_v44 }
0x12f5   : > { %4237 = vadd.xlane.f32.xlu1 %v4236_v59 }
0x1356   : > { %v4364_v34 = vpop.xlane.xlu1 %4363 }
0x135a   : > { %v4174_v6 = vpop.xlane.xlu1 %4173  ;;  %v4367_v51 = vpop.xlane.xlu0 %4366 }
0x135b   : > { %5982 = vrcp.f32 %v4367_v51 }
0x135c   : > { %5984 = vrcp.f32 %v4171_v37 }
0x135d   : > { %5986 = vrcp.f32 %v4364_v34 }
0x135e   : > { %v4177_v17 = vpop.xlane.xlu1 %4176  ;;  %5988 = vrcp.f32 %v4174_v6 }
0x1362   : > { %v7318_v50 = vpop.xlane.xlu1 %4228 }
0x1363   : > { %v4255_v18 = vmul.f32 %v4251_v1, %v7318_v50 }
0x1364   : > { %v7320_v16 = vpop.xlane.xlu0 %4388 }
0x1365   : > { %v5983_v53 = vpop.eup %5982 }
0x1366   : > { %v4232_v25 = vpop.xlane.xlu1 %4231  ;;  %v5985_v30 = vpop.eup %5984  ;;  %v4395_v27 = vmul.f32 %v5983_v53, %v4367_v51 }
0x1367   : > { %v5987_v38 = vpop.eup %5986  ;;  %v4244_v19 = vmul.f32 %v5985_v30, %v4171_v37 }
0x1368   : > { %v7322_v42 = vpop.xlane.xlu0 %4701  ;;  %v5989_v61 = vpop.eup %5988  ;;  %v4394_v31 = vmul.f32 %v5987_v38, %v4364_v34  ;;  %v4399_v41 = vsub.f32 2.0, %v4395_v27  ;;  %v7339_v27 = vrot.slane %v4759_v0, %v6381_v40 }
0x1369   : > { %v4245_v5 = vmul.f32 %v5989_v61, %v4174_v6  ;;  %v4248_v57 = vsub.f32 2.0, %v4244_v19  ;;  %v4712_v43 = vsub.f32 %v7283_v29, %v7322_v42 }
0x136a   : > { %v4370_v47 = vpop.xlane.xlu1 %4369  ;;  %v4398_v10 = vsub.f32 2.0, %v4394_v31 }
0x136b   : > { %5990 = vrcp.f32 %v4370_v47  ;;  %v4249_v63 = vsub.f32 2.0, %v4245_v5  ;;  %v4252_v37 = vmul.f32 %v5985_v30, %v4248_v57 }
0x136c   : > { %5992 = vrcp.f32 %v4177_v17  ;;  %v7324_v24 = vpop.xlane.xlu0 %4704  ;;  %v4402_v34 = vmul.f32 %v5987_v38, %v4398_v10 }
0x136e   : > { %v4373_v15 = vpop.xlane.xlu1 %4372 }
0x136f   : > { %5994 = vrcp.f32 %v4373_v15 }
0x1370   : > { %v4708_v55 = vpop.xlane.xlu0 %4707 }
0x1371   : > { %v4714_v21 = vsub.f32 %v4698_v58, %v4708_v55  ;;  %v4744_v58 = vcombine.high %v5354_v26, %v5354_v26 }
0x1372   : > { %v4235_v11 = vpop.xlane.xlu1 %4234 }
0x1373   : > { %v4720_v48 = vmul.f32 1.442695, %v4714_v21  ;;  %v7334_v59 = vrot.slane %v4744_v58, %v6378_v39  ;;  %v4256_v21 = vmul.f32 %v4252_v37, %v4232_v25  ;;  %v4716_v37 = vmul.f32 1.442695, %v4712_v43 }
0x1374   : > { %v4711_v62 = vpop.xlane.xlu0 %4710 }
0x1375   : > { %v5991_v13 = vpop.eup %5990  ;;  %5996 = vpow2.f32 %v4720_v48  ;;  %v4715_v28 = vsub.f32 %v7308_v45, %v4711_v62  ;;  %v4403_v45 = vmul.f32 %v5983_v53, %v4399_v41  ;;  %v4760_v55 = vcombine.high %v7334_v59, %v7334_v59 }
0x1376   : > { %v5993_v4 = vpop.eup %5992  ;;  %v4396_v32 = vmul.f32 %v5991_v13, %v4370_v47  ;;  %v4380_v49 = vpop.xlane.xlu1 %4379  ;;  %v4253_v47 = vmul.f32 %v5989_v61, %v4249_v63  ;;  %v4421_v25 = vrot.slane %v4256_v21, %v6266_v33 }
0x1377   : > { %v4722_v9 = vmul.f32 1.442695, %v4715_v28  ;;  %v4246_v22 = vmul.f32 %v5993_v4, %v4177_v17  ;;  %v4406_v53 = vmul.f32 %v4402_v34, %v4380_v49  ;;  %v7345_v48 = vrot.slane %v4760_v55, %v6381_v40 }
0x1378   : > { %v4400_v56 = vsub.f32 2.0, %v4396_v32  ;;  %v4257_v19 = vmul.f32 %v4253_v47, %v4235_v11  ;;  %v4417_v28 = vrot.slane %v4255_v18, %v6266_v33  ;;  %v4713_v34 = vsub.f32 %v7292_v14, %v7324_v24 }
0x1379   : > { %v5995_v12 = vpop.eup %5994  ;;  %5998 = vpow2.f32 %v4722_v9  ;;  %v4250_v17 = vsub.f32 2.0, %v4246_v22  ;;  %v4441_v5 = vrot.slane %v4406_v53, %v6266_v33 }
0x137a   : > { %v4397_v44 = vmul.f32 %v5995_v12, %v4373_v15  ;;  %v4383_v36 = vpop.xlane.xlu1 %4382  ;;  %v4404_v15 = vmul.f32 %v5991_v13, %v4400_v56  ;;  %v4425_v50 = vrot.slane %v4257_v19, %v6266_v33  ;;  %v4430_v57 = vsel %vm1070_vm7, %v4421_v25, %v4417_v28 }
0x137b   : > { %v4407_v6 = vmul.f32 %v4403_v45, %v4383_v36  ;;  %v4254_v62 = vmul.f32 %v5993_v4, %v4250_v17  ;;  %v4817_v56 = vsel %vm6325_vm6, %v7230_v7, 0.0  ;;  %6000 = vpow2.f32 %v4716_v37 }
0x137c   : > { %v4401_v51 = vsub.f32 2.0, %v4397_v44  ;;  %v4431_v10 = vsel %vm1072_vm8, %v4425_v50, %v4430_v57  ;;  %v7381_v44 = vld [vmem:[%s7496_s4 + $0x8] ss:$0 sm:$0xff]  ;;  %v4718_v47 = vmul.f32 1.442695, %v4713_v34 }
0x137d   : > { %v4445_v30 = vrot.slane %v4407_v6, %v6266_v33 }
0x137e   : > { %v4405_v8 = vmul.f32 %v5995_v12, %v4401_v51  ;;  %v4386_v39 = vpop.xlane.xlu1 %4385  ;;  %6002 = vpow2.f32 %v4718_v47 }
0x137f   : > { %v5997_v31 = vpop.eup %5996  ;;  %v4408_v38 = vmul.f32 %v4404_v15, %v4386_v39  ;;  %v4454_v32 = vsel %vm1097_vm9, %v4445_v30, %v4441_v5 }
0x1380   : > { %v4409_v61 = vmul.f32 %v4405_v8, %v7320_v16  ;;  %v7348_v26 = vmul.f32 %v5997_v31, %v7339_v27  ;;  %v4730_v12 = vsel %vm294_vm0, %v5997_v31, 0.0 }
0x1381   : > { %v4449_v11 = vrot.slane %v4408_v38, %v6266_v33 }
0x1382   : > { %v4238_v13 = vpop.xlane.xlu1 %4237  ;;  %v4453_v16 = vrot.slane %v4409_v61, %v6266_v33 }
0x1383   : > { %v5999_v41 = vpop.eup %5998  ;;  %v4258_v49 = vmul.f32 %v4254_v62, %v4238_v13  ;;  %v4455_v58 = vsel %vm1099_vm10, %v4449_v11, %v4454_v32 }
0x1384   : > { %v7359_v52 = vmul.f32 %v5999_v41, %v7345_v48  ;;  %v4456_v63 = vsel %vm1101_vm12, %v4453_v16, %v4455_v58  ;;  %v4733_v53 = vsel %vm294_vm0, %v5999_v41, 0.0 }
0x1385   : > { %v4429_v4 = vrot.slane %v4258_v49, %v6266_v33  ;;  %v6001_v24 = vpop.eup %6000 }
0x1387   : > { %v4432_v9 = vsel %vm1074_vm11, %v4429_v4, %v4431_v10  ;;  %v4791_v10 = vsel %vm294_vm0, %v7348_v26, 0.0 }
0x1388   : > { %v4458_v0 = vsel %vm1104_vm13, %v4432_v9, %v4456_v63  ;;  %v6003_v17 = vpop.eup %6002 }
0x1389   : > { %4459 = vxpose.xlu1.b32.start.end [1/1] (short) (narrow) %v4458_v0, 8  ;;  %v4727_v21 = vsel %vm294_vm0, %v6003_v17, 0.0 }
0x13b0   : > { %4731 = vadd.xlane.f32.xlu1 %v4730_v12 }
0x1409   : > { %v4475_v22 = vpop.trf.xlu1 }
0x140a   : > { %5634 = vmatmul.mubr.msk.f32.vlgmr.msra.gmra.mrb[30].mxu0 %vm1142_vm14, %v4475_v22 }
0x140b   : > { %5726 = vmatpush3.bf16.xpose.msk.msra.mxu0 %vm6283_vm2, %v7523_v2  ;;  %5647 = vmatprep.mubr.msk.f32.mxu0 %vm6099_vm1, %v7517_v20 }
0x1412   : > { %5648 = vmatmul.mubr.msk.f32.vlgmr.msra.gmra.mrb[32].mxu0 %vm294_vm0, %v4817_v56  ;;  %v4794_v56 = vsel %vm294_vm0, %v7359_v52, 0.0 }
0x14dd   : > { %v4560_v45 = vpop.f32.mrb[30].mxu0 }
0x14de   : > { %v4561_v36 = vadd.f32 %v7381_v44, %v4560_v45  ;;  %v5635_v1 = vpop.f32.mrb[31].mxu0 }
0x14e0   : > { %5347 = vst.msk [vmem:[%s6545_s26 + $0x30] sm:$0xff] %vm1216_vm15, %v4561_v36 }
0x14e5   : > { %v4887_v20 = vpop.f32.mrb[32].mxu0 }
0x14e6   : > { %v4891_v2 = vmul.f32 0.35355338, %v4887_v20  ;;  %v5649_v60 = vpop.f32.mrb[33].mxu0  ;;  %v4732_v20 = vpop.xlane.xlu1 %4731 }
0x14e8   : > { %v4892_v7 = vadd.f32 %v4891_v2, %v7277_v35  ;;  %v4893_v51 = vadd.f32 %v4891_v2, %v7286_v46  ;;  %v4894_v29 = vadd.f32 %v4891_v2, %v7295_v23  ;;  %v4895_v35 = vadd.f32 %v4891_v2, %v7303_v3 }
0x14e9   : > { %v4724_v46 = vsel %vm294_vm0, %v6001_v24, 0.0  ;;  %v4764_v23 = vrot.slane %v7329_v54, %v6381_v40  ;;  %v4768_v3 = vrot.slane %v7334_v59, %v6381_v40 }
0x14ea   : > { %v4896_v6 = vsel %vm294_vm0, %v4892_v7, -inf  ;;  %v4899_v55 = vsel %vm294_vm0, %v4893_v51, -inf  ;;  %v4902_v42 = vsel %vm294_vm0, %v4894_v29, -inf  ;;  %v4905_v14 = vsel %vm294_vm0, %v4895_v35, -inf }
0x14eb   : > { %4897 = vmax.xlane.f32.xlu0 %v4896_v6  ;;  %v4781_v15 = vmul.f32 %v6001_v24, %v4764_v23  ;;  %v4782_v19 = vmul.f32 %v6003_v17, %v4768_v3 }
0x14ed   : > { %v4785_v8 = vsel %vm294_vm0, %v4781_v15, 0.0  ;;  %v4788_v39 = vsel %vm294_vm0, %v4782_v19, 0.0 }
0x14ef   : > { %4900 = vmax.xlane.f32.xlu0 %v4899_v55 }
0x14f3   : > { %4903 = vmax.xlane.f32.xlu0 %v4902_v42 }
0x14f7   : > { %4906 = vmax.xlane.f32.xlu0 %v4905_v14 }
0x14fb   : > { %4725 = vadd.xlane.f32.xlu0 %v4724_v46 }
0x14ff   : > { %4728 = vadd.xlane.f32.xlu0 %v4727_v21 }
0x1503   : > { %4734 = vadd.xlane.f32.xlu0 %v4733_v53 }
0x1507   : > { %4786 = vadd.xlane.f32.xlu0 %v4785_v8 }
0x150b   : > { %4789 = vadd.xlane.f32.xlu0 %v4788_v39 }
0x1578   : > { %v4898_v31 = vpop.xlane.xlu0 %4897 }
0x1579   : > { %v4908_v18 = vsub.f32 %v4892_v7, %v4898_v31 }
0x157b   : > { %v4912_v30 = vmul.f32 1.442695, %v4908_v18 }
0x157c   : > { %v4901_v38 = vpop.xlane.xlu0 %4900 }
0x157d   : > { %6004 = vpow2.f32 %v4912_v30  ;;  %v4909_v54 = vsub.f32 %v4893_v51, %v4901_v38 }
0x157f   : > { %v4914_v61 = vmul.f32 1.442695, %v4909_v54 }
0x1580   : > { %v4904_v25 = vpop.xlane.xlu0 %4903 }
0x1581   : > { %6006 = vpow2.f32 %v4914_v61  ;;  %v4910_v5 = vsub.f32 %v4894_v29, %v4904_v25 }
0x1583   : > { %v4916_v11 = vmul.f32 1.442695, %v4910_v5 }
0x1584   : > { %v4907_v40 = vpop.xlane.xlu0 %4906 }
0x1585   : > { %6008 = vpow2.f32 %v4916_v11  ;;  %v4911_v59 = vsub.f32 %v4895_v35, %v4907_v40 }
0x1587   : > { %v6005_v62 = vpop.eup %6004  ;;  %v4918_v50 = vmul.f32 1.442695, %v4911_v59 }
0x1588   : > { %v4920_v13 = vsel %vm294_vm0, %v6005_v62, 0.0  ;;  %v4932_v9 = vmul.f32 %v6005_v62, %v4764_v23  ;;  %v4726_v45 = vpop.xlane.xlu0 %4725 }
0x1589   : > { %6010 = vpow2.f32 %v4918_v50  ;;  %4921 = vadd.xlane.f32.xlu0 %v4920_v13 }
0x158a   : > { %v4936_v63 = vsel %vm294_vm0, %v4932_v9, 0.0  ;;  %6012 = vrcp.f32 %v4732_v20 }
0x158b   : > { %v6007_v41 = vpop.eup %6006 }
0x158c   : > { %v4923_v28 = vsel %vm294_vm0, %v6007_v41, 0.0  ;;  %v4933_v0 = vmul.f32 %v6007_v41, %v4768_v3  ;;  %v4729_v26 = vpop.xlane.xlu0 %4728 }
0x158d   : > { %4924 = vadd.xlane.f32.xlu0 %v4923_v28  ;;  %6014 = vrcp.f32 %v4729_v26 }
0x158e   : > { %v4939_v12 = vsel %vm294_vm0, %v4933_v0, 0.0  ;;  %6016 = vrcp.f32 %v4726_v45 }
0x158f   : > { %v6009_v16 = vpop.eup %6008 }
0x1590   : > { %v4926_v32 = vsel %vm294_vm0, %v6009_v16, 0.0  ;;  %v4934_v22 = vmul.f32 %v6009_v16, %v7339_v27  ;;  %v4735_v36 = vpop.xlane.xlu0 %4734 }
0x1591   : > { %4927 = vadd.xlane.f32.xlu0 %v4926_v32 }
0x1593   : > { %v6011_v49 = vpop.eup %6010 }
0x1594   : > { %v4929_v58 = vsel %vm294_vm0, %v6011_v49, 0.0  ;;  %v4935_v57 = vmul.f32 %v6011_v49, %v7345_v48  ;;  %v4942_v48 = vsel %vm294_vm0, %v4934_v22, 0.0  ;;  %v4787_v1 = vpop.xlane.xlu0 %4786  ;;  %v6013_v7 = vpop.eup %6012 }
0x1595   : > { %4930 = vadd.xlane.f32.xlu0 %v4929_v58  ;;  %v4803_v14 = vmul.f32 %v6013_v7, %v4732_v20 }
0x1596   : > { %v4945_v4 = vsel %vm294_vm0, %v4935_v57, 0.0 }
0x1597   : > { %4946 = vadd.xlane.f32.xlu1 %v4945_v4  ;;  %v6015_v37 = vpop.eup %6014  ;;  %v4807_v8 = vsub.f32 2.0, %v4803_v14 }
0x1598   : > { %v4790_v43 = vpop.xlane.xlu0 %4789  ;;  %v6017_v34 = vpop.eup %6016  ;;  %v4802_v47 = vmul.f32 %v6015_v37, %v4729_v26 }
0x1599   : > { %4792 = vadd.xlane.f32.xlu0 %v4791_v10  ;;  %v4801_v42 = vmul.f32 %v6017_v34, %v4726_v45  ;;  %v4811_v40 = vmul.f32 %v6013_v7, %v4807_v8 }
0x159a   : > { %v4806_v46 = vsub.f32 2.0, %v4802_v47 }
0x159b   : > { %v4805_v15 = vsub.f32 2.0, %v4801_v42 }
0x159c   : > { %v4810_v31 = vmul.f32 %v6015_v37, %v4806_v46 }
0x159d   : > { %4937 = vadd.xlane.f32.xlu0 %v4936_v63  ;;  %v4809_v61 = vmul.f32 %v6017_v34, %v4805_v15 }
0x159e   : > { %v4814_v62 = vmul.f32 %v4810_v31, %v4790_v43 }
0x159f   : > { %v4813_v32 = vmul.f32 %v4809_v61, %v4787_v1 }
0x15a0   : > { %v4979_v10 = vrot.slane %v4814_v62, %v6266_v33 }
0x15a1   : > { %4940 = vadd.xlane.f32.xlu0 %v4939_v12 }
0x15a5   : > { %4943 = vadd.xlane.f32.xlu0 %v4942_v48  ;;  %v4975_v48 = vrot.slane %v4813_v32, %v6266_v33 }
0x15a7   : > { %v4988_v1 = vsel %vm1070_vm7, %v4979_v10, %v4975_v48 }
0x15a9   : > { %4795 = vadd.xlane.f32.xlu0 %v4794_v56 }
0x1616   : > { %v4922_v2 = vpop.xlane.xlu0 %4921 }
0x1617   : > { %6018 = vrcp.f32 %v4922_v2 }
0x161a   : > { %v4925_v27 = vpop.xlane.xlu0 %4924 }
0x161b   : > { %6020 = vrcp.f32 %v4925_v27 }
0x161e   : > { %v4928_v60 = vpop.xlane.xlu0 %4927 }
0x161f   : > { %6022 = vrcp.f32 %v4928_v60 }
0x1620   : > { %6024 = vrcp.f32 %v4735_v36 }
0x1621   : > { %v6019_v6 = vpop.eup %6018 }
0x1622   : > { %v4931_v52 = vpop.xlane.xlu0 %4930  ;;  %v4952_v35 = vmul.f32 %v6019_v6, %v4922_v2 }
0x1623   : > { %6026 = vrcp.f32 %v4931_v52 }
0x1624   : > { %v4956_v3 = vsub.f32 2.0, %v4952_v35  ;;  %v4947_v49 = vpop.xlane.xlu1 %4946 }
0x1625   : > { %v6021_v51 = vpop.eup %6020 }
0x1626   : > { %v4953_v55 = vmul.f32 %v6021_v51, %v4925_v27  ;;  %v4793_v29 = vpop.xlane.xlu0 %4792  ;;  %v4960_v25 = vmul.f32 %v6019_v6, %v4956_v3 }
0x1627   : > { %v4815_v28 = vmul.f32 %v4811_v40, %v4793_v29 }
0x1628   : > { %v4957_v17 = vsub.f32 2.0, %v4953_v55 }
0x1629   : > { %v6023_v24 = vpop.eup %6022  ;;  %v4983_v12 = vrot.slane %v4815_v28, %v6266_v33 }
0x162a   : > { %v6025_v21 = vpop.eup %6024  ;;  %v4954_v23 = vmul.f32 %v6023_v24, %v4928_v60  ;;  %v4938_v53 = vpop.xlane.xlu0 %4937  ;;  %v4961_v30 = vmul.f32 %v6021_v51, %v4957_v17 }
0x162b   : > { %v4804_v39 = vmul.f32 %v6025_v21, %v4735_v36  ;;  %v4964_v50 = vmul.f32 %v4960_v25, %v4938_v53  ;;  %v4989_v20 = vsel %vm1072_vm8, %v4983_v12, %v4988_v1 }
0x162c   : > { %v4958_v18 = vsub.f32 2.0, %v4954_v23 }
0x162d   : > { %v6027_v19 = vpop.eup %6026  ;;  %v4808_v59 = vsub.f32 2.0, %v4804_v39  ;;  %v4999_v9 = vrot.slane %v4964_v50, %v6266_v33 }
0x162e   : > { %v4955_v38 = vmul.f32 %v6027_v19, %v4931_v52  ;;  %v4941_v54 = vpop.xlane.xlu0 %4940  ;;  %v4962_v13 = vmul.f32 %v6023_v24, %v4958_v18 }
0x162f   : > { %v4965_v5 = vmul.f32 %v4961_v30, %v4941_v54  ;;  %v4812_v0 = vmul.f32 %v6025_v21, %v4808_v59 }
0x1630   : > { %v4959_v11 = vsub.f32 2.0, %v4955_v38 }
0x1631   : > { %v5003_v58 = vrot.slane %v4965_v5, %v6266_v33 }
0x1632   : > { %v4963_v41 = vmul.f32 %v6027_v19, %v4959_v11  ;;  %v4944_v16 = vpop.xlane.xlu0 %4943 }
0x1633   : > { %v4966_v57 = vmul.f32 %v4962_v13, %v4944_v16  ;;  %v5012_v45 = vsel %vm1097_vm9, %v5003_v58, %v4999_v9 }
0x1634   : > { %v4967_v4 = vmul.f32 %v4963_v41, %v4947_v49 }
0x1635   : > { %v5007_v63 = vrot.slane %v4966_v57, %v6266_v33 }
0x1636   : > { %v4796_v22 = vpop.xlane.xlu0 %4795  ;;  %v5011_v56 = vrot.slane %v4967_v4, %v6266_v33 }
0x1637   : > { %v4816_v26 = vmul.f32 %v4812_v0, %v4796_v22  ;;  %v5013_v36 = vsel %vm1099_vm10, %v5007_v63, %v5012_v45 }
0x1638   : > { %v5014_v27 = vsel %vm1101_vm12, %v5011_v56, %v5013_v36 }
0x1639   : > { %v4987_v43 = vrot.slane %v4816_v26, %v6266_v33 }
0x163b   : > { %v4990_v2 = vsel %vm1074_vm11, %v4987_v43, %v4989_v20 }
0x163c   : > { %v5016_v60 = vsel %vm1104_vm13, %v4990_v2, %v5014_v27 }
0x163d   : > { %5017 = vxpose.xlu0.b32.start.end [1/1] (short) (narrow) %v5016_v60, 8 }
0x16bd   : > { %v5033_v7 = vpop.trf.xlu0 }
0x16be   : > { %5653 = vmatmul.mubr.msk.f32.vlgmr.msra.gmra.mrb[36].mxu1 %vm1142_vm14, %v5033_v7 }
0x1791   : > { %v5118_v37 = vpop.f32.mrb[36].mxu1 }
0x1792   : > { %v5119_v33 = vadd.f32 %v7381_v44, %v5118_v37  ;;  %v5654_v52 = vpop.f32.mrb[37].mxu1 }
0x1794   : > { %5359 = vst.msk [vmem:[%s6545_s26 + $0x38] sm:$0xff] %vm1216_vm15, %v5119_v33 }
0x1795   : > { %6047 = shalt.err (!%p6044_p4)
}
0x1796   : > { %s6048_s16 = scalar_lea.hbm %s7442_s7, 1024  ;;  %s6052_s12 = scalar_lea.hbm %s7497_s5, 2048 }
0x1797   : > { %p6049_p7 = scmp.ne.s32.totalorder %s7442_s7, %s6048_s16  ;;  %p6053_p10 = scmp.lt.u32.totalorder %s7442_s7, %s7497_s5 }
0x1798   : > { %p6054_p11 = scmp.lt.u32.totalorder %s6052_s12, %s6048_s16  ;;  %p6056_p13 = scmp.lt.u32.totalorder %s6048_s16, %s7442_s7 }
0x1799   : > { %p6050_p8 = pnand %p6049_p7, %p6173_p5 }
0x179a   : > { %p6055_p12 = por %p6054_p11, %p6053_p10 }
0x179b   : > { %p6051_p9 = pneg %p6050_p8 }
0x179c   : > { %p6057_p0 = por %p6056_p13, %p6055_p12 }
0x179e   : > { %p6058_p1 = pnand %p6057_p0, %p6051_p9 }
0x17a0   : > { %6061 = shalt.err (!%p6058_p1)
}
0x17a1   : > { %s6103_s17 = smov 128   ;;  %s6104_s23 = smov 8  }
0x17a2   : > { %5727 = dma.vmem_to_hbm [thread:$0]  (%p6173_p5), %s7444_s25, 1024, %s7442_s7, %s7451_s8, %s6103_s17, %s6103_s17, %s6104_s23  }
0x17a3 PF: > { %p5733_p2 = scmp.ge.s32.totalorder %s6096_s21, 2  ;;  %s5153_s30 = sand.u32 1, %s6084_s18  }
0x17a4   : > { %s5154_s6 = scalar_lea.sflag [#allocation3], %s5153_s30 }
0x17a5   : > { %p5730_p3 = pnand %p5733_p2, %p6177_p6 }
0x17a7   : > { %6079 = dma.done.wait (!%p5730_p3), %s5154_s6, 1024  }
0x17a8   : > { %6081 = vsyncadd (!%p5730_p3), %s5154_s6, 4294966272  ;;  %p15_p4 = scmp.ge.s32.totalorder %s6160_s24, 4   ;;  %s7525_s18 = smov %s6088_s19 }
0x17a9   : > { %s7526_s19 = smov %s6092_s20  ;;  %s7527_s20 = smov %s6171_s27 }
0x17aa   : > { %s7528_s21 = smov %s6160_s24  ;;  %17 = sbr.rel (!%p15_p4) target bundleno = 3 (0x3), region = 104 }
0x17b1   :  { %5159 = vsyncpa [#allocation3], 1 }
0x17b2   :  { %5161 = vsyncpa [#allocation3 + $0x1], 1 }

</bundles_post_ra>
